<compile_context>
chip_gen: v7x
topology: tpu7x:2x2x1
jax: 0.10.0
libtpu: 0.0.40
codegen_flags: <defaults>
</compile_context>

<pallas_src>
import functools
import math

import jax
import jax.numpy as jnp
from jax import lax
from jax.experimental import pallas as pl
from jax.experimental.pallas import tpu as pltpu


# -----------------------------------------------------------------------------
# Fused kernel.
# Packed gate layout (8H = 512 lanes): [i_f i_b | f_f f_b | g_f g_b | o_f o_b]
# so each gate slice is a full 2H = 128-lane chunk covering both directions.
# All activations are kept time-major: row r = t*B + b.
# -----------------------------------------------------------------------------
def _ner_kernel(ids_ref, emb_ref,
                w_in0_ref, b0_ref, wr0_ref,
                w_in1_ref, b1_ref, wr1_ref,
                wqkv_ref, bqkv_ref, wfc_ref, bfc_ref,
                out_ref,
                hs_ref, hr_ref, *, B, T, H):
    G = 2 * H                    # per-gate width in the paired layout (fwd|bwd)
    F = 2 * H                    # bi-LSTM feature size
    Vp = emb_ref.shape[0]        # padded vocab (multiple of 128)

    # ---- embedding lookup as a single one-hot MXU matmul (time-major rows) ---
    ids = ids_ref[...]                                             # (T*B, 1) int32
    onehot = (lax.broadcasted_iota(jnp.int32, (T * B, Vp), 1) == ids
              ).astype(jnp.bfloat16)                               # (T*B, Vp)
    x = jnp.dot(onehot, emb_ref[...],
                preferred_element_type=jnp.float32)                # (T*B, E)

    # hoisted lane masks
    gate_fwd = (lax.broadcasted_iota(jnp.int32, (B, 8 * H), 1) % G) < H
    out_fwd = lax.broadcasted_iota(jnp.int32, (T * B, F), 1) < H

    # ---- one fused bidirectional LSTM layer ----------------------------------
    def bilstm(x_flat, w_in_ref, b_ref, wr_ref):
        # ONE dense input projection for all timesteps & both directions;
        # bias (b_ih + b_hh, both directions) folded in once.
        gi = (jnp.dot(x_flat.astype(jnp.bfloat16), w_in_ref[...],
                      preferred_element_type=jnp.float32)
              + b_ref[...])                                        # (T*B, 8H)

        h = jnp.zeros((B, F), jnp.float32)                         # [h_fwd | h_bwd]
        c = jnp.zeros((B, F), jnp.float32)
        for t in range(T):                                         # unrolled (T static)
            # fwd lanes take x[t], bwd lanes take x[T-1-t] (bias identical in both)
            gi_t = gi[t * B:(t + 1) * B, :]
            gi_r = gi[(T - 1 - t) * B:(T - t) * B, :]
            gates = (jnp.where(gate_fwd, gi_t, gi_r)
                     + jnp.dot(h.astype(jnp.bfloat16), wr_ref[...],
                               preferred_element_type=jnp.float32))        # (B, 8H)
            i_g = jax.nn.sigmoid(gates[:, 0 * G:1 * G])            # 128-lane aligned
            f_g = jax.nn.sigmoid(gates[:, 1 * G:2 * G])
            g_g = jnp.tanh(gates[:, 2 * G:3 * G])
            o_g = jax.nn.sigmoid(gates[:, 3 * G:4 * G])
            c = f_g * c + i_g * g_g
            h = o_g * jnp.tanh(c)
            hs_ref[t * B:(t + 1) * B, :] = h                       # step order
            hr_ref[(T - 1 - t) * B:(T - t) * B, :] = h             # time-reversed order
        # one-pass re-alignment: y[t] = [h_fwd(t) | h_bwd(t)]  (single vselect)
        return jnp.where(out_fwd, hs_ref[...], hr_ref[...])        # (T*B, 2H)

    y = bilstm(x, w_in0_ref, b0_ref, wr0_ref)                      # layer 0
    y = bilstm(y, w_in1_ref, b1_ref, wr1_ref)                      # layer 1

    # ---- self-attention: fused QKV projection + block-diagonal batch mask ----
    qkv = (jnp.dot(y.astype(jnp.bfloat16), wqkv_ref[...],
                   preferred_element_type=jnp.float32)
           + bqkv_ref[...])                                        # (T*B, 3F)
    q = qkv[:, 0 * F:1 * F].astype(jnp.bfloat16)                   # 1/sqrt(F) pre-folded
    k = qkv[:, 1 * F:2 * F].astype(jnp.bfloat16)
    v = qkv[:, 2 * F:3 * F]
    scores = lax.dot_general(q, k, (((1,), (1,)), ((), ())),
                             preferred_element_type=jnp.float32)   # (T*B, T*B)
    # rows/cols interleave batch elements (row = t*B + b); mask cross-batch pairs
    r_id = lax.broadcasted_iota(jnp.int32, (T * B, T * B), 0)
    c_id = lax.broadcasted_iota(jnp.int32, (T * B, T * B), 1)
    scores = jnp.where((r_id % B) == (c_id % B), scores, -1e9)
    scores = scores - jnp.max(scores, axis=-1, keepdims=True)
    e = jnp.exp(scores)                                            # masked cols -> 0
    attn = e / jnp.sum(e, axis=-1, keepdims=True)
    ctx = jnp.dot(attn, v, preferred_element_type=jnp.float32)     # (T*B, F)

    # ---- final linear, padded to a lane-dense 128-wide output ----------------
    out_ref[...] = (jnp.dot(ctx.astype(jnp.bfloat16), wfc_ref[...],
                            preferred_element_type=jnp.float32)
                    + bfc_ref[...])                                # (T*B, 128)


def lstm_ner_forward(token_ids, packed):
    """token_ids: (B, T) int32.  Returns (B, T, tagset) f32 logits."""
    B, T = token_ids.shape
    H = packed["w_rec0"].shape[0] // 2
    tagset = packed["tagset_size"]
    ts_pad = packed["wfc"].shape[1]

    # layout plumbing done in the wrapper (outside the kernel): time-major ids in
    ids_tm = jnp.transpose(token_ids).reshape(T * B, 1).astype(jnp.int32)

    kernel = functools.partial(_ner_kernel, B=B, T=T, H=H)
    vmem = pl.BlockSpec(memory_space=pltpu.MemorySpace.VMEM)
    out = pl.pallas_call(
        kernel,
        out_shape=jax.ShapeDtypeStruct((T * B, ts_pad), jnp.float32),
        in_specs=[vmem] * 12,
        out_specs=vmem,
        scratch_shapes=[pltpu.VMEM((T * B, 2 * H), jnp.float32)] * 2,
        compiler_params=pltpu.CompilerParams(
            vmem_limit_bytes=32 * 1024 * 1024),
    )(ids_tm,
      packed["embedding"],
      packed["w_in0"], packed["b0"], packed["w_rec0"],
      packed["w_in1"], packed["b1"], packed["w_rec1"],
      packed["wqkv"], packed["bqkv"], packed["wfc"], packed["bfc"])

    # (T*B, 128) time-major -> (B, T, tagset); tiny XLA-side transpose/slice.
    out = out.reshape(T, B, ts_pad)[:, :, :tagset]
    return jnp.transpose(out, (1, 0, 2))


# -----------------------------------------------------------------------------
# Parameter init (PyTorch-like) + one-time packing into the fused layouts.
# -----------------------------------------------------------------------------
def init_params(key, vocab_size, tagset_size, embed_dim, hidden_dim):
    ks = iter(jax.random.split(key, 32))
    H, F = hidden_dim, 2 * hidden_dim
    u = lambda k, shape, s: jax.random.uniform(k, shape, jnp.float32, -s, s)
    stdv = 1.0 / math.sqrt(H)

    def lstm_dir_params(d_in):
        w_ih = u(next(ks), (d_in, 4 * H), stdv)
        w_hh = u(next(ks), (H, 4 * H), stdv)
        b = u(next(ks), (1, 4 * H), stdv) + u(next(ks), (1, 4 * H), stdv)  # b_ih+b_hh
        return (w_ih, w_hh, b)

    params = {
        "hidden_dim": hidden_dim,
        "embedding": jax.random.normal(next(ks), (vocab_size, embed_dim),
                                       jnp.float32),
        "lstm0_fwd": lstm_dir_params(embed_dim),
        "lstm0_bwd": lstm_dir_params(embed_dim),
        "lstm1_fwd": lstm_dir_params(F),
        "lstm1_bwd": lstm_dir_params(F),
    }
    s_lin = 1.0 / math.sqrt(F)
    for name in ("q", "k", "v"):
        params["w" + name] = u(next(ks), (F, F), s_lin)
        params["b" + name] = u(next(ks), (1, F), s_lin)
    params["wfc"] = u(next(ks), (F, tagset_size), s_lin)
    params["bfc"] = u(next(ks), (1, tagset_size), s_lin)
    return params


def _spread_gates(w, side, H):
    """(rows, 4H) [i|f|g|o] -> (rows, 8H) paired layout, this direction's slots."""
    rows = w.shape[0]
    out = jnp.zeros((rows, 8 * H), w.dtype)
    for g in range(4):
        off = g * 2 * H + side * H
        out = out.at[:, off:off + H].set(w[:, g * H:(g + 1) * H])
    return out


def pack_params(params):
    H = params["hidden_dim"]
    F = 2 * H
    packed = {}

    # embedding: bf16, vocab padded to a multiple of 128 (lane-dense one-hot K)
    emb = params["embedding"]
    vocab, E = emb.shape
    vp = ((vocab + 127) // 128) * 128
    packed["embedding"] = jnp.zeros((vp, E), jnp.bfloat16).at[:vocab].set(
        emb.astype(jnp.bfloat16))

    for layer in (0, 1):
        w_ih_f, w_hh_f, b_f = params[f"lstm{layer}_fwd"]
        w_ih_b, w_hh_b, b_b = params[f"lstm{layer}_bwd"]
        # fwd/bwd occupy complementary lane slots -> ONE dense input projection
        packed[f"w_in{layer}"] = (_spread_gates(w_ih_f, 0, H)
                                  + _spread_gates(w_ih_b, 1, H)).astype(jnp.bfloat16)
        packed[f"b{layer}"] = (_spread_gates(b_f, 0, H)
                               + _spread_gates(b_b, 1, H)).astype(jnp.float32)
        packed[f"w_rec{layer}"] = jnp.concatenate(
            [_spread_gates(w_hh_f, 0, H), _spread_gates(w_hh_b, 1, H)],
            axis=0).astype(jnp.bfloat16)                            # (2H, 8H)

    # fused QKV weight; 1/sqrt(F) folded into wq/bq at pack time
    scale = 1.0 / math.sqrt(float(F))
    packed["wqkv"] = jnp.concatenate(
        [params["wq"] * scale, params["wk"], params["wv"]],
        axis=1).astype(jnp.bfloat16)                                # (F, 3F)
    packed["bqkv"] = jnp.concatenate(
        [params["bq"] * scale, params["bk"], params["bv"]],
        axis=1).astype(jnp.float32)                                 # (1, 3F)

    # fc padded to 128 output lanes (lane-dense stores); wrapper slices back
    tagset = params["wfc"].shape[1]
    ts_pad = ((tagset + 127) // 128) * 128
    packed["wfc"] = jnp.zeros((F, ts_pad), jnp.bfloat16).at[:, :tagset].set(
        params["wfc"].astype(jnp.bfloat16))
    packed["bfc"] = jnp.zeros((1, ts_pad), jnp.float32).at[:, :tagset].set(
        params["bfc"])
    packed["tagset_size"] = tagset
    return packed


if __name__ == "__main__":
    B, T = 2, 8
    vocab_size, tagset_size = 50, 8
    embed_dim, hidden_dim = 128, 64

    key = jax.random.PRNGKey(0)
    k_param, k_tok = jax.random.split(key)
    params = init_params(k_param, vocab_size, tagset_size, embed_dim, hidden_dim)
    packed = pack_params(params)                     # one-time weight repack
    token_ids = jax.random.randint(k_tok, (B, T), 0, vocab_size, dtype=jnp.int32)

    logits = lstm_ner_forward(token_ids, packed)
    jax.block_until_ready(logits)
    assert logits.shape == (B, T, tagset_size)
    assert jnp.all(jnp.isfinite(logits))
    print("KERNEL_OK")
</pallas_src>

<mosaic_0001>
module attributes {stable_mosaic.version = 11 : i64} {
  func.func @_ner_kernel(%arg0: memref<16x1xi32, #tpu.memory_space<vmem>>, %arg1: memref<128x128xbf16, #tpu.memory_space<vmem>>, %arg2: memref<128x512xbf16, #tpu.memory_space<vmem>>, %arg3: memref<1x512xf32, #tpu.memory_space<vmem>>, %arg4: memref<128x512xbf16, #tpu.memory_space<vmem>>, %arg5: memref<128x512xbf16, #tpu.memory_space<vmem>>, %arg6: memref<1x512xf32, #tpu.memory_space<vmem>>, %arg7: memref<128x512xbf16, #tpu.memory_space<vmem>>, %arg8: memref<128x384xbf16, #tpu.memory_space<vmem>>, %arg9: memref<1x384xf32, #tpu.memory_space<vmem>>, %arg10: memref<128x128xbf16, #tpu.memory_space<vmem>>, %arg11: memref<1x128xf32, #tpu.memory_space<vmem>>, %arg12: memref<16x128xf32, #tpu.memory_space<vmem>>, %arg13: memref<16x128xf32, #tpu.memory_space<vmem>>, %arg14: memref<16x128xf32, #tpu.memory_space<vmem>>) attributes {dimension_semantics = [], scalar_prefetch = 0 : i64, scratch_operands = 2 : i64, tpu.core_type = #tpu.core_type<tc>} {
    %c0 = arith.constant 0 : index
    %c0_0 = arith.constant 0 : index
    %0 = vector.load %arg0[%c0, %c0_0] : memref<16x1xi32, #tpu.memory_space<vmem>>, vector<16x1xi32>
    %1 = tpu.iota {dimensions = array<i32: 1>} : vector<16x128xi32>
    %2 = vector.broadcast %0 : vector<16x1xi32> to vector<16x128xi32>
    %3 = arith.cmpi eq, %1, %2 : vector<16x128xi32>
    %4 = arith.extui %3 : vector<16x128xi1> to vector<16x128xi32>
    %5 = arith.sitofp %4 : vector<16x128xi32> to vector<16x128xf32>
    %6 = arith.truncf %5 : vector<16x128xf32> to vector<16x128xbf16>
    %c0_1 = arith.constant 0 : index
    %c0_2 = arith.constant 0 : index
    %7 = vector.load %arg1[%c0_1, %c0_2] : memref<128x128xbf16, #tpu.memory_space<vmem>>, vector<128x128xbf16>
    %cst = arith.constant dense<0.000000e+00> : vector<16x128xf32>
    %8 = tpu.matmul %6, %7, %cst {dimension_numbers = #tpu.dot_dimension_numbers<[1], [0], [0], [1], [0, 0, 1, 1], [], []>} : vector<16x128xbf16>, vector<128x128xbf16>, vector<16x128xf32> -> vector<16x128xf32>
    %9 = tpu.iota {dimensions = array<i32: 1>} : vector<2x512xi32>
    %c128_i32 = arith.constant 128 : i32
    %c0_i32 = arith.constant 0 : i32
    %10 = arith.cmpi eq, %c128_i32, %c0_i32 : i32
    %c1_i32 = arith.constant 1 : i32
    %11 = arith.select %10, %c1_i32, %c128_i32 : i32
    %12 = vector.broadcast %11 : i32 to vector<2x512xi32>
    %13 = arith.remsi %9, %12 : vector<2x512xi32>
    %c0_i32_3 = arith.constant 0 : i32
    %14 = vector.broadcast %c0_i32_3 : i32 to vector<2x512xi32>
    %15 = arith.cmpi ne, %13, %14 : vector<2x512xi32>
    %c0_i32_4 = arith.constant 0 : i32
    %16 = vector.broadcast %c0_i32_4 : i32 to vector<2x512xi32>
    %17 = arith.cmpi slt, %13, %16 : vector<2x512xi32>
    %c0_i32_5 = arith.constant 0 : i32
    %18 = arith.cmpi slt, %11, %c0_i32_5 : i32
    %19 = vector.broadcast %18 : i1 to vector<2x512xi1>
    %20 = vector.broadcast %19 : vector<2x512xi1> to vector<2x512xi1>
    %21 = arith.xori %17, %20 : vector<2x512xi1>
    %22 = arith.andi %21, %15 : vector<2x512xi1>
    %23 = vector.broadcast %11 : i32 to vector<2x512xi32>
    %24 = arith.addi %13, %23 : vector<2x512xi32>
    %25 = arith.select %22, %24, %13 : vector<2x512xi1>, vector<2x512xi32>
    %c64_i32 = arith.constant 64 : i32
    %26 = vector.broadcast %c64_i32 : i32 to vector<2x512xi32>
    %27 = arith.cmpi slt, %25, %26 : vector<2x512xi32>
    %28 = tpu.iota {dimensions = array<i32: 1>} : vector<16x128xi32>
    %c64_i32_6 = arith.constant 64 : i32
    %29 = vector.broadcast %c64_i32_6 : i32 to vector<16x128xi32>
    %30 = arith.cmpi slt, %28, %29 : vector<16x128xi32>
    %31 = arith.truncf %8 : vector<16x128xf32> to vector<16x128xbf16>
    %c0_7 = arith.constant 0 : index
    %c0_8 = arith.constant 0 : index
    %32 = vector.load %arg2[%c0_7, %c0_8] : memref<128x512xbf16, #tpu.memory_space<vmem>>, vector<128x512xbf16>
    %cst_9 = arith.constant dense<0.000000e+00> : vector<16x512xf32>
    %33 = tpu.matmul %31, %32, %cst_9 {dimension_numbers = #tpu.dot_dimension_numbers<[1], [0], [0], [1], [0, 0, 1, 1], [], []>} : vector<16x128xbf16>, vector<128x512xbf16>, vector<16x512xf32> -> vector<16x512xf32>
    %c0_10 = arith.constant 0 : index
    %c0_11 = arith.constant 0 : index
    %34 = vector.load %arg3[%c0_10, %c0_11] : memref<1x512xf32, #tpu.memory_space<vmem>>, vector<1x512xf32>
    %35 = vector.broadcast %34 : vector<1x512xf32> to vector<16x512xf32>
    %36 = arith.addf %33, %35 : vector<16x512xf32>
    %cst_12 = arith.constant 0.000000e+00 : f32
    %37 = vector.broadcast %cst_12 : f32 to vector<2x128xf32>
    %cst_13 = arith.constant 0.000000e+00 : f32
    %38 = vector.broadcast %cst_13 : f32 to vector<2x128xf32>
    %39 = vector.extract_strided_slice %36 {offsets = [0, 0], sizes = [2, 512], strides = [1, 1]} : vector<16x512xf32> to vector<2x512xf32>
    %40 = vector.extract_strided_slice %36 {offsets = [14, 0], sizes = [2, 512], strides = [1, 1]} : vector<16x512xf32> to vector<2x512xf32>
    %41 = arith.select %27, %39, %40 : vector<2x512xi1>, vector<2x512xf32>
    %42 = arith.truncf %37 : vector<2x128xf32> to vector<2x128xbf16>
    %c0_14 = arith.constant 0 : index
    %c0_15 = arith.constant 0 : index
    %43 = vector.load %arg4[%c0_14, %c0_15] : memref<128x512xbf16, #tpu.memory_space<vmem>>, vector<128x512xbf16>
    %cst_16 = arith.constant dense<0.000000e+00> : vector<2x512xf32>
    %44 = tpu.matmul %42, %43, %cst_16 {dimension_numbers = #tpu.dot_dimension_numbers<[1], [0], [0], [1], [0, 0, 1, 1], [], []>} : vector<2x128xbf16>, vector<128x512xbf16>, vector<2x512xf32> -> vector<2x512xf32>
    %45 = arith.addf %41, %44 : vector<2x512xf32>
    %46 = vector.extract_strided_slice %45 {offsets = [0, 0], sizes = [2, 128], strides = [1, 1]} : vector<2x512xf32> to vector<2x128xf32>
    %47 = arith.negf %46 : vector<2x128xf32>
    %48 = math.exp %47 : vector<2x128xf32>
    %cst_17 = arith.constant 1.000000e+00 : f32
    %49 = vector.broadcast %cst_17 : f32 to vector<2x128xf32>
    %50 = arith.addf %49, %48 : vector<2x128xf32>
    %51 = arith.divf %49, %50 : vector<2x128xf32>
    %52 = vector.extract_strided_slice %45 {offsets = [0, 128], sizes = [2, 128], strides = [1, 1]} : vector<2x512xf32> to vector<2x128xf32>
    %53 = arith.negf %52 : vector<2x128xf32>
    %54 = math.exp %53 : vector<2x128xf32>
    %cst_18 = arith.constant 1.000000e+00 : f32
    %55 = vector.broadcast %cst_18 : f32 to vector<2x128xf32>
    %56 = arith.addf %55, %54 : vector<2x128xf32>
    %57 = arith.divf %55, %56 : vector<2x128xf32>
    %58 = vector.extract_strided_slice %45 {offsets = [0, 256], sizes = [2, 128], strides = [1, 1]} : vector<2x512xf32> to vector<2x128xf32>
    %59 = math.tanh %58 : vector<2x128xf32>
    %60 = vector.extract_strided_slice %45 {offsets = [0, 384], sizes = [2, 128], strides = [1, 1]} : vector<2x512xf32> to vector<2x128xf32>
    %61 = arith.negf %60 : vector<2x128xf32>
    %62 = math.exp %61 : vector<2x128xf32>
    %cst_19 = arith.constant 1.000000e+00 : f32
    %63 = vector.broadcast %cst_19 : f32 to vector<2x128xf32>
    %64 = arith.addf %63, %62 : vector<2x128xf32>
    %65 = arith.divf %63, %64 : vector<2x128xf32>
    %66 = arith.mulf %57, %38 : vector<2x128xf32>
    %67 = arith.mulf %51, %59 : vector<2x128xf32>
    %68 = arith.addf %66, %67 : vector<2x128xf32>
    %69 = math.tanh %68 : vector<2x128xf32>
    %70 = arith.mulf %65, %69 : vector<2x128xf32>
    %c0_20 = arith.constant 0 : index
    %c0_21 = arith.constant 0 : index
    %71 = vector.load %arg13[%c0_20, %c0_21] : memref<16x128xf32, #tpu.memory_space<vmem>>, vector<2x128xf32>
    tpu.vector_store %arg13[%c0_20, %c0_21], %70 {strides = array<i32>} : memref<16x128xf32, #tpu.memory_space<vmem>>, vector<2x128xf32>,
    %c14 = arith.constant 14 : index
    %c0_22 = arith.constant 0 : index
    %72 = vector.load %arg14[%c14, %c0_22] : memref<16x128xf32, #tpu.memory_space<vmem>>, vector<2x128xf32>
    tpu.vector_store %arg14[%c14, %c0_22], %70 {strides = array<i32>} : memref<16x128xf32, #tpu.memory_space<vmem>>, vector<2x128xf32>,
    %73 = vector.extract_strided_slice %36 {offsets = [2, 0], sizes = [2, 512], strides = [1, 1]} : vector<16x512xf32> to vector<2x512xf32>
    %74 = vector.extract_strided_slice %36 {offsets = [12, 0], sizes = [2, 512], strides = [1, 1]} : vector<16x512xf32> to vector<2x512xf32>
    %75 = arith.select %27, %73, %74 : vector<2x512xi1>, vector<2x512xf32>
    %76 = arith.truncf %70 : vector<2x128xf32> to vector<2x128xbf16>
    %c0_23 = arith.constant 0 : index
    %c0_24 = arith.constant 0 : index
    %77 = vector.load %arg4[%c0_23, %c0_24] : memref<128x512xbf16, #tpu.memory_space<vmem>>, vector<128x512xbf16>
    %cst_25 = arith.constant dense<0.000000e+00> : vector<2x512xf32>
    %78 = tpu.matmul %76, %77, %cst_25 {dimension_numbers = #tpu.dot_dimension_numbers<[1], [0], [0], [1], [0, 0, 1, 1], [], []>} : vector<2x128xbf16>, vector<128x512xbf16>, vector<2x512xf32> -> vector<2x512xf32>
    %79 = arith.addf %75, %78 : vector<2x512xf32>
    %80 = vector.extract_strided_slice %79 {offsets = [0, 0], sizes = [2, 128], strides = [1, 1]} : vector<2x512xf32> to vector<2x128xf32>
    %81 = arith.negf %80 : vector<2x128xf32>
    %82 = math.exp %81 : vector<2x128xf32>
    %cst_26 = arith.constant 1.000000e+00 : f32
    %83 = vector.broadcast %cst_26 : f32 to vector<2x128xf32>
    %84 = arith.addf %83, %82 : vector<2x128xf32>
    %85 = arith.divf %83, %84 : vector<2x128xf32>
    %86 = vector.extract_strided_slice %79 {offsets = [0, 128], sizes = [2, 128], strides = [1, 1]} : vector<2x512xf32> to vector<2x128xf32>
    %87 = arith.negf %86 : vector<2x128xf32>
    %88 = math.exp %87 : vector<2x128xf32>
    %cst_27 = arith.constant 1.000000e+00 : f32
    %89 = vector.broadcast %cst_27 : f32 to vector<2x128xf32>
    %90 = arith.addf %89, %88 : vector<2x128xf32>
    %91 = arith.divf %89, %90 : vector<2x128xf32>
    %92 = vector.extract_strided_slice %79 {offsets = [0, 256], sizes = [2, 128], strides = [1, 1]} : vector<2x512xf32> to vector<2x128xf32>
    %93 = math.tanh %92 : vector<2x128xf32>
    %94 = vector.extract_strided_slice %79 {offsets = [0, 384], sizes = [2, 128], strides = [1, 1]} : vector<2x512xf32> to vector<2x128xf32>
    %95 = arith.negf %94 : vector<2x128xf32>
    %96 = math.exp %95 : vector<2x128xf32>
    %cst_28 = arith.constant 1.000000e+00 : f32
    %97 = vector.broadcast %cst_28 : f32 to vector<2x128xf32>
    %98 = arith.addf %97, %96 : vector<2x128xf32>
    %99 = arith.divf %97, %98 : vector<2x128xf32>
    %100 = arith.mulf %91, %68 : vector<2x128xf32>
    %101 = arith.mulf %85, %93 : vector<2x128xf32>
    %102 = arith.addf %100, %101 : vector<2x128xf32>
    %103 = math.tanh %102 : vector<2x128xf32>
    %104 = arith.mulf %99, %103 : vector<2x128xf32>
    %c2 = arith.constant 2 : index
    %c0_29 = arith.constant 0 : index
    %105 = vector.load %arg13[%c2, %c0_29] : memref<16x128xf32, #tpu.memory_space<vmem>>, vector<2x128xf32>
    tpu.vector_store %arg13[%c2, %c0_29], %104 {strides = array<i32>} : memref<16x128xf32, #tpu.memory_space<vmem>>, vector<2x128xf32>,
    %c12 = arith.constant 12 : index
    %c0_30 = arith.constant 0 : index
    %106 = vector.load %arg14[%c12, %c0_30] : memref<16x128xf32, #tpu.memory_space<vmem>>, vector<2x128xf32>
    tpu.vector_store %arg14[%c12, %c0_30], %104 {strides = array<i32>} : memref<16x128xf32, #tpu.memory_space<vmem>>, vector<2x128xf32>,
    %107 = vector.extract_strided_slice %36 {offsets = [4, 0], sizes = [2, 512], strides = [1, 1]} : vector<16x512xf32> to vector<2x512xf32>
    %108 = vector.extract_strided_slice %36 {offsets = [10, 0], sizes = [2, 512], strides = [1, 1]} : vector<16x512xf32> to vector<2x512xf32>
    %109 = arith.select %27, %107, %108 : vector<2x512xi1>, vector<2x512xf32>
    %110 = arith.truncf %104 : vector<2x128xf32> to vector<2x128xbf16>
    %c0_31 = arith.constant 0 : index
    %c0_32 = arith.constant 0 : index
    %111 = vector.load %arg4[%c0_31, %c0_32] : memref<128x512xbf16, #tpu.memory_space<vmem>>, vector<128x512xbf16>
    %cst_33 = arith.constant dense<0.000000e+00> : vector<2x512xf32>
    %112 = tpu.matmul %110, %111, %cst_33 {dimension_numbers = #tpu.dot_dimension_numbers<[1], [0], [0], [1], [0, 0, 1, 1], [], []>} : vector<2x128xbf16>, vector<128x512xbf16>, vector<2x512xf32> -> vector<2x512xf32>
    %113 = arith.addf %109, %112 : vector<2x512xf32>
    %114 = vector.extract_strided_slice %113 {offsets = [0, 0], sizes = [2, 128], strides = [1, 1]} : vector<2x512xf32> to vector<2x128xf32>
    %115 = arith.negf %114 : vector<2x128xf32>
    %116 = math.exp %115 : vector<2x128xf32>
    %cst_34 = arith.constant 1.000000e+00 : f32
    %117 = vector.broadcast %cst_34 : f32 to vector<2x128xf32>
    %118 = arith.addf %117, %116 : vector<2x128xf32>
    %119 = arith.divf %117, %118 : vector<2x128xf32>
    %120 = vector.extract_strided_slice %113 {offsets = [0, 128], sizes = [2, 128], strides = [1, 1]} : vector<2x512xf32> to vector<2x128xf32>
    %121 = arith.negf %120 : vector<2x128xf32>
    %122 = math.exp %121 : vector<2x128xf32>
    %cst_35 = arith.constant 1.000000e+00 : f32
    %123 = vector.broadcast %cst_35 : f32 to vector<2x128xf32>
    %124 = arith.addf %123, %122 : vector<2x128xf32>
    %125 = arith.divf %123, %124 : vector<2x128xf32>
    %126 = vector.extract_strided_slice %113 {offsets = [0, 256], sizes = [2, 128], strides = [1, 1]} : vector<2x512xf32> to vector<2x128xf32>
    %127 = math.tanh %126 : vector<2x128xf32>
    %128 = vector.extract_strided_slice %113 {offsets = [0, 384], sizes = [2, 128], strides = [1, 1]} : vector<2x512xf32> to vector<2x128xf32>
    %129 = arith.negf %128 : vector<2x128xf32>
    %130 = math.exp %129 : vector<2x128xf32>
    %cst_36 = arith.constant 1.000000e+00 : f32
    %131 = vector.broadcast %cst_36 : f32 to vector<2x128xf32>
    %132 = arith.addf %131, %130 : vector<2x128xf32>
    %133 = arith.divf %131, %132 : vector<2x128xf32>
    %134 = arith.mulf %125, %102 : vector<2x128xf32>
    %135 = arith.mulf %119, %127 : vector<2x128xf32>
    %136 = arith.addf %134, %135 : vector<2x128xf32>
    %137 = math.tanh %136 : vector<2x128xf32>
    %138 = arith.mulf %133, %137 : vector<2x128xf32>
    %c4 = arith.constant 4 : index
    %c0_37 = arith.constant 0 : index
    %139 = vector.load %arg13[%c4, %c0_37] : memref<16x128xf32, #tpu.memory_space<vmem>>, vector<2x128xf32>
    tpu.vector_store %arg13[%c4, %c0_37], %138 {strides = array<i32>} : memref<16x128xf32, #tpu.memory_space<vmem>>, vector<2x128xf32>,
    %c10 = arith.constant 10 : index
    %c0_38 = arith.constant 0 : index
    %140 = vector.load %arg14[%c10, %c0_38] : memref<16x128xf32, #tpu.memory_space<vmem>>, vector<2x128xf32>
    tpu.vector_store %arg14[%c10, %c0_38], %138 {strides = array<i32>} : memref<16x128xf32, #tpu.memory_space<vmem>>, vector<2x128xf32>,
    %141 = vector.extract_strided_slice %36 {offsets = [6, 0], sizes = [2, 512], strides = [1, 1]} : vector<16x512xf32> to vector<2x512xf32>
    %142 = vector.extract_strided_slice %36 {offsets = [8, 0], sizes = [2, 512], strides = [1, 1]} : vector<16x512xf32> to vector<2x512xf32>
    %143 = arith.select %27, %141, %142 : vector<2x512xi1>, vector<2x512xf32>
    %144 = arith.truncf %138 : vector<2x128xf32> to vector<2x128xbf16>
    %c0_39 = arith.constant 0 : index
    %c0_40 = arith.constant 0 : index
    %145 = vector.load %arg4[%c0_39, %c0_40] : memref<128x512xbf16, #tpu.memory_space<vmem>>, vector<128x512xbf16>
    %cst_41 = arith.constant dense<0.000000e+00> : vector<2x512xf32>
    %146 = tpu.matmul %144, %145, %cst_41 {dimension_numbers = #tpu.dot_dimension_numbers<[1], [0], [0], [1], [0, 0, 1, 1], [], []>} : vector<2x128xbf16>, vector<128x512xbf16>, vector<2x512xf32> -> vector<2x512xf32>
    %147 = arith.addf %143, %146 : vector<2x512xf32>
    %148 = vector.extract_strided_slice %147 {offsets = [0, 0], sizes = [2, 128], strides = [1, 1]} : vector<2x512xf32> to vector<2x128xf32>
    %149 = arith.negf %148 : vector<2x128xf32>
    %150 = math.exp %149 : vector<2x128xf32>
    %cst_42 = arith.constant 1.000000e+00 : f32
    %151 = vector.broadcast %cst_42 : f32 to vector<2x128xf32>
    %152 = arith.addf %151, %150 : vector<2x128xf32>
    %153 = arith.divf %151, %152 : vector<2x128xf32>
    %154 = vector.extract_strided_slice %147 {offsets = [0, 128], sizes = [2, 128], strides = [1, 1]} : vector<2x512xf32> to vector<2x128xf32>
    %155 = arith.negf %154 : vector<2x128xf32>
    %156 = math.exp %155 : vector<2x128xf32>
    %cst_43 = arith.constant 1.000000e+00 : f32
    %157 = vector.broadcast %cst_43 : f32 to vector<2x128xf32>
    %158 = arith.addf %157, %156 : vector<2x128xf32>
    %159 = arith.divf %157, %158 : vector<2x128xf32>
    %160 = vector.extract_strided_slice %147 {offsets = [0, 256], sizes = [2, 128], strides = [1, 1]} : vector<2x512xf32> to vector<2x128xf32>
    %161 = math.tanh %160 : vector<2x128xf32>
    %162 = vector.extract_strided_slice %147 {offsets = [0, 384], sizes = [2, 128], strides = [1, 1]} : vector<2x512xf32> to vector<2x128xf32>
    %163 = arith.negf %162 : vector<2x128xf32>
    %164 = math.exp %163 : vector<2x128xf32>
    %cst_44 = arith.constant 1.000000e+00 : f32
    %165 = vector.broadcast %cst_44 : f32 to vector<2x128xf32>
    %166 = arith.addf %165, %164 : vector<2x128xf32>
    %167 = arith.divf %165, %166 : vector<2x128xf32>
    %168 = arith.mulf %159, %136 : vector<2x128xf32>
    %169 = arith.mulf %153, %161 : vector<2x128xf32>
    %170 = arith.addf %168, %169 : vector<2x128xf32>
    %171 = math.tanh %170 : vector<2x128xf32>
    %172 = arith.mulf %167, %171 : vector<2x128xf32>
    %c6 = arith.constant 6 : index
    %c0_45 = arith.constant 0 : index
    %173 = vector.load %arg13[%c6, %c0_45] : memref<16x128xf32, #tpu.memory_space<vmem>>, vector<2x128xf32>
    tpu.vector_store %arg13[%c6, %c0_45], %172 {strides = array<i32>} : memref<16x128xf32, #tpu.memory_space<vmem>>, vector<2x128xf32>,
    %c8 = arith.constant 8 : index
    %c0_46 = arith.constant 0 : index
    %174 = vector.load %arg14[%c8, %c0_46] : memref<16x128xf32, #tpu.memory_space<vmem>>, vector<2x128xf32>
    tpu.vector_store %arg14[%c8, %c0_46], %172 {strides = array<i32>} : memref<16x128xf32, #tpu.memory_space<vmem>>, vector<2x128xf32>,
    %175 = vector.extract_strided_slice %36 {offsets = [8, 0], sizes = [2, 512], strides = [1, 1]} : vector<16x512xf32> to vector<2x512xf32>
    %176 = vector.extract_strided_slice %36 {offsets = [6, 0], sizes = [2, 512], strides = [1, 1]} : vector<16x512xf32> to vector<2x512xf32>
    %177 = arith.select %27, %175, %176 : vector<2x512xi1>, vector<2x512xf32>
    %178 = arith.truncf %172 : vector<2x128xf32> to vector<2x128xbf16>
    %c0_47 = arith.constant 0 : index
    %c0_48 = arith.constant 0 : index
    %179 = vector.load %arg4[%c0_47, %c0_48] : memref<128x512xbf16, #tpu.memory_space<vmem>>, vector<128x512xbf16>
    %cst_49 = arith.constant dense<0.000000e+00> : vector<2x512xf32>
    %180 = tpu.matmul %178, %179, %cst_49 {dimension_numbers = #tpu.dot_dimension_numbers<[1], [0], [0], [1], [0, 0, 1, 1], [], []>} : vector<2x128xbf16>, vector<128x512xbf16>, vector<2x512xf32> -> vector<2x512xf32>
    %181 = arith.addf %177, %180 : vector<2x512xf32>
    %182 = vector.extract_strided_slice %181 {offsets = [0, 0], sizes = [2, 128], strides = [1, 1]} : vector<2x512xf32> to vector<2x128xf32>
    %183 = arith.negf %182 : vector<2x128xf32>
    %184 = math.exp %183 : vector<2x128xf32>
    %cst_50 = arith.constant 1.000000e+00 : f32
    %185 = vector.broadcast %cst_50 : f32 to vector<2x128xf32>
    %186 = arith.addf %185, %184 : vector<2x128xf32>
    %187 = arith.divf %185, %186 : vector<2x128xf32>
    %188 = vector.extract_strided_slice %181 {offsets = [0, 128], sizes = [2, 128], strides = [1, 1]} : vector<2x512xf32> to vector<2x128xf32>
    %189 = arith.negf %188 : vector<2x128xf32>
    %190 = math.exp %189 : vector<2x128xf32>
    %cst_51 = arith.constant 1.000000e+00 : f32
    %191 = vector.broadcast %cst_51 : f32 to vector<2x128xf32>
    %192 = arith.addf %191, %190 : vector<2x128xf32>
    %193 = arith.divf %191, %192 : vector<2x128xf32>
    %194 = vector.extract_strided_slice %181 {offsets = [0, 256], sizes = [2, 128], strides = [1, 1]} : vector<2x512xf32> to vector<2x128xf32>
    %195 = math.tanh %194 : vector<2x128xf32>
    %196 = vector.extract_strided_slice %181 {offsets = [0, 384], sizes = [2, 128], strides = [1, 1]} : vector<2x512xf32> to vector<2x128xf32>
    %197 = arith.negf %196 : vector<2x128xf32>
    %198 = math.exp %197 : vector<2x128xf32>
    %cst_52 = arith.constant 1.000000e+00 : f32
    %199 = vector.broadcast %cst_52 : f32 to vector<2x128xf32>
    %200 = arith.addf %199, %198 : vector<2x128xf32>
    %201 = arith.divf %199, %200 : vector<2x128xf32>
    %202 = arith.mulf %193, %170 : vector<2x128xf32>
    %203 = arith.mulf %187, %195 : vector<2x128xf32>
    %204 = arith.addf %202, %203 : vector<2x128xf32>
    %205 = math.tanh %204 : vector<2x128xf32>
    %206 = arith.mulf %201, %205 : vector<2x128xf32>
    %c8_53 = arith.constant 8 : index
    %c0_54 = arith.constant 0 : index
    %207 = vector.load %arg13[%c8_53, %c0_54] : memref<16x128xf32, #tpu.memory_space<vmem>>, vector<2x128xf32>
    tpu.vector_store %arg13[%c8_53, %c0_54], %206 {strides = array<i32>} : memref<16x128xf32, #tpu.memory_space<vmem>>, vector<2x128xf32>,
    %c6_55 = arith.constant 6 : index
    %c0_56 = arith.constant 0 : index
    %208 = vector.load %arg14[%c6_55, %c0_56] : memref<16x128xf32, #tpu.memory_space<vmem>>, vector<2x128xf32>
    tpu.vector_store %arg14[%c6_55, %c0_56], %206 {strides = array<i32>} : memref<16x128xf32, #tpu.memory_space<vmem>>, vector<2x128xf32>,
    %209 = vector.extract_strided_slice %36 {offsets = [10, 0], sizes = [2, 512], strides = [1, 1]} : vector<16x512xf32> to vector<2x512xf32>
    %210 = vector.extract_strided_slice %36 {offsets = [4, 0], sizes = [2, 512], strides = [1, 1]} : vector<16x512xf32> to vector<2x512xf32>
    %211 = arith.select %27, %209, %210 : vector<2x512xi1>, vector<2x512xf32>
    %212 = arith.truncf %206 : vector<2x128xf32> to vector<2x128xbf16>
    %c0_57 = arith.constant 0 : index
    %c0_58 = arith.constant 0 : index
    %213 = vector.load %arg4[%c0_57, %c0_58] : memref<128x512xbf16, #tpu.memory_space<vmem>>, vector<128x512xbf16>
    %cst_59 = arith.constant dense<0.000000e+00> : vector<2x512xf32>
    %214 = tpu.matmul %212, %213, %cst_59 {dimension_numbers = #tpu.dot_dimension_numbers<[1], [0], [0], [1], [0, 0, 1, 1], [], []>} : vector<2x128xbf16>, vector<128x512xbf16>, vector<2x512xf32> -> vector<2x512xf32>
    %215 = arith.addf %211, %214 : vector<2x512xf32>
    %216 = vector.extract_strided_slice %215 {offsets = [0, 0], sizes = [2, 128], strides = [1, 1]} : vector<2x512xf32> to vector<2x128xf32>
    %217 = arith.negf %216 : vector<2x128xf32>
    %218 = math.exp %217 : vector<2x128xf32>
    %cst_60 = arith.constant 1.000000e+00 : f32
    %219 = vector.broadcast %cst_60 : f32 to vector<2x128xf32>
    %220 = arith.addf %219, %218 : vector<2x128xf32>
    %221 = arith.divf %219, %220 : vector<2x128xf32>
    %222 = vector.extract_strided_slice %215 {offsets = [0, 128], sizes = [2, 128], strides = [1, 1]} : vector<2x512xf32> to vector<2x128xf32>
    %223 = arith.negf %222 : vector<2x128xf32>
    %224 = math.exp %223 : vector<2x128xf32>
    %cst_61 = arith.constant 1.000000e+00 : f32
    %225 = vector.broadcast %cst_61 : f32 to vector<2x128xf32>
    %226 = arith.addf %225, %224 : vector<2x128xf32>
    %227 = arith.divf %225, %226 : vector<2x128xf32>
    %228 = vector.extract_strided_slice %215 {offsets = [0, 256], sizes = [2, 128], strides = [1, 1]} : vector<2x512xf32> to vector<2x128xf32>
    %229 = math.tanh %228 : vector<2x128xf32>
    %230 = vector.extract_strided_slice %215 {offsets = [0, 384], sizes = [2, 128], strides = [1, 1]} : vector<2x512xf32> to vector<2x128xf32>
    %231 = arith.negf %230 : vector<2x128xf32>
    %232 = math.exp %231 : vector<2x128xf32>
    %cst_62 = arith.constant 1.000000e+00 : f32
    %233 = vector.broadcast %cst_62 : f32 to vector<2x128xf32>
    %234 = arith.addf %233, %232 : vector<2x128xf32>
    %235 = arith.divf %233, %234 : vector<2x128xf32>
    %236 = arith.mulf %227, %204 : vector<2x128xf32>
    %237 = arith.mulf %221, %229 : vector<2x128xf32>
    %238 = arith.addf %236, %237 : vector<2x128xf32>
    %239 = math.tanh %238 : vector<2x128xf32>
    %240 = arith.mulf %235, %239 : vector<2x128xf32>
    %c10_63 = arith.constant 10 : index
    %c0_64 = arith.constant 0 : index
    %241 = vector.load %arg13[%c10_63, %c0_64] : memref<16x128xf32, #tpu.memory_space<vmem>>, vector<2x128xf32>
    tpu.vector_store %arg13[%c10_63, %c0_64], %240 {strides = array<i32>} : memref<16x128xf32, #tpu.memory_space<vmem>>, vector<2x128xf32>,
    %c4_65 = arith.constant 4 : index
    %c0_66 = arith.constant 0 : index
    %242 = vector.load %arg14[%c4_65, %c0_66] : memref<16x128xf32, #tpu.memory_space<vmem>>, vector<2x128xf32>
    tpu.vector_store %arg14[%c4_65, %c0_66], %240 {strides = array<i32>} : memref<16x128xf32, #tpu.memory_space<vmem>>, vector<2x128xf32>,
    %243 = vector.extract_strided_slice %36 {offsets = [12, 0], sizes = [2, 512], strides = [1, 1]} : vector<16x512xf32> to vector<2x512xf32>
    %244 = vector.extract_strided_slice %36 {offsets = [2, 0], sizes = [2, 512], strides = [1, 1]} : vector<16x512xf32> to vector<2x512xf32>
    %245 = arith.select %27, %243, %244 : vector<2x512xi1>, vector<2x512xf32>
    %246 = arith.truncf %240 : vector<2x128xf32> to vector<2x128xbf16>
    %c0_67 = arith.constant 0 : index
    %c0_68 = arith.constant 0 : index
    %247 = vector.load %arg4[%c0_67, %c0_68] : memref<128x512xbf16, #tpu.memory_space<vmem>>, vector<128x512xbf16>
    %cst_69 = arith.constant dense<0.000000e+00> : vector<2x512xf32>
    %248 = tpu.matmul %246, %247, %cst_69 {dimension_numbers = #tpu.dot_dimension_numbers<[1], [0], [0], [1], [0, 0, 1, 1], [], []>} : vector<2x128xbf16>, vector<128x512xbf16>, vector<2x512xf32> -> vector<2x512xf32>
    %249 = arith.addf %245, %248 : vector<2x512xf32>
    %250 = vector.extract_strided_slice %249 {offsets = [0, 0], sizes = [2, 128], strides = [1, 1]} : vector<2x512xf32> to vector<2x128xf32>
    %251 = arith.negf %250 : vector<2x128xf32>
    %252 = math.exp %251 : vector<2x128xf32>
    %cst_70 = arith.constant 1.000000e+00 : f32
    %253 = vector.broadcast %cst_70 : f32 to vector<2x128xf32>
    %254 = arith.addf %253, %252 : vector<2x128xf32>
    %255 = arith.divf %253, %254 : vector<2x128xf32>
    %256 = vector.extract_strided_slice %249 {offsets = [0, 128], sizes = [2, 128], strides = [1, 1]} : vector<2x512xf32> to vector<2x128xf32>
    %257 = arith.negf %256 : vector<2x128xf32>
    %258 = math.exp %257 : vector<2x128xf32>
    %cst_71 = arith.constant 1.000000e+00 : f32
    %259 = vector.broadcast %cst_71 : f32 to vector<2x128xf32>
    %260 = arith.addf %259, %258 : vector<2x128xf32>
    %261 = arith.divf %259, %260 : vector<2x128xf32>
    %262 = vector.extract_strided_slice %249 {offsets = [0, 256], sizes = [2, 128], strides = [1, 1]} : vector<2x512xf32> to vector<2x128xf32>
    %263 = math.tanh %262 : vector<2x128xf32>
    %264 = vector.extract_strided_slice %249 {offsets = [0, 384], sizes = [2, 128], strides = [1, 1]} : vector<2x512xf32> to vector<2x128xf32>
    %265 = arith.negf %264 : vector<2x128xf32>
    %266 = math.exp %265 : vector<2x128xf32>
    %cst_72 = arith.constant 1.000000e+00 : f32
    %267 = vector.broadcast %cst_72 : f32 to vector<2x128xf32>
    %268 = arith.addf %267, %266 : vector<2x128xf32>
    %269 = arith.divf %267, %268 : vector<2x128xf32>
    %270 = arith.mulf %261, %238 : vector<2x128xf32>
    %271 = arith.mulf %255, %263 : vector<2x128xf32>
    %272 = arith.addf %270, %271 : vector<2x128xf32>
    %273 = math.tanh %272 : vector<2x128xf32>
    %274 = arith.mulf %269, %273 : vector<2x128xf32>
    %c12_73 = arith.constant 12 : index
    %c0_74 = arith.constant 0 : index
    %275 = vector.load %arg13[%c12_73, %c0_74] : memref<16x128xf32, #tpu.memory_space<vmem>>, vector<2x128xf32>
    tpu.vector_store %arg13[%c12_73, %c0_74], %274 {strides = array<i32>} : memref<16x128xf32, #tpu.memory_space<vmem>>, vector<2x128xf32>,
    %c2_75 = arith.constant 2 : index
    %c0_76 = arith.constant 0 : index
    %276 = vector.load %arg14[%c2_75, %c0_76] : memref<16x128xf32, #tpu.memory_space<vmem>>, vector<2x128xf32>
    tpu.vector_store %arg14[%c2_75, %c0_76], %274 {strides = array<i32>} : memref<16x128xf32, #tpu.memory_space<vmem>>, vector<2x128xf32>,
    %277 = vector.extract_strided_slice %36 {offsets = [14, 0], sizes = [2, 512], strides = [1, 1]} : vector<16x512xf32> to vector<2x512xf32>
    %278 = vector.extract_strided_slice %36 {offsets = [0, 0], sizes = [2, 512], strides = [1, 1]} : vector<16x512xf32> to vector<2x512xf32>
    %279 = arith.select %27, %277, %278 : vector<2x512xi1>, vector<2x512xf32>
    %280 = arith.truncf %274 : vector<2x128xf32> to vector<2x128xbf16>
    %c0_77 = arith.constant 0 : index
    %c0_78 = arith.constant 0 : index
    %281 = vector.load %arg4[%c0_77, %c0_78] : memref<128x512xbf16, #tpu.memory_space<vmem>>, vector<128x512xbf16>
    %cst_79 = arith.constant dense<0.000000e+00> : vector<2x512xf32>
    %282 = tpu.matmul %280, %281, %cst_79 {dimension_numbers = #tpu.dot_dimension_numbers<[1], [0], [0], [1], [0, 0, 1, 1], [], []>} : vector<2x128xbf16>, vector<128x512xbf16>, vector<2x512xf32> -> vector<2x512xf32>
    %283 = arith.addf %279, %282 : vector<2x512xf32>
    %284 = vector.extract_strided_slice %283 {offsets = [0, 0], sizes = [2, 128], strides = [1, 1]} : vector<2x512xf32> to vector<2x128xf32>
    %285 = arith.negf %284 : vector<2x128xf32>
    %286 = math.exp %285 : vector<2x128xf32>
    %cst_80 = arith.constant 1.000000e+00 : f32
    %287 = vector.broadcast %cst_80 : f32 to vector<2x128xf32>
    %288 = arith.addf %287, %286 : vector<2x128xf32>
    %289 = arith.divf %287, %288 : vector<2x128xf32>
    %290 = vector.extract_strided_slice %283 {offsets = [0, 128], sizes = [2, 128], strides = [1, 1]} : vector<2x512xf32> to vector<2x128xf32>
    %291 = arith.negf %290 : vector<2x128xf32>
    %292 = math.exp %291 : vector<2x128xf32>
    %cst_81 = arith.constant 1.000000e+00 : f32
    %293 = vector.broadcast %cst_81 : f32 to vector<2x128xf32>
    %294 = arith.addf %293, %292 : vector<2x128xf32>
    %295 = arith.divf %293, %294 : vector<2x128xf32>
    %296 = vector.extract_strided_slice %283 {offsets = [0, 256], sizes = [2, 128], strides = [1, 1]} : vector<2x512xf32> to vector<2x128xf32>
    %297 = math.tanh %296 : vector<2x128xf32>
    %298 = vector.extract_strided_slice %283 {offsets = [0, 384], sizes = [2, 128], strides = [1, 1]} : vector<2x512xf32> to vector<2x128xf32>
    %299 = arith.negf %298 : vector<2x128xf32>
    %300 = math.exp %299 : vector<2x128xf32>
    %cst_82 = arith.constant 1.000000e+00 : f32
    %301 = vector.broadcast %cst_82 : f32 to vector<2x128xf32>
    %302 = arith.addf %301, %300 : vector<2x128xf32>
    %303 = arith.divf %301, %302 : vector<2x128xf32>
    %304 = arith.mulf %295, %272 : vector<2x128xf32>
    %305 = arith.mulf %289, %297 : vector<2x128xf32>
    %306 = arith.addf %304, %305 : vector<2x128xf32>
    %307 = math.tanh %306 : vector<2x128xf32>
    %308 = arith.mulf %303, %307 : vector<2x128xf32>
    %c14_83 = arith.constant 14 : index
    %c0_84 = arith.constant 0 : index
    %309 = vector.load %arg13[%c14_83, %c0_84] : memref<16x128xf32, #tpu.memory_space<vmem>>, vector<2x128xf32>
    tpu.vector_store %arg13[%c14_83, %c0_84], %308 {strides = array<i32>} : memref<16x128xf32, #tpu.memory_space<vmem>>, vector<2x128xf32>,
    %c0_85 = arith.constant 0 : index
    %c0_86 = arith.constant 0 : index
    %310 = vector.load %arg14[%c0_85, %c0_86] : memref<16x128xf32, #tpu.memory_space<vmem>>, vector<2x128xf32>
    tpu.vector_store %arg14[%c0_85, %c0_86], %308 {strides = array<i32>} : memref<16x128xf32, #tpu.memory_space<vmem>>, vector<2x128xf32>,
    %c0_87 = arith.constant 0 : index
    %c0_88 = arith.constant 0 : index
    %311 = vector.load %arg13[%c0_87, %c0_88] : memref<16x128xf32, #tpu.memory_space<vmem>>, vector<16x128xf32>
    %c0_89 = arith.constant 0 : index
    %c0_90 = arith.constant 0 : index
    %312 = vector.load %arg14[%c0_89, %c0_90] : memref<16x128xf32, #tpu.memory_space<vmem>>, vector<16x128xf32>
    %313 = arith.select %30, %311, %312 : vector<16x128xi1>, vector<16x128xf32>
    %314 = arith.truncf %313 : vector<16x128xf32> to vector<16x128xbf16>
    %c0_91 = arith.constant 0 : index
    %c0_92 = arith.constant 0 : index
    %315 = vector.load %arg5[%c0_91, %c0_92] : memref<128x512xbf16, #tpu.memory_space<vmem>>, vector<128x512xbf16>
    %cst_93 = arith.constant dense<0.000000e+00> : vector<16x512xf32>
    %316 = tpu.matmul %314, %315, %cst_93 {dimension_numbers = #tpu.dot_dimension_numbers<[1], [0], [0], [1], [0, 0, 1, 1], [], []>} : vector<16x128xbf16>, vector<128x512xbf16>, vector<16x512xf32> -> vector<16x512xf32>
    %c0_94 = arith.constant 0 : index
    %c0_95 = arith.constant 0 : index
    %317 = vector.load %arg6[%c0_94, %c0_95] : memref<1x512xf32, #tpu.memory_space<vmem>>, vector<1x512xf32>
    %318 = vector.broadcast %317 : vector<1x512xf32> to vector<16x512xf32>
    %319 = arith.addf %316, %318 : vector<16x512xf32>
    %cst_96 = arith.constant 0.000000e+00 : f32
    %320 = vector.broadcast %cst_96 : f32 to vector<2x128xf32>
    %cst_97 = arith.constant 0.000000e+00 : f32
    %321 = vector.broadcast %cst_97 : f32 to vector<2x128xf32>
    %322 = vector.extract_strided_slice %319 {offsets = [0, 0], sizes = [2, 512], strides = [1, 1]} : vector<16x512xf32> to vector<2x512xf32>
    %323 = vector.extract_strided_slice %319 {offsets = [14, 0], sizes = [2, 512], strides = [1, 1]} : vector<16x512xf32> to vector<2x512xf32>
    %324 = arith.select %27, %322, %323 : vector<2x512xi1>, vector<2x512xf32>
    %325 = arith.truncf %320 : vector<2x128xf32> to vector<2x128xbf16>
    %c0_98 = arith.constant 0 : index
    %c0_99 = arith.constant 0 : index
    %326 = vector.load %arg7[%c0_98, %c0_99] : memref<128x512xbf16, #tpu.memory_space<vmem>>, vector<128x512xbf16>
    %cst_100 = arith.constant dense<0.000000e+00> : vector<2x512xf32>
    %327 = tpu.matmul %325, %326, %cst_100 {dimension_numbers = #tpu.dot_dimension_numbers<[1], [0], [0], [1], [0, 0, 1, 1], [], []>} : vector<2x128xbf16>, vector<128x512xbf16>, vector<2x512xf32> -> vector<2x512xf32>
    %328 = arith.addf %324, %327 : vector<2x512xf32>
    %329 = vector.extract_strided_slice %328 {offsets = [0, 0], sizes = [2, 128], strides = [1, 1]} : vector<2x512xf32> to vector<2x128xf32>
    %330 = arith.negf %329 : vector<2x128xf32>
    %331 = math.exp %330 : vector<2x128xf32>
    %cst_101 = arith.constant 1.000000e+00 : f32
    %332 = vector.broadcast %cst_101 : f32 to vector<2x128xf32>
    %333 = arith.addf %332, %331 : vector<2x128xf32>
    %334 = arith.divf %332, %333 : vector<2x128xf32>
    %335 = vector.extract_strided_slice %328 {offsets = [0, 128], sizes = [2, 128], strides = [1, 1]} : vector<2x512xf32> to vector<2x128xf32>
    %336 = arith.negf %335 : vector<2x128xf32>
    %337 = math.exp %336 : vector<2x128xf32>
    %cst_102 = arith.constant 1.000000e+00 : f32
    %338 = vector.broadcast %cst_102 : f32 to vector<2x128xf32>
    %339 = arith.addf %338, %337 : vector<2x128xf32>
    %340 = arith.divf %338, %339 : vector<2x128xf32>
    %341 = vector.extract_strided_slice %328 {offsets = [0, 256], sizes = [2, 128], strides = [1, 1]} : vector<2x512xf32> to vector<2x128xf32>
    %342 = math.tanh %341 : vector<2x128xf32>
    %343 = vector.extract_strided_slice %328 {offsets = [0, 384], sizes = [2, 128], strides = [1, 1]} : vector<2x512xf32> to vector<2x128xf32>
    %344 = arith.negf %343 : vector<2x128xf32>
    %345 = math.exp %344 : vector<2x128xf32>
    %cst_103 = arith.constant 1.000000e+00 : f32
    %346 = vector.broadcast %cst_103 : f32 to vector<2x128xf32>
    %347 = arith.addf %346, %345 : vector<2x128xf32>
    %348 = arith.divf %346, %347 : vector<2x128xf32>
    %349 = arith.mulf %340, %321 : vector<2x128xf32>
    %350 = arith.mulf %334, %342 : vector<2x128xf32>
    %351 = arith.addf %349, %350 : vector<2x128xf32>
    %352 = math.tanh %351 : vector<2x128xf32>
    %353 = arith.mulf %348, %352 : vector<2x128xf32>
    %c0_104 = arith.constant 0 : index
    %c0_105 = arith.constant 0 : index
    %354 = vector.load %arg13[%c0_104, %c0_105] : memref<16x128xf32, #tpu.memory_space<vmem>>, vector<2x128xf32>
    tpu.vector_store %arg13[%c0_104, %c0_105], %353 {strides = array<i32>} : memref<16x128xf32, #tpu.memory_space<vmem>>, vector<2x128xf32>,
    %c14_106 = arith.constant 14 : index
    %c0_107 = arith.constant 0 : index
    %355 = vector.load %arg14[%c14_106, %c0_107] : memref<16x128xf32, #tpu.memory_space<vmem>>, vector<2x128xf32>
    tpu.vector_store %arg14[%c14_106, %c0_107], %353 {strides = array<i32>} : memref<16x128xf32, #tpu.memory_space<vmem>>, vector<2x128xf32>,
    %356 = vector.extract_strided_slice %319 {offsets = [2, 0], sizes = [2, 512], strides = [1, 1]} : vector<16x512xf32> to vector<2x512xf32>
    %357 = vector.extract_strided_slice %319 {offsets = [12, 0], sizes = [2, 512], strides = [1, 1]} : vector<16x512xf32> to vector<2x512xf32>
    %358 = arith.select %27, %356, %357 : vector<2x512xi1>, vector<2x512xf32>
    %359 = arith.truncf %353 : vector<2x128xf32> to vector<2x128xbf16>
    %c0_108 = arith.constant 0 : index
    %c0_109 = arith.constant 0 : index
    %360 = vector.load %arg7[%c0_108, %c0_109] : memref<128x512xbf16, #tpu.memory_space<vmem>>, vector<128x512xbf16>
    %cst_110 = arith.constant dense<0.000000e+00> : vector<2x512xf32>
    %361 = tpu.matmul %359, %360, %cst_110 {dimension_numbers = #tpu.dot_dimension_numbers<[1], [0], [0], [1], [0, 0, 1, 1], [], []>} : vector<2x128xbf16>, vector<128x512xbf16>, vector<2x512xf32> -> vector<2x512xf32>
    %362 = arith.addf %358, %361 : vector<2x512xf32>
    %363 = vector.extract_strided_slice %362 {offsets = [0, 0], sizes = [2, 128], strides = [1, 1]} : vector<2x512xf32> to vector<2x128xf32>
    %364 = arith.negf %363 : vector<2x128xf32>
    %365 = math.exp %364 : vector<2x128xf32>
    %cst_111 = arith.constant 1.000000e+00 : f32
    %366 = vector.broadcast %cst_111 : f32 to vector<2x128xf32>
    %367 = arith.addf %366, %365 : vector<2x128xf32>
    %368 = arith.divf %366, %367 : vector<2x128xf32>
    %369 = vector.extract_strided_slice %362 {offsets = [0, 128], sizes = [2, 128], strides = [1, 1]} : vector<2x512xf32> to vector<2x128xf32>
    %370 = arith.negf %369 : vector<2x128xf32>
    %371 = math.exp %370 : vector<2x128xf32>
    %cst_112 = arith.constant 1.000000e+00 : f32
    %372 = vector.broadcast %cst_112 : f32 to vector<2x128xf32>
    %373 = arith.addf %372, %371 : vector<2x128xf32>
    %374 = arith.divf %372, %373 : vector<2x128xf32>
    %375 = vector.extract_strided_slice %362 {offsets = [0, 256], sizes = [2, 128], strides = [1, 1]} : vector<2x512xf32> to vector<2x128xf32>
    %376 = math.tanh %375 : vector<2x128xf32>
    %377 = vector.extract_strided_slice %362 {offsets = [0, 384], sizes = [2, 128], strides = [1, 1]} : vector<2x512xf32> to vector<2x128xf32>
    %378 = arith.negf %377 : vector<2x128xf32>
    %379 = math.exp %378 : vector<2x128xf32>
    %cst_113 = arith.constant 1.000000e+00 : f32
    %380 = vector.broadcast %cst_113 : f32 to vector<2x128xf32>
    %381 = arith.addf %380, %379 : vector<2x128xf32>
    %382 = arith.divf %380, %381 : vector<2x128xf32>
    %383 = arith.mulf %374, %351 : vector<2x128xf32>
    %384 = arith.mulf %368, %376 : vector<2x128xf32>
    %385 = arith.addf %383, %384 : vector<2x128xf32>
    %386 = math.tanh %385 : vector<2x128xf32>
    %387 = arith.mulf %382, %386 : vector<2x128xf32>
    %c2_114 = arith.constant 2 : index
    %c0_115 = arith.constant 0 : index
    %388 = vector.load %arg13[%c2_114, %c0_115] : memref<16x128xf32, #tpu.memory_space<vmem>>, vector<2x128xf32>
    tpu.vector_store %arg13[%c2_114, %c0_115], %387 {strides = array<i32>} : memref<16x128xf32, #tpu.memory_space<vmem>>, vector<2x128xf32>,
    %c12_116 = arith.constant 12 : index
    %c0_117 = arith.constant 0 : index
    %389 = vector.load %arg14[%c12_116, %c0_117] : memref<16x128xf32, #tpu.memory_space<vmem>>, vector<2x128xf32>
    tpu.vector_store %arg14[%c12_116, %c0_117], %387 {strides = array<i32>} : memref<16x128xf32, #tpu.memory_space<vmem>>, vector<2x128xf32>,
    %390 = vector.extract_strided_slice %319 {offsets = [4, 0], sizes = [2, 512], strides = [1, 1]} : vector<16x512xf32> to vector<2x512xf32>
    %391 = vector.extract_strided_slice %319 {offsets = [10, 0], sizes = [2, 512], strides = [1, 1]} : vector<16x512xf32> to vector<2x512xf32>
    %392 = arith.select %27, %390, %391 : vector<2x512xi1>, vector<2x512xf32>
    %393 = arith.truncf %387 : vector<2x128xf32> to vector<2x128xbf16>
    %c0_118 = arith.constant 0 : index
    %c0_119 = arith.constant 0 : index
    %394 = vector.load %arg7[%c0_118, %c0_119] : memref<128x512xbf16, #tpu.memory_space<vmem>>, vector<128x512xbf16>
    %cst_120 = arith.constant dense<0.000000e+00> : vector<2x512xf32>
    %395 = tpu.matmul %393, %394, %cst_120 {dimension_numbers = #tpu.dot_dimension_numbers<[1], [0], [0], [1], [0, 0, 1, 1], [], []>} : vector<2x128xbf16>, vector<128x512xbf16>, vector<2x512xf32> -> vector<2x512xf32>
    %396 = arith.addf %392, %395 : vector<2x512xf32>
    %397 = vector.extract_strided_slice %396 {offsets = [0, 0], sizes = [2, 128], strides = [1, 1]} : vector<2x512xf32> to vector<2x128xf32>
    %398 = arith.negf %397 : vector<2x128xf32>
    %399 = math.exp %398 : vector<2x128xf32>
    %cst_121 = arith.constant 1.000000e+00 : f32
    %400 = vector.broadcast %cst_121 : f32 to vector<2x128xf32>
    %401 = arith.addf %400, %399 : vector<2x128xf32>
    %402 = arith.divf %400, %401 : vector<2x128xf32>
    %403 = vector.extract_strided_slice %396 {offsets = [0, 128], sizes = [2, 128], strides = [1, 1]} : vector<2x512xf32> to vector<2x128xf32>
    %404 = arith.negf %403 : vector<2x128xf32>
    %405 = math.exp %404 : vector<2x128xf32>
    %cst_122 = arith.constant 1.000000e+00 : f32
    %406 = vector.broadcast %cst_122 : f32 to vector<2x128xf32>
    %407 = arith.addf %406, %405 : vector<2x128xf32>
    %408 = arith.divf %406, %407 : vector<2x128xf32>
    %409 = vector.extract_strided_slice %396 {offsets = [0, 256], sizes = [2, 128], strides = [1, 1]} : vector<2x512xf32> to vector<2x128xf32>
    %410 = math.tanh %409 : vector<2x128xf32>
    %411 = vector.extract_strided_slice %396 {offsets = [0, 384], sizes = [2, 128], strides = [1, 1]} : vector<2x512xf32> to vector<2x128xf32>
    %412 = arith.negf %411 : vector<2x128xf32>
    %413 = math.exp %412 : vector<2x128xf32>
    %cst_123 = arith.constant 1.000000e+00 : f32
    %414 = vector.broadcast %cst_123 : f32 to vector<2x128xf32>
    %415 = arith.addf %414, %413 : vector<2x128xf32>
    %416 = arith.divf %414, %415 : vector<2x128xf32>
    %417 = arith.mulf %408, %385 : vector<2x128xf32>
    %418 = arith.mulf %402, %410 : vector<2x128xf32>
    %419 = arith.addf %417, %418 : vector<2x128xf32>
    %420 = math.tanh %419 : vector<2x128xf32>
    %421 = arith.mulf %416, %420 : vector<2x128xf32>
    %c4_124 = arith.constant 4 : index
    %c0_125 = arith.constant 0 : index
    %422 = vector.load %arg13[%c4_124, %c0_125] : memref<16x128xf32, #tpu.memory_space<vmem>>, vector<2x128xf32>
    tpu.vector_store %arg13[%c4_124, %c0_125], %421 {strides = array<i32>} : memref<16x128xf32, #tpu.memory_space<vmem>>, vector<2x128xf32>,
    %c10_126 = arith.constant 10 : index
    %c0_127 = arith.constant 0 : index
    %423 = vector.load %arg14[%c10_126, %c0_127] : memref<16x128xf32, #tpu.memory_space<vmem>>, vector<2x128xf32>
    tpu.vector_store %arg14[%c10_126, %c0_127], %421 {strides = array<i32>} : memref<16x128xf32, #tpu.memory_space<vmem>>, vector<2x128xf32>,
    %424 = vector.extract_strided_slice %319 {offsets = [6, 0], sizes = [2, 512], strides = [1, 1]} : vector<16x512xf32> to vector<2x512xf32>
    %425 = vector.extract_strided_slice %319 {offsets = [8, 0], sizes = [2, 512], strides = [1, 1]} : vector<16x512xf32> to vector<2x512xf32>
    %426 = arith.select %27, %424, %425 : vector<2x512xi1>, vector<2x512xf32>
    %427 = arith.truncf %421 : vector<2x128xf32> to vector<2x128xbf16>
    %c0_128 = arith.constant 0 : index
    %c0_129 = arith.constant 0 : index
    %428 = vector.load %arg7[%c0_128, %c0_129] : memref<128x512xbf16, #tpu.memory_space<vmem>>, vector<128x512xbf16>
    %cst_130 = arith.constant dense<0.000000e+00> : vector<2x512xf32>
    %429 = tpu.matmul %427, %428, %cst_130 {dimension_numbers = #tpu.dot_dimension_numbers<[1], [0], [0], [1], [0, 0, 1, 1], [], []>} : vector<2x128xbf16>, vector<128x512xbf16>, vector<2x512xf32> -> vector<2x512xf32>
    %430 = arith.addf %426, %429 : vector<2x512xf32>
    %431 = vector.extract_strided_slice %430 {offsets = [0, 0], sizes = [2, 128], strides = [1, 1]} : vector<2x512xf32> to vector<2x128xf32>
    %432 = arith.negf %431 : vector<2x128xf32>
    %433 = math.exp %432 : vector<2x128xf32>
    %cst_131 = arith.constant 1.000000e+00 : f32
    %434 = vector.broadcast %cst_131 : f32 to vector<2x128xf32>
    %435 = arith.addf %434, %433 : vector<2x128xf32>
    %436 = arith.divf %434, %435 : vector<2x128xf32>
    %437 = vector.extract_strided_slice %430 {offsets = [0, 128], sizes = [2, 128], strides = [1, 1]} : vector<2x512xf32> to vector<2x128xf32>
    %438 = arith.negf %437 : vector<2x128xf32>
    %439 = math.exp %438 : vector<2x128xf32>
    %cst_132 = arith.constant 1.000000e+00 : f32
    %440 = vector.broadcast %cst_132 : f32 to vector<2x128xf32>
    %441 = arith.addf %440, %439 : vector<2x128xf32>
    %442 = arith.divf %440, %441 : vector<2x128xf32>
    %443 = vector.extract_strided_slice %430 {offsets = [0, 256], sizes = [2, 128], strides = [1, 1]} : vector<2x512xf32> to vector<2x128xf32>
    %444 = math.tanh %443 : vector<2x128xf32>
    %445 = vector.extract_strided_slice %430 {offsets = [0, 384], sizes = [2, 128], strides = [1, 1]} : vector<2x512xf32> to vector<2x128xf32>
    %446 = arith.negf %445 : vector<2x128xf32>
    %447 = math.exp %446 : vector<2x128xf32>
    %cst_133 = arith.constant 1.000000e+00 : f32
    %448 = vector.broadcast %cst_133 : f32 to vector<2x128xf32>
    %449 = arith.addf %448, %447 : vector<2x128xf32>
    %450 = arith.divf %448, %449 : vector<2x128xf32>
    %451 = arith.mulf %442, %419 : vector<2x128xf32>
    %452 = arith.mulf %436, %444 : vector<2x128xf32>
    %453 = arith.addf %451, %452 : vector<2x128xf32>
    %454 = math.tanh %453 : vector<2x128xf32>
    %455 = arith.mulf %450, %454 : vector<2x128xf32>
    %c6_134 = arith.constant 6 : index
    %c0_135 = arith.constant 0 : index
    %456 = vector.load %arg13[%c6_134, %c0_135] : memref<16x128xf32, #tpu.memory_space<vmem>>, vector<2x128xf32>
    tpu.vector_store %arg13[%c6_134, %c0_135], %455 {strides = array<i32>} : memref<16x128xf32, #tpu.memory_space<vmem>>, vector<2x128xf32>,
    %c8_136 = arith.constant 8 : index
    %c0_137 = arith.constant 0 : index
    %457 = vector.load %arg14[%c8_136, %c0_137] : memref<16x128xf32, #tpu.memory_space<vmem>>, vector<2x128xf32>
    tpu.vector_store %arg14[%c8_136, %c0_137], %455 {strides = array<i32>} : memref<16x128xf32, #tpu.memory_space<vmem>>, vector<2x128xf32>,
    %458 = vector.extract_strided_slice %319 {offsets = [8, 0], sizes = [2, 512], strides = [1, 1]} : vector<16x512xf32> to vector<2x512xf32>
    %459 = vector.extract_strided_slice %319 {offsets = [6, 0], sizes = [2, 512], strides = [1, 1]} : vector<16x512xf32> to vector<2x512xf32>
    %460 = arith.select %27, %458, %459 : vector<2x512xi1>, vector<2x512xf32>
    %461 = arith.truncf %455 : vector<2x128xf32> to vector<2x128xbf16>
    %c0_138 = arith.constant 0 : index
    %c0_139 = arith.constant 0 : index
    %462 = vector.load %arg7[%c0_138, %c0_139] : memref<128x512xbf16, #tpu.memory_space<vmem>>, vector<128x512xbf16>
    %cst_140 = arith.constant dense<0.000000e+00> : vector<2x512xf32>
    %463 = tpu.matmul %461, %462, %cst_140 {dimension_numbers = #tpu.dot_dimension_numbers<[1], [0], [0], [1], [0, 0, 1, 1], [], []>} : vector<2x128xbf16>, vector<128x512xbf16>, vector<2x512xf32> -> vector<2x512xf32>
    %464 = arith.addf %460, %463 : vector<2x512xf32>
    %465 = vector.extract_strided_slice %464 {offsets = [0, 0], sizes = [2, 128], strides = [1, 1]} : vector<2x512xf32> to vector<2x128xf32>
    %466 = arith.negf %465 : vector<2x128xf32>
    %467 = math.exp %466 : vector<2x128xf32>
    %cst_141 = arith.constant 1.000000e+00 : f32
    %468 = vector.broadcast %cst_141 : f32 to vector<2x128xf32>
    %469 = arith.addf %468, %467 : vector<2x128xf32>
    %470 = arith.divf %468, %469 : vector<2x128xf32>
    %471 = vector.extract_strided_slice %464 {offsets = [0, 128], sizes = [2, 128], strides = [1, 1]} : vector<2x512xf32> to vector<2x128xf32>
    %472 = arith.negf %471 : vector<2x128xf32>
    %473 = math.exp %472 : vector<2x128xf32>
    %cst_142 = arith.constant 1.000000e+00 : f32
    %474 = vector.broadcast %cst_142 : f32 to vector<2x128xf32>
    %475 = arith.addf %474, %473 : vector<2x128xf32>
    %476 = arith.divf %474, %475 : vector<2x128xf32>
    %477 = vector.extract_strided_slice %464 {offsets = [0, 256], sizes = [2, 128], strides = [1, 1]} : vector<2x512xf32> to vector<2x128xf32>
    %478 = math.tanh %477 : vector<2x128xf32>
    %479 = vector.extract_strided_slice %464 {offsets = [0, 384], sizes = [2, 128], strides = [1, 1]} : vector<2x512xf32> to vector<2x128xf32>
    %480 = arith.negf %479 : vector<2x128xf32>
    %481 = math.exp %480 : vector<2x128xf32>
    %cst_143 = arith.constant 1.000000e+00 : f32
    %482 = vector.broadcast %cst_143 : f32 to vector<2x128xf32>
    %483 = arith.addf %482, %481 : vector<2x128xf32>
    %484 = arith.divf %482, %483 : vector<2x128xf32>
    %485 = arith.mulf %476, %453 : vector<2x128xf32>
    %486 = arith.mulf %470, %478 : vector<2x128xf32>
    %487 = arith.addf %485, %486 : vector<2x128xf32>
    %488 = math.tanh %487 : vector<2x128xf32>
    %489 = arith.mulf %484, %488 : vector<2x128xf32>
    %c8_144 = arith.constant 8 : index
    %c0_145 = arith.constant 0 : index
    %490 = vector.load %arg13[%c8_144, %c0_145] : memref<16x128xf32, #tpu.memory_space<vmem>>, vector<2x128xf32>
    tpu.vector_store %arg13[%c8_144, %c0_145], %489 {strides = array<i32>} : memref<16x128xf32, #tpu.memory_space<vmem>>, vector<2x128xf32>,
    %c6_146 = arith.constant 6 : index
    %c0_147 = arith.constant 0 : index
    %491 = vector.load %arg14[%c6_146, %c0_147] : memref<16x128xf32, #tpu.memory_space<vmem>>, vector<2x128xf32>
    tpu.vector_store %arg14[%c6_146, %c0_147], %489 {strides = array<i32>} : memref<16x128xf32, #tpu.memory_space<vmem>>, vector<2x128xf32>,
    %492 = vector.extract_strided_slice %319 {offsets = [10, 0], sizes = [2, 512], strides = [1, 1]} : vector<16x512xf32> to vector<2x512xf32>
    %493 = vector.extract_strided_slice %319 {offsets = [4, 0], sizes = [2, 512], strides = [1, 1]} : vector<16x512xf32> to vector<2x512xf32>
    %494 = arith.select %27, %492, %493 : vector<2x512xi1>, vector<2x512xf32>
    %495 = arith.truncf %489 : vector<2x128xf32> to vector<2x128xbf16>
    %c0_148 = arith.constant 0 : index
    %c0_149 = arith.constant 0 : index
    %496 = vector.load %arg7[%c0_148, %c0_149] : memref<128x512xbf16, #tpu.memory_space<vmem>>, vector<128x512xbf16>
    %cst_150 = arith.constant dense<0.000000e+00> : vector<2x512xf32>
    %497 = tpu.matmul %495, %496, %cst_150 {dimension_numbers = #tpu.dot_dimension_numbers<[1], [0], [0], [1], [0, 0, 1, 1], [], []>} : vector<2x128xbf16>, vector<128x512xbf16>, vector<2x512xf32> -> vector<2x512xf32>
    %498 = arith.addf %494, %497 : vector<2x512xf32>
    %499 = vector.extract_strided_slice %498 {offsets = [0, 0], sizes = [2, 128], strides = [1, 1]} : vector<2x512xf32> to vector<2x128xf32>
    %500 = arith.negf %499 : vector<2x128xf32>
    %501 = math.exp %500 : vector<2x128xf32>
    %cst_151 = arith.constant 1.000000e+00 : f32
    %502 = vector.broadcast %cst_151 : f32 to vector<2x128xf32>
    %503 = arith.addf %502, %501 : vector<2x128xf32>
    %504 = arith.divf %502, %503 : vector<2x128xf32>
    %505 = vector.extract_strided_slice %498 {offsets = [0, 128], sizes = [2, 128], strides = [1, 1]} : vector<2x512xf32> to vector<2x128xf32>
    %506 = arith.negf %505 : vector<2x128xf32>
    %507 = math.exp %506 : vector<2x128xf32>
    %cst_152 = arith.constant 1.000000e+00 : f32
    %508 = vector.broadcast %cst_152 : f32 to vector<2x128xf32>
    %509 = arith.addf %508, %507 : vector<2x128xf32>
    %510 = arith.divf %508, %509 : vector<2x128xf32>
    %511 = vector.extract_strided_slice %498 {offsets = [0, 256], sizes = [2, 128], strides = [1, 1]} : vector<2x512xf32> to vector<2x128xf32>
    %512 = math.tanh %511 : vector<2x128xf32>
    %513 = vector.extract_strided_slice %498 {offsets = [0, 384], sizes = [2, 128], strides = [1, 1]} : vector<2x512xf32> to vector<2x128xf32>
    %514 = arith.negf %513 : vector<2x128xf32>
    %515 = math.exp %514 : vector<2x128xf32>
    %cst_153 = arith.constant 1.000000e+00 : f32
    %516 = vector.broadcast %cst_153 : f32 to vector<2x128xf32>
    %517 = arith.addf %516, %515 : vector<2x128xf32>
    %518 = arith.divf %516, %517 : vector<2x128xf32>
    %519 = arith.mulf %510, %487 : vector<2x128xf32>
    %520 = arith.mulf %504, %512 : vector<2x128xf32>
    %521 = arith.addf %519, %520 : vector<2x128xf32>
    %522 = math.tanh %521 : vector<2x128xf32>
    %523 = arith.mulf %518, %522 : vector<2x128xf32>
    %c10_154 = arith.constant 10 : index
    %c0_155 = arith.constant 0 : index
    %524 = vector.load %arg13[%c10_154, %c0_155] : memref<16x128xf32, #tpu.memory_space<vmem>>, vector<2x128xf32>
    tpu.vector_store %arg13[%c10_154, %c0_155], %523 {strides = array<i32>} : memref<16x128xf32, #tpu.memory_space<vmem>>, vector<2x128xf32>,
    %c4_156 = arith.constant 4 : index
    %c0_157 = arith.constant 0 : index
    %525 = vector.load %arg14[%c4_156, %c0_157] : memref<16x128xf32, #tpu.memory_space<vmem>>, vector<2x128xf32>
    tpu.vector_store %arg14[%c4_156, %c0_157], %523 {strides = array<i32>} : memref<16x128xf32, #tpu.memory_space<vmem>>, vector<2x128xf32>,
    %526 = vector.extract_strided_slice %319 {offsets = [12, 0], sizes = [2, 512], strides = [1, 1]} : vector<16x512xf32> to vector<2x512xf32>
    %527 = vector.extract_strided_slice %319 {offsets = [2, 0], sizes = [2, 512], strides = [1, 1]} : vector<16x512xf32> to vector<2x512xf32>
    %528 = arith.select %27, %526, %527 : vector<2x512xi1>, vector<2x512xf32>
    %529 = arith.truncf %523 : vector<2x128xf32> to vector<2x128xbf16>
    %c0_158 = arith.constant 0 : index
    %c0_159 = arith.constant 0 : index
    %530 = vector.load %arg7[%c0_158, %c0_159] : memref<128x512xbf16, #tpu.memory_space<vmem>>, vector<128x512xbf16>
    %cst_160 = arith.constant dense<0.000000e+00> : vector<2x512xf32>
    %531 = tpu.matmul %529, %530, %cst_160 {dimension_numbers = #tpu.dot_dimension_numbers<[1], [0], [0], [1], [0, 0, 1, 1], [], []>} : vector<2x128xbf16>, vector<128x512xbf16>, vector<2x512xf32> -> vector<2x512xf32>
    %532 = arith.addf %528, %531 : vector<2x512xf32>
    %533 = vector.extract_strided_slice %532 {offsets = [0, 0], sizes = [2, 128], strides = [1, 1]} : vector<2x512xf32> to vector<2x128xf32>
    %534 = arith.negf %533 : vector<2x128xf32>
    %535 = math.exp %534 : vector<2x128xf32>
    %cst_161 = arith.constant 1.000000e+00 : f32
    %536 = vector.broadcast %cst_161 : f32 to vector<2x128xf32>
    %537 = arith.addf %536, %535 : vector<2x128xf32>
    %538 = arith.divf %536, %537 : vector<2x128xf32>
    %539 = vector.extract_strided_slice %532 {offsets = [0, 128], sizes = [2, 128], strides = [1, 1]} : vector<2x512xf32> to vector<2x128xf32>
    %540 = arith.negf %539 : vector<2x128xf32>
    %541 = math.exp %540 : vector<2x128xf32>
    %cst_162 = arith.constant 1.000000e+00 : f32
    %542 = vector.broadcast %cst_162 : f32 to vector<2x128xf32>
    %543 = arith.addf %542, %541 : vector<2x128xf32>
    %544 = arith.divf %542, %543 : vector<2x128xf32>
    %545 = vector.extract_strided_slice %532 {offsets = [0, 256], sizes = [2, 128], strides = [1, 1]} : vector<2x512xf32> to vector<2x128xf32>
    %546 = math.tanh %545 : vector<2x128xf32>
    %547 = vector.extract_strided_slice %532 {offsets = [0, 384], sizes = [2, 128], strides = [1, 1]} : vector<2x512xf32> to vector<2x128xf32>
    %548 = arith.negf %547 : vector<2x128xf32>
    %549 = math.exp %548 : vector<2x128xf32>
    %cst_163 = arith.constant 1.000000e+00 : f32
    %550 = vector.broadcast %cst_163 : f32 to vector<2x128xf32>
    %551 = arith.addf %550, %549 : vector<2x128xf32>
    %552 = arith.divf %550, %551 : vector<2x128xf32>
    %553 = arith.mulf %544, %521 : vector<2x128xf32>
    %554 = arith.mulf %538, %546 : vector<2x128xf32>
    %555 = arith.addf %553, %554 : vector<2x128xf32>
    %556 = math.tanh %555 : vector<2x128xf32>
    %557 = arith.mulf %552, %556 : vector<2x128xf32>
    %c12_164 = arith.constant 12 : index
    %c0_165 = arith.constant 0 : index
    %558 = vector.load %arg13[%c12_164, %c0_165] : memref<16x128xf32, #tpu.memory_space<vmem>>, vector<2x128xf32>
    tpu.vector_store %arg13[%c12_164, %c0_165], %557 {strides = array<i32>} : memref<16x128xf32, #tpu.memory_space<vmem>>, vector<2x128xf32>,
    %c2_166 = arith.constant 2 : index
    %c0_167 = arith.constant 0 : index
    %559 = vector.load %arg14[%c2_166, %c0_167] : memref<16x128xf32, #tpu.memory_space<vmem>>, vector<2x128xf32>
    tpu.vector_store %arg14[%c2_166, %c0_167], %557 {strides = array<i32>} : memref<16x128xf32, #tpu.memory_space<vmem>>, vector<2x128xf32>,
    %560 = vector.extract_strided_slice %319 {offsets = [14, 0], sizes = [2, 512], strides = [1, 1]} : vector<16x512xf32> to vector<2x512xf32>
    %561 = vector.extract_strided_slice %319 {offsets = [0, 0], sizes = [2, 512], strides = [1, 1]} : vector<16x512xf32> to vector<2x512xf32>
    %562 = arith.select %27, %560, %561 : vector<2x512xi1>, vector<2x512xf32>
    %563 = arith.truncf %557 : vector<2x128xf32> to vector<2x128xbf16>
    %c0_168 = arith.constant 0 : index
    %c0_169 = arith.constant 0 : index
    %564 = vector.load %arg7[%c0_168, %c0_169] : memref<128x512xbf16, #tpu.memory_space<vmem>>, vector<128x512xbf16>
    %cst_170 = arith.constant dense<0.000000e+00> : vector<2x512xf32>
    %565 = tpu.matmul %563, %564, %cst_170 {dimension_numbers = #tpu.dot_dimension_numbers<[1], [0], [0], [1], [0, 0, 1, 1], [], []>} : vector<2x128xbf16>, vector<128x512xbf16>, vector<2x512xf32> -> vector<2x512xf32>
    %566 = arith.addf %562, %565 : vector<2x512xf32>
    %567 = vector.extract_strided_slice %566 {offsets = [0, 0], sizes = [2, 128], strides = [1, 1]} : vector<2x512xf32> to vector<2x128xf32>
    %568 = arith.negf %567 : vector<2x128xf32>
    %569 = math.exp %568 : vector<2x128xf32>
    %cst_171 = arith.constant 1.000000e+00 : f32
    %570 = vector.broadcast %cst_171 : f32 to vector<2x128xf32>
    %571 = arith.addf %570, %569 : vector<2x128xf32>
    %572 = arith.divf %570, %571 : vector<2x128xf32>
    %573 = vector.extract_strided_slice %566 {offsets = [0, 128], sizes = [2, 128], strides = [1, 1]} : vector<2x512xf32> to vector<2x128xf32>
    %574 = arith.negf %573 : vector<2x128xf32>
    %575 = math.exp %574 : vector<2x128xf32>
    %cst_172 = arith.constant 1.000000e+00 : f32
    %576 = vector.broadcast %cst_172 : f32 to vector<2x128xf32>
    %577 = arith.addf %576, %575 : vector<2x128xf32>
    %578 = arith.divf %576, %577 : vector<2x128xf32>
    %579 = vector.extract_strided_slice %566 {offsets = [0, 256], sizes = [2, 128], strides = [1, 1]} : vector<2x512xf32> to vector<2x128xf32>
    %580 = math.tanh %579 : vector<2x128xf32>
    %581 = vector.extract_strided_slice %566 {offsets = [0, 384], sizes = [2, 128], strides = [1, 1]} : vector<2x512xf32> to vector<2x128xf32>
    %582 = arith.negf %581 : vector<2x128xf32>
    %583 = math.exp %582 : vector<2x128xf32>
    %cst_173 = arith.constant 1.000000e+00 : f32
    %584 = vector.broadcast %cst_173 : f32 to vector<2x128xf32>
    %585 = arith.addf %584, %583 : vector<2x128xf32>
    %586 = arith.divf %584, %585 : vector<2x128xf32>
    %587 = arith.mulf %578, %555 : vector<2x128xf32>
    %588 = arith.mulf %572, %580 : vector<2x128xf32>
    %589 = arith.addf %587, %588 : vector<2x128xf32>
    %590 = math.tanh %589 : vector<2x128xf32>
    %591 = arith.mulf %586, %590 : vector<2x128xf32>
    %c14_174 = arith.constant 14 : index
    %c0_175 = arith.constant 0 : index
    %592 = vector.load %arg13[%c14_174, %c0_175] : memref<16x128xf32, #tpu.memory_space<vmem>>, vector<2x128xf32>
    tpu.vector_store %arg13[%c14_174, %c0_175], %591 {strides = array<i32>} : memref<16x128xf32, #tpu.memory_space<vmem>>, vector<2x128xf32>,
    %c0_176 = arith.constant 0 : index
    %c0_177 = arith.constant 0 : index
    %593 = vector.load %arg14[%c0_176, %c0_177] : memref<16x128xf32, #tpu.memory_space<vmem>>, vector<2x128xf32>
    tpu.vector_store %arg14[%c0_176, %c0_177], %591 {strides = array<i32>} : memref<16x128xf32, #tpu.memory_space<vmem>>, vector<2x128xf32>,
    %c0_178 = arith.constant 0 : index
    %c0_179 = arith.constant 0 : index
    %594 = vector.load %arg13[%c0_178, %c0_179] : memref<16x128xf32, #tpu.memory_space<vmem>>, vector<16x128xf32>
    %c0_180 = arith.constant 0 : index
    %c0_181 = arith.constant 0 : index
    %595 = vector.load %arg14[%c0_180, %c0_181] : memref<16x128xf32, #tpu.memory_space<vmem>>, vector<16x128xf32>
    %596 = arith.select %30, %594, %595 : vector<16x128xi1>, vector<16x128xf32>
    %597 = arith.truncf %596 : vector<16x128xf32> to vector<16x128xbf16>
    %c0_182 = arith.constant 0 : index
    %c0_183 = arith.constant 0 : index
    %598 = vector.load %arg8[%c0_182, %c0_183] : memref<128x384xbf16, #tpu.memory_space<vmem>>, vector<128x384xbf16>
    %cst_184 = arith.constant dense<0.000000e+00> : vector<16x384xf32>
    %599 = tpu.matmul %597, %598, %cst_184 {dimension_numbers = #tpu.dot_dimension_numbers<[1], [0], [0], [1], [0, 0, 1, 1], [], []>} : vector<16x128xbf16>, vector<128x384xbf16>, vector<16x384xf32> -> vector<16x384xf32>
    %c0_185 = arith.constant 0 : index
    %c0_186 = arith.constant 0 : index
    %600 = vector.load %arg9[%c0_185, %c0_186] : memref<1x384xf32, #tpu.memory_space<vmem>>, vector<1x384xf32>
    %601 = vector.broadcast %600 : vector<1x384xf32> to vector<16x384xf32>
    %602 = arith.addf %599, %601 : vector<16x384xf32>
    %603 = vector.extract_strided_slice %602 {offsets = [0, 0], sizes = [16, 128], strides = [1, 1]} : vector<16x384xf32> to vector<16x128xf32>
    %604 = arith.truncf %603 : vector<16x128xf32> to vector<16x128xbf16>
    %605 = vector.extract_strided_slice %602 {offsets = [0, 128], sizes = [16, 128], strides = [1, 1]} : vector<16x384xf32> to vector<16x128xf32>
    %606 = arith.truncf %605 : vector<16x128xf32> to vector<16x128xbf16>
    %607 = vector.extract_strided_slice %602 {offsets = [0, 256], sizes = [16, 128], strides = [1, 1]} : vector<16x384xf32> to vector<16x128xf32>
    %cst_187 = arith.constant dense<0.000000e+00> : vector<16x16xf32>
    %608 = tpu.matmul %604, %606, %cst_187 {dimension_numbers = #tpu.dot_dimension_numbers<[1], [1], [0], [0], [0, 0, 1, 0], [], []>} : vector<16x128xbf16>, vector<16x128xbf16>, vector<16x16xf32> -> vector<16x16xf32>
    %609 = tpu.iota {dimensions = array<i32: 0>} : vector<16x16xi32>
    %610 = tpu.iota {dimensions = array<i32: 1>} : vector<16x16xi32>
    %c2_i32 = arith.constant 2 : i32
    %c0_i32_188 = arith.constant 0 : i32
    %611 = arith.cmpi eq, %c2_i32, %c0_i32_188 : i32
    %c1_i32_189 = arith.constant 1 : i32
    %612 = arith.select %611, %c1_i32_189, %c2_i32 : i32
    %613 = vector.broadcast %612 : i32 to vector<16x16xi32>
    %614 = arith.remsi %609, %613 : vector<16x16xi32>
    %c0_i32_190 = arith.constant 0 : i32
    %615 = vector.broadcast %c0_i32_190 : i32 to vector<16x16xi32>
    %616 = arith.cmpi ne, %614, %615 : vector<16x16xi32>
    %c0_i32_191 = arith.constant 0 : i32
    %617 = vector.broadcast %c0_i32_191 : i32 to vector<16x16xi32>
    %618 = arith.cmpi slt, %614, %617 : vector<16x16xi32>
    %c0_i32_192 = arith.constant 0 : i32
    %619 = arith.cmpi slt, %612, %c0_i32_192 : i32
    %620 = vector.broadcast %619 : i1 to vector<16x16xi1>
    %621 = vector.broadcast %620 : vector<16x16xi1> to vector<16x16xi1>
    %622 = arith.xori %618, %621 : vector<16x16xi1>
    %623 = arith.andi %622, %616 : vector<16x16xi1>
    %624 = vector.broadcast %612 : i32 to vector<16x16xi32>
    %625 = arith.addi %614, %624 : vector<16x16xi32>
    %626 = arith.select %623, %625, %614 : vector<16x16xi1>, vector<16x16xi32>
    %c2_i32_193 = arith.constant 2 : i32
    %c0_i32_194 = arith.constant 0 : i32
    %627 = arith.cmpi eq, %c2_i32_193, %c0_i32_194 : i32
    %c1_i32_195 = arith.constant 1 : i32
    %628 = arith.select %627, %c1_i32_195, %c2_i32_193 : i32
    %629 = vector.broadcast %628 : i32 to vector<16x16xi32>
    %630 = arith.remsi %610, %629 : vector<16x16xi32>
    %c0_i32_196 = arith.constant 0 : i32
    %631 = vector.broadcast %c0_i32_196 : i32 to vector<16x16xi32>
    %632 = arith.cmpi ne, %630, %631 : vector<16x16xi32>
    %c0_i32_197 = arith.constant 0 : i32
    %633 = vector.broadcast %c0_i32_197 : i32 to vector<16x16xi32>
    %634 = arith.cmpi slt, %630, %633 : vector<16x16xi32>
    %c0_i32_198 = arith.constant 0 : i32
    %635 = arith.cmpi slt, %628, %c0_i32_198 : i32
    %636 = vector.broadcast %635 : i1 to vector<16x16xi1>
    %637 = vector.broadcast %636 : vector<16x16xi1> to vector<16x16xi1>
    %638 = arith.xori %634, %637 : vector<16x16xi1>
    %639 = arith.andi %638, %632 : vector<16x16xi1>
    %640 = vector.broadcast %628 : i32 to vector<16x16xi32>
    %641 = arith.addi %630, %640 : vector<16x16xi32>
    %642 = arith.select %639, %641, %630 : vector<16x16xi1>, vector<16x16xi32>
    %643 = arith.cmpi eq, %626, %642 : vector<16x16xi32>
    %cst_199 = arith.constant -1.000000e+09 : f32
    %644 = vector.broadcast %cst_199 : f32 to vector<16x16xf32>
    %645 = arith.select %643, %608, %644 : vector<16x16xi1>, vector<16x16xf32>
    %cst_200 = arith.constant dense<0xFF800000> : vector<16xf32>
    %646 = vector.multi_reduction <maximumf>, %645, %cst_200 [1] : vector<16x16xf32> to vector<16xf32>
    %647 = vector.shape_cast %646 : vector<16xf32> to vector<16x1xf32>
    %648 = vector.broadcast %647 : vector<16x1xf32> to vector<16x16xf32>
    %649 = arith.subf %645, %648 : vector<16x16xf32>
    %650 = math.exp %649 : vector<16x16xf32>
    %cst_201 = arith.constant dense<0.000000e+00> : vector<16xf32>
    %651 = vector.multi_reduction <add>, %650, %cst_201 [1] : vector<16x16xf32> to vector<16xf32>
    %652 = vector.shape_cast %651 : vector<16xf32> to vector<16x1xf32>
    %653 = vector.broadcast %652 : vector<16x1xf32> to vector<16x16xf32>
    %654 = arith.divf %650, %653 : vector<16x16xf32>
    %cst_202 = arith.constant dense<0.000000e+00> : vector<16x128xf32>
    %655 = tpu.matmul %654, %607, %cst_202 {dimension_numbers = #tpu.dot_dimension_numbers<[1], [0], [0], [1], [0, 0, 1, 1], [], []>} : vector<16x16xf32>, vector<16x128xf32>, vector<16x128xf32> -> vector<16x128xf32>
    %656 = arith.truncf %655 : vector<16x128xf32> to vector<16x128xbf16>
    %c0_203 = arith.constant 0 : index
    %c0_204 = arith.constant 0 : index
    %657 = vector.load %arg10[%c0_203, %c0_204] : memref<128x128xbf16, #tpu.memory_space<vmem>>, vector<128x128xbf16>
    %cst_205 = arith.constant dense<0.000000e+00> : vector<16x128xf32>
    %658 = tpu.matmul %656, %657, %cst_205 {dimension_numbers = #tpu.dot_dimension_numbers<[1], [0], [0], [1], [0, 0, 1, 1], [], []>} : vector<16x128xbf16>, vector<128x128xbf16>, vector<16x128xf32> -> vector<16x128xf32>
    %c0_206 = arith.constant 0 : index
    %c0_207 = arith.constant 0 : index
    %659 = vector.load %arg11[%c0_206, %c0_207] : memref<1x128xf32, #tpu.memory_space<vmem>>, vector<1x128xf32>
    %660 = vector.broadcast %659 : vector<1x128xf32> to vector<16x128xf32>
    %661 = arith.addf %658, %660 : vector<16x128xf32>
    %c0_208 = arith.constant 0 : index
    %c0_209 = arith.constant 0 : index
    %662 = vector.load %arg12[%c0_208, %c0_209] : memref<16x128xf32, #tpu.memory_space<vmem>>, vector<16x128xf32>
    tpu.vector_store %arg12[%c0_208, %c0_209], %661 {strides = array<i32>} : memref<16x128xf32, #tpu.memory_space<vmem>>, vector<16x128xf32>,
    return
  }
}

</mosaic_0001>

<bundles_post_ra>
// kernel: tpu_custom_call.1
= control target key start
LH: loop header
LB: loop body
LE: loop exit
PB: predicated region body
PF: predicated region fallthrough
CT: control target
= control target key end

     0   :  { %17 = vsyncpa [#allocation5], 0  ;;  %s9690_s0 = inlined_call_operand.vmem [shape: s32[16,1], index: 0, kind: input, shape index: {}]   ;;  %s9691_s1 = inlined_call_operand.hbm [shape: bf16[128,128], index: 1, kind: input, shape index: {}]   ;;  %s9692_s2 = inlined_call_operand.hbm [shape: bf16[128,512], index: 2, kind: input, shape index: {}]   ;;  %s9693_s3 = inlined_call_operand.vmem [shape: f32[1,512], index: 3, kind: input, shape index: {}]   ;;  %s9694_s4 = inlined_call_operand.hbm [shape: bf16[128,512], index: 4, kind: input, shape index: {}]   ;;  %s9695_s5 = inlined_call_operand.hbm [shape: bf16[128,512], index: 5, kind: input, shape index: {}]   ;;  %s9696_s6 = inlined_call_operand.vmem [shape: f32[1,512], index: 6, kind: input, shape index: {}]   ;;  %s9697_s7 = inlined_call_operand.hbm [shape: bf16[128,512], index: 7, kind: input, shape index: {}]   ;;  %s9698_s8 = inlined_call_operand.hbm [shape: bf16[128,384], index: 8, kind: input, shape index: {}]   ;;  %s9699_s9 = inlined_call_operand.vmem [shape: f32[1,384], index: 9, kind: input, shape index: {}]   ;;  %s9700_s10 = inlined_call_operand.hbm [shape: bf16[128,128], index: 10, kind: input, shape index: {}]   ;;  %s9701_s11 = inlined_call_operand.vmem [shape: f32[1,128], index: 11, kind: input, shape index: {}]   ;;  %s9702_s12 = inlined_call_operand.hbm [shape: f32[16,128], index: 12, kind: output, shape index: {}]  }
   0x1   :  { %18 = vsyncpa [#allocation8], 0 }
   0x2   :  { %19 = vsyncpa [#allocation11], 0 }
   0x3   :  { %20 = vsyncpa [#allocation14], 0 }
   0x4   :  { %21 = vsyncpa [#allocation6], 0  ;;  %s8311_s21 = smov [#allocation7]   ;;  %s8125_s25 = scalar_lea.hbm %s9692_s2, 4096 }
   0x5   :  { %s41_s22 = sshll.u32 %s8311_s21, 4  ;;  %p8126_p0 = scmp.ne.s32.totalorder %s9692_s2, %s8125_s25  ;;  %s42_s22 = int_to_ptr.vmem [resolvable:$true] %s41_s22 }
   0x6   :  { %p8129_p1 = scmp.lt.u32.totalorder %s8125_s25, %s9692_s2 }
   0x8   :  { %p8131_p2 = pnand %p8129_p1, %p8126_p0 }
   0xa   :  { %8134 = shalt.err (!%p8131_p2)
}
   0xb   :  { %s8135_s30 = scalar_lea.vmem %s42_s22, 4096  ;;  %p8140_p4 = scmp.lt.s32.totalorder %s42_s22, %s42_s22 }
   0xc   :  { %p8136_p3 = scmp.ne.s32.totalorder %s42_s22, %s8135_s30  ;;  %p8141_p5 = scmp.lt.s32.totalorder %s8135_s30, %s8135_s30 }
   0xe   :  { %p8142_p6 = por %p8141_p5, %p8140_p4 }
  0x10   :  { %p8143_p7 = pnand %p8142_p6, %p8136_p3 }
  0x12   :  { %8146 = shalt.err (!%p8143_p7)
}
  0x13   :  { %s8312_s13 = smov 256   ;;  %s8313_s14 = smov 16  }
  0x14   :  { %47 = dma.hbm_to_vmem [thread:$0]  %s9692_s2, 4096, %s42_s22, [#allocation8], %s8312_s13, %s8312_s13, %s8313_s14  }
  0x15   :  { %s8314_s17 = smov [#allocation10]   ;;  %s8315_s19 = smov [#allocation13]  }
  0x16   :  { %s67_s18 = sshll.u32 %s8314_s17, 4  ;;  %s93_s20 = sshll.u32 %s8315_s19, 4  ;;  %s68_s18 = int_to_ptr.vmem [resolvable:$true] %s67_s18  ;;  %s94_s20 = int_to_ptr.vmem [resolvable:$true] %s93_s20 }
  0x17   :  { %s8147_s24 = scalar_lea.hbm %s9695_s5, 4096 }
  0x18   :  { %p8148_p8 = scmp.ne.s32.totalorder %s9695_s5, %s8147_s24  ;;  %p8151_p9 = scmp.lt.u32.totalorder %s8147_s24, %s9695_s5 }
  0x1a   :  { %p8153_p10 = pnand %p8151_p9, %p8148_p8 }
  0x1c   :  { %8156 = shalt.err (!%p8153_p10)
}
  0x1d   :  { %s8157_s2 = scalar_lea.vmem %s68_s18, 4096  ;;  %p8162_p12 = scmp.lt.s32.totalorder %s68_s18, %s68_s18 }
  0x1e   :  { %p8158_p11 = scmp.ne.s32.totalorder %s68_s18, %s8157_s2  ;;  %p8163_p13 = scmp.lt.s32.totalorder %s8157_s2, %s8157_s2 }
  0x20   :  { %p8164_p0 = por %p8163_p13, %p8162_p12 }
  0x22   :  { %p8165_p1 = pnand %p8164_p0, %p8158_p11 }
  0x24   :  { %8168 = shalt.err (!%p8165_p1)
}
  0x25   :  { %73 = dma.hbm_to_vmem [thread:$0]  %s9695_s5, 4096, %s68_s18, [#allocation11], %s8312_s13, %s8312_s13, %s8313_s14  }
  0x26   :  { %s8169_s16 = scalar_lea.hbm %s9698_s8, 3072 }
  0x27   :  { %p8170_p2 = scmp.ne.s32.totalorder %s9698_s8, %s8169_s16  ;;  %p8173_p3 = scmp.lt.u32.totalorder %s8169_s16, %s9698_s8 }
  0x29   :  { %p8175_p4 = pnand %p8173_p3, %p8170_p2 }
  0x2b   :  { %8178 = shalt.err (!%p8175_p4)
}
  0x2c   :  { %s8179_s24 = scalar_lea.vmem %s94_s20, 3072  ;;  %p8184_p6 = scmp.lt.s32.totalorder %s94_s20, %s94_s20 }
  0x2d   :  { %p8180_p5 = scmp.ne.s32.totalorder %s94_s20, %s8179_s24  ;;  %p8185_p7 = scmp.lt.s32.totalorder %s8179_s24, %s8179_s24 }
  0x2f   :  { %p8186_p8 = por %p8185_p7, %p8184_p6 }
  0x31   :  { %p8187_p9 = pnand %p8186_p8, %p8180_p5 }
  0x33   :  { %8190 = shalt.err (!%p8187_p9)
}
  0x34   :  { %s8316_s5 = smov 192   ;;  %s8317_s18 = smov 12  }
  0x35   :  { %99 = dma.hbm_to_vmem [thread:$0]  %s9698_s8, 3072, %s94_s20, [#allocation14], %s8316_s5, %s8316_s5, %s8317_s18  }
  0x36   :  { %s8318_s27 = smov [#allocation4]   ;;  %s8191_s29 = scalar_lea.hbm %s9691_s1, 1024 }
  0x37   :  { %s29_s28 = sshll.u32 %s8318_s27, 4  ;;  %p8192_p10 = scmp.ne.s32.totalorder %s9691_s1, %s8191_s29  ;;  %s30_s28 = int_to_ptr.vmem [resolvable:$true] %s29_s28 }
  0x38   :  { %p8195_p11 = scmp.lt.u32.totalorder %s8191_s29, %s9691_s1 }
  0x3a   :  { %p8197_p12 = pnand %p8195_p11, %p8192_p10 }
  0x3c   :  { %8200 = shalt.err (!%p8197_p12)
}
  0x3d   :  { %s8201_s19 = scalar_lea.vmem %s30_s28, 1024  ;;  %p8206_p0 = scmp.lt.s32.totalorder %s30_s28, %s30_s28 }
  0x3e   :  { %p8202_p13 = scmp.ne.s32.totalorder %s30_s28, %s8201_s19  ;;  %p8207_p1 = scmp.lt.s32.totalorder %s8201_s19, %s8201_s19 }
  0x40   :  { %p8208_p2 = por %p8207_p1, %p8206_p0 }
  0x42   :  { %p8209_p3 = pnand %p8208_p2, %p8202_p13 }
  0x44   :  { %8212 = shalt.err (!%p8209_p3)
}
  0x45   :  { %s8319_s8 = smov 64   ;;  %s8320_s20 = smov 4  }
  0x46   :  { %35 = dma.hbm_to_vmem [thread:$0]  %s9691_s1, 1024, %s30_s28, [#allocation5], %s8319_s8, %s8319_s8, %s8320_s20  }
  0x47   :  { %s8321_s24 = smov [#allocation9]   ;;  %s8322_s18 = smov [#allocation12]  }
  0x48   :  { %s55_s5 = sshll.u32 %s8321_s24, 4  ;;  %s81_s25 = sshll.u32 %s8322_s18, 4  ;;  %s56_s5 = int_to_ptr.vmem [resolvable:$true] %s55_s5  ;;  %s8453_s25 = int_to_ptr.vmem [resolvable:$true] %s81_s25 }
  0x49   :  { %s8213_s2 = scalar_lea.hbm %s9694_s4, 4096 }
  0x4a   :  { %p8214_p4 = scmp.ne.s32.totalorder %s9694_s4, %s8213_s2  ;;  %p8217_p5 = scmp.lt.u32.totalorder %s8213_s2, %s9694_s4 }
  0x4c   :  { %p8219_p6 = pnand %p8217_p5, %p8214_p4 }
  0x4e   :  { %8222 = shalt.err (!%p8219_p6)
}
  0x4f   :  { %s8223_s1 = scalar_lea.vmem %s56_s5, 4096  ;;  %p8228_p8 = scmp.lt.s32.totalorder %s56_s5, %s56_s5 }
  0x50   :  { %p8224_p7 = scmp.ne.s32.totalorder %s56_s5, %s8223_s1  ;;  %p8229_p9 = scmp.lt.s32.totalorder %s8223_s1, %s8223_s1 }
  0x52   :  { %p8230_p10 = por %p8229_p9, %p8228_p8 }
  0x54   :  { %p8231_p11 = pnand %p8230_p10, %p8224_p7 }
  0x56   :  { %8234 = shalt.err (!%p8231_p11)
}
  0x57   :  { %61 = dma.hbm_to_vmem [thread:$0]  %s9694_s4, 4096, %s56_s5, [#allocation8], %s8312_s13, %s8312_s13, %s8313_s14  }
  0x58   :  { %s8235_s21 = scalar_lea.hbm %s9697_s7, 4096 }
  0x59   :  { %p8236_p12 = scmp.ne.s32.totalorder %s9697_s7, %s8235_s21  ;;  %p8239_p13 = scmp.lt.u32.totalorder %s8235_s21, %s9697_s7 }
  0x5b   :  { %p8241_p0 = pnand %p8239_p13, %p8236_p12 }
  0x5d   :  { %8244 = shalt.err (!%p8241_p0)
}
  0x5e   :  { %s8245_s27 = scalar_lea.vmem %s8453_s25, 4096  ;;  %p8250_p2 = scmp.lt.s32.totalorder %s8453_s25, %s8453_s25 }
  0x5f   :  { %p8246_p1 = scmp.ne.s32.totalorder %s8453_s25, %s8245_s27  ;;  %p8251_p3 = scmp.lt.s32.totalorder %s8245_s27, %s8245_s27 }
  0x61   :  { %p8252_p4 = por %p8251_p3, %p8250_p2 }
  0x63   :  { %p8253_p5 = pnand %p8252_p4, %p8246_p1 }
  0x65   :  { %8256 = shalt.err (!%p8253_p5)
}
  0x66   :  { %87 = dma.hbm_to_vmem [thread:$0]  %s9697_s7, 4096, %s8453_s25, [#allocation11], %s8312_s13, %s8312_s13, %s8313_s14  }
  0x67   :  { %s8323_s2 = smov [#allocation15]   ;;  %s8257_s15 = scalar_lea.hbm %s9700_s10, 1024 }
  0x68   :  { %s107_s22 = sshll.u32 %s8323_s2, 4  ;;  %p8258_p6 = scmp.ne.s32.totalorder %s9700_s10, %s8257_s15  ;;  %s108_s22 = int_to_ptr.vmem [resolvable:$true] %s107_s22 }
  0x69   :  { %p8261_p7 = scmp.lt.u32.totalorder %s8257_s15, %s9700_s10 }
  0x6b   :  { %p8263_p8 = pnand %p8261_p7, %p8258_p6 }
  0x6d   :  { %8266 = shalt.err (!%p8263_p8)
}
  0x6e   :  { %s8267_s19 = scalar_lea.vmem %s108_s22, 1024  ;;  %p8272_p10 = scmp.lt.s32.totalorder %s108_s22, %s108_s22 }
  0x6f   :  { %p8268_p9 = scmp.ne.s32.totalorder %s108_s22, %s8267_s19  ;;  %p8273_p11 = scmp.lt.s32.totalorder %s8267_s19, %s8267_s19 }
  0x71   :  { %p8274_p12 = por %p8273_p11, %p8272_p10 }
  0x73   :  { %p8275_p13 = pnand %p8274_p12, %p8268_p9 }
  0x75   :  { %8278 = shalt.err (!%p8275_p13)
}
  0x76   :  { %113 = dma.hbm_to_vmem [thread:$0]  %s9700_s10, 1024, %s108_s22, [#allocation14], %s8319_s8, %s8319_s8, %s8320_s20  }
  0x77   :  { %8301 = dma.done.wait [#allocation5], 1024  }
  0x78   :  { %8302 = vsyncadd [#allocation5], 4294966272 }
  0x79   :  { %8303 = dma.done.wait [#allocation8], 8192  }
  0x7a   :  { %8304 = vsyncadd [#allocation8], 4294959104 }
  0x7b   :  { %8305 = dma.done.wait [#allocation11], 8192  }
  0x7c   :  { %8306 = vsyncadd [#allocation11], 4294959104 }
  0x7d   :  { %8307 = dma.done.wait [#allocation14], 4096  }
  0x7e   :  { %8308 = vsyncadd [#allocation14], 4294963200  ;;  %v9706_v0 = vmov 0   ;;  %v9703_v1 = vmov 0.0   ;;  %v138_v2 = vld [vmem:[%s9690_s0] sm:$0xff]  ;;  %v7525_v3 = vld [vmem:[#allocation4] sm:$0xff]   ;;  %v140_v27 = vlaneseq }
  0x7f   :  { %7524 = vset.pattern.permute.xlu0 %v9706_v0  ;;  %7427 = vmatprep.subr.bf16.mxu0 %v9703_v1  ;;  %v139_v4 = vld [vmem:[%s9690_s0 + $0x8] sm:$0xff]  ;;  %v7526_v5 = vld [vmem:[#allocation4 + $0x8] sm:$0xff]   ;;  %vm8326_vm0 = vmmov 0   ;;  %v7527_v6 = vld [vmem:[#allocation4 + $0x10] sm:$0xff]   ;;  %v8327_v33 = vmov 1.0|1.0  }
  0x80   :  { %563 = vmatprep.mubr.bf16.mxu1 %v9706_v0  ;;  %143 = vperm.xlu0 %7524, %v138_v2   ;;  %v7533_v7 = vld [vmem:[#allocation7 + $0x4] ss:$16 sps:$4 sm:$0xff]   ;;  %v7528_v8 = vld [vmem:[#allocation4 + $0x18] sm:$0xff]   ;;  %v7538_v9 = vld [vmem:[#allocation7] ss:$16 sps:$4 sm:$0xff]   ;;  %v8524_v29 = vand.u32 127, %v140_v27 }
  0x81   :  { %7428 = vmatpush3.bf16.msra.mxu0 %v7525_v3  ;;  %7443 = vmatprep.mubr.msk.bf16.mxu0 %vm8326_vm0, %v9703_v1  ;;  %v7539_v10 = vld [vmem:[#allocation7 + $0x24] ss:$16 sps:$4 sm:$0xff]   ;;  %v7544_v11 = vld [vmem:[#allocation7 + $0x20] ss:$16 sps:$4 sm:$0xff]   ;;  %v7530_v16 = vld [vmem:[#allocation4 + $0x28] sm:$0xff]   ;;  %vm6484_vm9 = vcmask 130048  }
  0x82   :  { %7429 = vmatprep.subr.bf16.mxu0 %v9703_v1  ;;  %531 = vmatprep.subr.bf16.mxu1 %v7533_v7  ;;  %v7545_v12 = vld [vmem:[#allocation7 + $0x44] ss:$16 sps:$4 sm:$0xff]   ;;  %v7550_v14 = vld [vmem:[#allocation7 + $0x40] ss:$16 sps:$4 sm:$0xff]   ;;  %v7532_v21 = vld [vmem:[#allocation4 + $0x38] sm:$0xff]   ;;  %9730 = vst [vmem:[#allocation22_spill] sm:$0xff] %v8524_v29 }
  0x83   :  { %532 = vmatpush1.bf16.msra.mxu1 %v7538_v9  ;;  %v7529_v13 = vld [vmem:[#allocation4 + $0x20] sm:$0xff]   ;;  %v7531_v17 = vld [vmem:[#allocation4 + $0x30] sm:$0xff]   ;;  %v7537_v23 = vld [vmem:[#allocation7 + $0xc] ss:$16 sps:$4 sm:$0xff]   ;;  %vm311_vm4 = vcmp.lt.s32.totalorder %v8524_v29, 64  ;;  %s8328_s18 = smov [#allocation16]  }
  0x84   :  { %146 = vperm.xlu0 %7524, %v139_v4   ;;  %533 = vmatprep.subr.bf16.mxu1 %v7539_v10  ;;  %v7551_v15 = vld [vmem:[#allocation7 + $0x64] ss:$16 sps:$4 sm:$0xff]   ;;  %v7556_v18 = vld [vmem:[#allocation7 + $0x60] ss:$16 sps:$4 sm:$0xff]   ;;  %v7535_v31 = vld [vmem:[#allocation7 + $0x8] ss:$16 sps:$4 sm:$0xff]  }
  0x85   :  { %7430 = vmatpush3.bf16.msra.mxu0 %v7526_v5  ;;  %v7557_v19 = vld [vmem:[#allocation7 + $0x84] ss:$16 sps:$4 sm:$0xff]   ;;  %v7562_v20 = vld [vmem:[#allocation7 + $0x80] ss:$16 sps:$4 sm:$0xff]   ;;  %v7543_v32 = vld [vmem:[#allocation7 + $0x2c] ss:$16 sps:$4 sm:$0xff]  }
  0x86   :  { %7431 = vmatprep.subr.bf16.mxu0 %v9703_v1  ;;  %v7563_v22 = vld [vmem:[#allocation7 + $0xa4] ss:$16 sps:$4 sm:$0xff]   ;;  %v7568_v24 = vld [vmem:[#allocation7 + $0xa0] ss:$16 sps:$4 sm:$0xff]   ;;  %v7541_v34 = vld [vmem:[#allocation7 + $0x28] ss:$16 sps:$4 sm:$0xff]  }
  0x87   :  { %534 = vmatpush1.bf16.msra.mxu1 %v7544_v11  ;;  %v7569_v25 = vld [vmem:[#allocation7 + $0xc4] ss:$16 sps:$4 sm:$0xff]   ;;  %v7574_v26 = vld [vmem:[#allocation7 + $0xc0] ss:$16 sps:$4 sm:$0xff]   ;;  %v7549_v35 = vld [vmem:[#allocation7 + $0x4c] ss:$16 sps:$4 sm:$0xff]  }
  0x88   :  { %535 = vmatprep.subr.bf16.mxu1 %v7545_v12  ;;  %v7547_v36 = vld [vmem:[#allocation7 + $0x48] ss:$16 sps:$4 sm:$0xff]   ;;  %v7555_v37 = vld [vmem:[#allocation7 + $0x6c] ss:$16 sps:$4 sm:$0xff]   ;;  %v7575_v45 = vld [vmem:[#allocation7 + $0xe4] ss:$16 sps:$4 sm:$0xff]  }
  0x89   :  { %7432 = vmatpush3.bf16.msra.mxu0 %v7527_v6  ;;  %v7553_v38 = vld [vmem:[#allocation7 + $0x68] ss:$16 sps:$4 sm:$0xff]   ;;  %v7561_v39 = vld [vmem:[#allocation7 + $0x8c] ss:$16 sps:$4 sm:$0xff]   ;;  %v7580_v48 = vld [vmem:[#allocation7 + $0xe0] ss:$16 sps:$4 sm:$0xff]  }
  0x8a   :  { %7433 = vmatprep.subr.bf16.mxu0 %v9703_v1  ;;  %v7559_v40 = vld [vmem:[#allocation7 + $0x88] ss:$16 sps:$4 sm:$0xff]   ;;  %v7567_v41 = vld [vmem:[#allocation7 + $0xac] ss:$16 sps:$4 sm:$0xff]   ;;  %v8529_v49 = vld [vmem:[#allocation9 + $0x4] ss:$16 sps:$4 sm:$0xff]  }
  0x8b   :  { %536 = vmatpush1.bf16.msra.mxu1 %v7550_v14  ;;  %v7565_v42 = vld [vmem:[#allocation7 + $0xa8] ss:$16 sps:$4 sm:$0xff]   ;;  %v7573_v43 = vld [vmem:[#allocation7 + $0xcc] ss:$16 sps:$4 sm:$0xff]   ;;  %v8535_v54 = vld [vmem:[#allocation9] ss:$16 sps:$4 sm:$0xff]  }
  0x8c   :  { %537 = vmatprep.subr.bf16.mxu1 %v7551_v15  ;;  %v7571_v44 = vld [vmem:[#allocation7 + $0xc8] ss:$16 sps:$4 sm:$0xff]   ;;  %v7579_v46 = vld [vmem:[#allocation7 + $0xec] ss:$16 sps:$4 sm:$0xff]   ;;  %v8539_v58 = vld [vmem:[#allocation9 + $0x24] ss:$16 sps:$4 sm:$0xff]  }
  0x8d   :  { %7434 = vmatpush3.bf16.msra.mxu0 %v7528_v8  ;;  %v7577_v47 = vld [vmem:[#allocation7 + $0xe8] ss:$16 sps:$4 sm:$0xff]   ;;  %v8531_v50 = vld [vmem:[#allocation9 + $0xc] ss:$16 sps:$4 sm:$0xff]   ;;  %v8545_v60 = vld [vmem:[#allocation9 + $0x20] ss:$16 sps:$4 sm:$0xff]  }
  0x8e   :  { %7435 = vmatprep.subr.bf16.mxu0 %v9703_v1  ;;  %v8537_v55 = vld [vmem:[#allocation9 + $0x8] ss:$16 sps:$4 sm:$0xff]   ;;  %v8541_v59 = vld [vmem:[#allocation9 + $0x2c] ss:$16 sps:$4 sm:$0xff]   ;;  %v8551_v62 = vld [vmem:[#allocation9 + $0x44] ss:$16 sps:$4 sm:$0xff]  }
  0x8f   :  { %538 = vmatpush1.bf16.msra.mxu1 %v7556_v18  ;;  %v8547_v61 = vld [vmem:[#allocation9 + $0x28] ss:$16 sps:$4 sm:$0xff]   ;;  %v8553_v63 = vld [vmem:[#allocation9 + $0x4c] ss:$16 sps:$4 sm:$0xff]   ;;  %v8559_v2 = vld [vmem:[#allocation9 + $0x40] ss:$16 sps:$4 sm:$0xff]  }
  0x90   :  { %539 = vmatprep.subr.bf16.mxu1 %v7557_v19  ;;  %v8561_v3 = vld [vmem:[#allocation9 + $0x48] ss:$16 sps:$4 sm:$0xff]   ;;  %v8565_v4 = vld [vmem:[#allocation9 + $0x64] ss:$16 sps:$4 sm:$0xff]   ;;  %v8567_v5 = vld [vmem:[#allocation9 + $0x6c] ss:$16 sps:$4 sm:$0xff]  }
  0x91   :  { %7436 = vmatpush3.bf16.msra.mxu0 %v7529_v13  ;;  %v8571_v6 = vld [vmem:[#allocation9 + $0x60] ss:$16 sps:$4 sm:$0xff]   ;;  %v8573_v7 = vld [vmem:[#allocation9 + $0x68] ss:$16 sps:$4 sm:$0xff]   ;;  %v8577_v8 = vld [vmem:[#allocation9 + $0x84] ss:$16 sps:$4 sm:$0xff]  }
  0x92   :  { %7437 = vmatprep.subr.bf16.mxu0 %v9703_v1  ;;  %v8579_v9 = vld [vmem:[#allocation9 + $0x8c] ss:$16 sps:$4 sm:$0xff]   ;;  %v8583_v10 = vld [vmem:[#allocation9 + $0x80] ss:$16 sps:$4 sm:$0xff]   ;;  %v8585_v11 = vld [vmem:[#allocation9 + $0x88] ss:$16 sps:$4 sm:$0xff]  }
  0x93   :  { %540 = vmatpush1.bf16.msra.mxu1 %v7562_v20  ;;  %v8589_v12 = vld [vmem:[#allocation9 + $0xa4] ss:$16 sps:$4 sm:$0xff]   ;;  %v8591_v13 = vld [vmem:[#allocation9 + $0xac] ss:$16 sps:$4 sm:$0xff]   ;;  %v8595_v14 = vld [vmem:[#allocation9 + $0xa0] ss:$16 sps:$4 sm:$0xff]  }
  0x94   :  { %541 = vmatprep.subr.bf16.mxu1 %v7563_v22  ;;  %v8597_v15 = vld [vmem:[#allocation9 + $0xa8] ss:$16 sps:$4 sm:$0xff]   ;;  %v8607_v18 = vld [vmem:[#allocation9 + $0xc0] ss:$16 sps:$4 sm:$0xff]   ;;  %v8613_v20 = vld [vmem:[#allocation9 + $0xe4] ss:$16 sps:$4 sm:$0xff]  }
  0x95   :  { %7438 = vmatpush3.bf16.msra.mxu0 %v7530_v16  ;;  %v8601_v16 = vld [vmem:[#allocation9 + $0xc4] ss:$16 sps:$4 sm:$0xff]   ;;  %v8609_v19 = vld [vmem:[#allocation9 + $0xc8] ss:$16 sps:$4 sm:$0xff]   ;;  %v8619_v22 = vld [vmem:[#allocation9 + $0xe0] ss:$16 sps:$4 sm:$0xff]  }
  0x96   :  { %7439 = vmatprep.subr.bf16.mxu0 %v9703_v1  ;;  %s6708_s26 = sshll.u32 %s8328_s18, 4  ;;  %s6709_s26 = int_to_ptr.vmem [resolvable:$true] %s6708_s26 }
  0x97   :  { %542 = vmatpush1.bf16.msra.mxu1 %v7568_v24  ;;  %v8666_v24 = vshrl.u32 %v140_v27, 7  ;;  %v260_v27 = vadd.s32 128, %v8524_v29  ;;  %s8279_s27 = scalar_lea.vmem %s6709_s26, 256  ;;  %p8284_p1 = scmp.lt.s32.totalorder %s6709_s26, %s6709_s26 }
  0x98   :  { %543 = vmatprep.subr.bf16.mxu1 %v7569_v25  ;;  %p8280_p0 = scmp.ne.s32.totalorder %s6709_s26, %s8279_s27  ;;  %p8285_p2 = scmp.lt.s32.totalorder %s8279_s27, %s8279_s27 }
  0x99   :  { %7440 = vmatpush3.bf16.msra.mxu0 %v7531_v17  ;;  %v8603_v17 = vld [vmem:[#allocation9 + $0xcc] ss:$16 sps:$4 sm:$0xff]   ;;  %9731 = vst [vmem:[#allocation23_spill] sm:$0xff] %v8666_v24  ;;  %v8669_v25 = vsub.s32 0, %v8666_v24 }
  0x9a   :  { %7441 = vmatprep.subr.bf16.mxu0 %v9703_v1  ;;  %p8286_p3 = por %p8285_p2, %p8284_p1 }
  0x9b   :  { %544 = vmatpush1.bf16.msra.mxu1 %v7574_v26  ;;  %9732 = vst [vmem:[#allocation24_spill] sm:$0xff] %v8669_v25  ;;  %v8672_v26 = vsub.s32 2, %v8666_v24 }
  0x9c   :  { %545 = vmatprep.subr.bf16.mxu1 %v7575_v45  ;;  %p8287_p4 = pnand %p8286_p3, %p8280_p0 }
  0x9d   :  { %7442 = vmatpush3.bf16.msra.mxu0 %v7532_v21  ;;  %v8615_v21 = vld [vmem:[#allocation9 + $0xec] ss:$16 sps:$4 sm:$0xff]   ;;  %9733 = vst [vmem:[#allocation25_spill] sm:$0xff] %v8672_v26 }
  0x9e   :  { %574 = vmatprep.subr.bf16.mxu0 %v7537_v23  ;;  %v8621_v23 = vld [vmem:[#allocation9 + $0xe8] ss:$16 sps:$4 sm:$0xff]  }
  0x9f   :  { %546 = vmatpush1.bf16.msra.mxu1 %v7580_v48 }
  0xa0   :  { %825 = vmatprep.subr.bf16.mxu1 %v8529_v49 }
  0xff   :  { %v144_v28 = vpop.permute.xlu0 %143 }
 0x100   :  { %vm148_vm1 = vcmp.eq.s32.totalorder %v8524_v29, %v144_v28  ;;  %v261_v28 = vadd.s32 256, %v8524_v29 }
 0x103   :  { %v147_v30 = vpop.permute.xlu0 %146 }
 0x104   :  { %vm149_vm2 = vcmp.eq.s32.totalorder %v8524_v29, %v147_v30  ;;  %v349_v30 = vld [vmem:[%s9693_s3] sm:$0xf] }
 0x105   :  { %vm6733_vm3 = vmpackc.low %vm149_vm2, %vm148_vm1 }
 0x106   :  { %7444 = vmatmul.mubr.msk.bf16.vlgmr.msra.gmra.mrb[0].mxu0 %vm6733_vm3, %v8327_v33  ;;  %v262_v33 = vadd.s32 384, %v8524_v29 }
 0x107   :  { %575 = vmatpush1.bf16.msra.mxu0 %v7535_v31  ;;  %606 = vmatprep.mubr.bf16.mxu0 %v9706_v0  ;;  %v8679_v31 = vsub.s32 1, %v8666_v24 }
 0x108   :  { %576 = vmatprep.subr.bf16.mxu0 %v7543_v32  ;;  %v9705_v32 = vsub.s32 3, %v8666_v24 }
 0x109   :  { %9734 = vst [vmem:[#allocation26_spill] sm:$0xff] %v8679_v31 }
 0x10b   :  { %577 = vmatpush1.bf16.msra.mxu0 %v7541_v34  ;;  %v354_v34 = vrot.slane %v349_v30, %v8669_v25 }
 0x10c   :  { %578 = vmatprep.subr.bf16.mxu0 %v7549_v35  ;;  %v362_v35 = vrot.slane %v349_v30, %v8672_v26 }
 0x10f   :  { %579 = vmatpush1.bf16.msra.mxu0 %v7547_v36  ;;  %v281_v36 = vand.u32 127, %v261_v28 }
 0x110   :  { %580 = vmatprep.subr.bf16.mxu0 %v7555_v37  ;;  %v358_v37 = vrot.slane %v349_v30, %v8679_v31 }
 0x111   :  { %vm8690_vm5 = vcmp.lt.s32.totalorder %v281_v36, 64 }
 0x113   :  { %581 = vmatpush1.bf16.msra.mxu0 %v7553_v38  ;;  %v366_v38 = vrot.slane %v349_v30, %v9705_v32 }
 0x114   :  { %582 = vmatprep.subr.bf16.mxu0 %v7561_v39  ;;  %v274_v39 = vand.u32 127, %v260_v27 }
 0x116   :  { %vm8694_vm6 = vcmp.lt.s32.totalorder %v274_v39, 64 }
 0x117   :  { %583 = vmatpush1.bf16.msra.mxu0 %v7559_v40  ;;  %v288_v40 = vand.u32 127, %v262_v33 }
 0x118   :  { %584 = vmatprep.subr.bf16.mxu0 %v7567_v41 }
 0x119   :  { %vm8698_vm7 = vcmp.lt.s32.totalorder %v288_v40, 64 }
 0x11b   :  { %585 = vmatpush1.bf16.msra.mxu0 %v7565_v42 }
 0x11c   :  { %586 = vmatprep.subr.bf16.mxu0 %v7573_v43 }
 0x11f   :  { %587 = vmatpush1.bf16.msra.mxu0 %v7571_v44 }
 0x120   :  { %588 = vmatprep.subr.bf16.mxu0 %v7579_v46 }
 0x123   :  { %589 = vmatpush1.bf16.msra.mxu0 %v7577_v47  ;;  %v9735_v47 = vmov 0 }
 0x124   :  { %866 = vmatprep.subr.bf16.mxu0 %v8531_v50  ;;  %v9736_v47 = vsel %vm8690_vm5, 4294967295, %v9735_v47 }
 0x125   :  { %9737 = vst [vmem:[#allocation27_spill] sm:$0xff] %v9736_v47 }
 0x1d9   :  { %v253_v51 = vpop.f32.mrb[0].mxu0 }
 0x1da   :  { %v7445_v52 = vpop.f32.mrb[1].mxu0 }
 0x1db   :  { %v256_v53 = vpop.f32.mrb[2].mxu0 }
 0x1dc   :  { %v316_v56 = vpack.c.bf16 %v256_v53, %v253_v51  ;;  %v7446_v57 = vpop.f32.mrb[3].mxu0 }
 0x1dd   :  { %v9741_v57 = vmov 0 }
 0x1de   :  { %564 = vmatmul.mubr.bf16.vlgmr.msra.gmra.mrb[0].mxu1 %v316_v56  ;;  %607 = vmatmul.mubr.bf16.vlgmr.msra.gmra.mrb[4].mxu0 %v316_v56  ;;  %v9738_v56 = vmov 0  ;;  %v9742_v57 = vsel %vm8698_vm7, 4294967295, %v9741_v57 }
 0x1df   :  { %826 = vmatpush1.bf16.msra.mxu1 %v8535_v54  ;;  %867 = vmatpush1.bf16.msra.mxu0 %v8537_v55  ;;  %v9739_v56 = vsel %vm8694_vm6, 4294967295, %v9738_v56  ;;  %9743 = vst [vmem:[#allocation29_spill] sm:$0xff] %v9742_v57 }
 0x1e0   :  { %827 = vmatprep.subr.bf16.mxu1 %v8539_v58  ;;  %868 = vmatprep.subr.bf16.mxu0 %v8541_v59  ;;  %9740 = vst [vmem:[#allocation28_spill] sm:$0xff] %v9739_v56 }
 0x1e1   :  { %857 = vmatprep.mubr.bf16.mxu1 %v9706_v0  ;;  %898 = vmatprep.mubr.bf16.mxu0 %v9706_v0 }
 0x1e3   :  { %828 = vmatpush1.bf16.msra.mxu1 %v8545_v60  ;;  %869 = vmatpush1.bf16.msra.mxu0 %v8547_v61 }
 0x1e4   :  { %829 = vmatprep.subr.bf16.mxu1 %v8551_v62  ;;  %870 = vmatprep.subr.bf16.mxu0 %v8553_v63 }
 0x1e7   :  { %830 = vmatpush1.bf16.msra.mxu1 %v8559_v2  ;;  %871 = vmatpush1.bf16.msra.mxu0 %v8561_v3 }
 0x1e8   :  { %831 = vmatprep.subr.bf16.mxu1 %v8565_v4  ;;  %872 = vmatprep.subr.bf16.mxu0 %v8567_v5 }
 0x1eb   :  { %832 = vmatpush1.bf16.msra.mxu1 %v8571_v6  ;;  %873 = vmatpush1.bf16.msra.mxu0 %v8573_v7 }
 0x1ec   :  { %833 = vmatprep.subr.bf16.mxu1 %v8577_v8  ;;  %874 = vmatprep.subr.bf16.mxu0 %v8579_v9 }
 0x1ef   :  { %834 = vmatpush1.bf16.msra.mxu1 %v8583_v10  ;;  %875 = vmatpush1.bf16.msra.mxu0 %v8585_v11 }
 0x1f0   :  { %835 = vmatprep.subr.bf16.mxu1 %v8589_v12  ;;  %876 = vmatprep.subr.bf16.mxu0 %v8591_v13 }
 0x1f3   :  { %836 = vmatpush1.bf16.msra.mxu1 %v8595_v14  ;;  %877 = vmatpush1.bf16.msra.mxu0 %v8597_v15 }
 0x1f4   :  { %837 = vmatprep.subr.bf16.mxu1 %v8601_v16  ;;  %878 = vmatprep.subr.bf16.mxu0 %v8603_v17 }
 0x1f7   :  { %838 = vmatpush1.bf16.msra.mxu1 %v8607_v18  ;;  %879 = vmatpush1.bf16.msra.mxu0 %v8609_v19 }
 0x1f8   :  { %839 = vmatprep.subr.bf16.mxu1 %v8613_v20  ;;  %880 = vmatprep.subr.bf16.mxu0 %v8615_v21 }
 0x1fb   :  { %840 = vmatpush1.bf16.msra.mxu1 %v8619_v22  ;;  %881 = vmatpush1.bf16.msra.mxu0 %v8621_v23 }
 0x1fc   :  { %1142 = vmatprep.subr.bf16.mxu1 %v8529_v49  ;;  %1183 = vmatprep.subr.bf16.mxu0 %v8531_v50 }
 0x1fe   :  { %858 = vmatmul.mubr.bf16.vlgmr.msra.gmra.mrb[4].mxu1 %v9706_v0  ;;  %899 = vmatmul.mubr.bf16.vlgmr.msra.gmra.mrb[8].mxu0 %v9706_v0 }
 0x1ff   :  { %1143 = vmatpush1.bf16.msra.mxu1 %v8535_v54  ;;  %1184 = vmatpush1.bf16.msra.mxu0 %v8537_v55 }
 0x200   :  { %1144 = vmatprep.subr.bf16.mxu1 %v8539_v58  ;;  %1185 = vmatprep.subr.bf16.mxu0 %v8541_v59 }
 0x201   :  { %1174 = vmatprep.mubr.bf16.mxu1 %v9706_v0  ;;  %1215 = vmatprep.mubr.bf16.mxu0 %v9706_v0 }
 0x203   :  { %1145 = vmatpush1.bf16.msra.mxu1 %v8545_v60  ;;  %1186 = vmatpush1.bf16.msra.mxu0 %v8547_v61 }
 0x204   :  { %1146 = vmatprep.subr.bf16.mxu1 %v8551_v62  ;;  %1187 = vmatprep.subr.bf16.mxu0 %v8553_v63 }
 0x207   :  { %1147 = vmatpush1.bf16.msra.mxu1 %v8559_v2  ;;  %1188 = vmatpush1.bf16.msra.mxu0 %v8561_v3 }
 0x208   :  { %1148 = vmatprep.subr.bf16.mxu1 %v8565_v4  ;;  %1189 = vmatprep.subr.bf16.mxu0 %v8567_v5 }
 0x20b   :  { %1149 = vmatpush1.bf16.msra.mxu1 %v8571_v6  ;;  %1190 = vmatpush1.bf16.msra.mxu0 %v8573_v7 }
 0x20c   :  { %1150 = vmatprep.subr.bf16.mxu1 %v8577_v8  ;;  %1191 = vmatprep.subr.bf16.mxu0 %v8579_v9 }
 0x20f   :  { %1151 = vmatpush1.bf16.msra.mxu1 %v8583_v10  ;;  %1192 = vmatpush1.bf16.msra.mxu0 %v8585_v11 }
 0x210   :  { %1152 = vmatprep.subr.bf16.mxu1 %v8589_v12  ;;  %1193 = vmatprep.subr.bf16.mxu0 %v8591_v13 }
 0x213   :  { %1153 = vmatpush1.bf16.msra.mxu1 %v8595_v14  ;;  %1194 = vmatpush1.bf16.msra.mxu0 %v8597_v15 }
 0x214   :  { %1154 = vmatprep.subr.bf16.mxu1 %v8601_v16  ;;  %1195 = vmatprep.subr.bf16.mxu0 %v8603_v17 }
 0x217   :  { %1155 = vmatpush1.bf16.msra.mxu1 %v8607_v18  ;;  %1196 = vmatpush1.bf16.msra.mxu0 %v8609_v19 }
 0x218   :  { %1156 = vmatprep.subr.bf16.mxu1 %v8613_v20  ;;  %1197 = vmatprep.subr.bf16.mxu0 %v8615_v21 }
 0x21b   :  { %1157 = vmatpush1.bf16.msra.mxu1 %v8619_v22  ;;  %1198 = vmatpush1.bf16.msra.mxu0 %v8621_v23 }
 0x21c   :  { %1465 = vmatprep.subr.bf16.mxu1 %v8529_v49  ;;  %1506 = vmatprep.subr.bf16.mxu0 %v8531_v50 }
 0x2b1   :  { %v565_v41 = vpop.f32.mrb[0].mxu1  ;;  %v608_v42 = vpop.f32.mrb[4].mxu0 }
 0x2b2   :  { %v566_v43 = vadd.f32 %v565_v41, %v354_v34  ;;  %v609_v44 = vadd.f32 %v608_v42, %v362_v35  ;;  %v567_v45 = vpop.f32.mrb[1].mxu1  ;;  %v610_v46 = vpop.f32.mrb[5].mxu0 }
 0x2b3   :  { %v568_v48 = vadd.f32 %v567_v45, %v358_v37  ;;  %v611_v51 = vadd.f32 %v610_v46, %v366_v38  ;;  %v569_v52 = vpop.f32.mrb[2].mxu1  ;;  %v612_v53 = vpop.f32.mrb[6].mxu0 }
 0x2b4   :  { %v570_v28 = vadd.f32 %v569_v52, %v354_v34  ;;  %v613_v30 = vadd.f32 %v612_v53, %v362_v35  ;;  %v571_v27 = vpop.f32.mrb[3].mxu1  ;;  %v614_v33 = vpop.f32.mrb[7].mxu0  ;;  %v1919_v36 = vrot.slane %v566_v43, 6  ;;  %v1921_v41 = vrot.slane %v609_v44, 6 }
 0x2b5   :  { %v572_v42 = vadd.f32 %v571_v27, %v358_v37  ;;  %v615_v1 = vadd.f32 %v614_v33, %v366_v38  ;;  %v1920_v45 = vrot.slane %v568_v48, 6  ;;  %v1922_v46 = vrot.slane %v611_v51, 6 }
 0x2b6   :  { %v621_v32 = vrot.slane %v570_v28, 6  ;;  %v623_v0 = vrot.slane %v613_v30, 6  ;;  %v937_v39 = vrot.slane %v570_v28, 2  ;;  %v939_v24 = vrot.slane %v613_v30, 2 }
 0x2b7   :  { %v622_v31 = vrot.slane %v572_v42, 6  ;;  %v624_v26 = vrot.slane %v615_v1, 6  ;;  %v938_v40 = vrot.slane %v572_v42, 2  ;;  %v940_v25 = vrot.slane %v615_v1, 2 }
 0x2b8   :  { %v8704_v34 = vsel %vm311_vm4, %v566_v43, %v621_v32  ;;  %v8708_v35 = vsel %vm8690_vm5, %v609_v44, %v623_v0  ;;  %v8712_v37 = vsel %vm311_vm4, %v566_v43, %v937_v39  ;;  %v8716_v38 = vsel %vm8690_vm5, %v609_v44, %v939_v24 }
 0x2b9   :  { %v8720_v52 = vsel %vm8694_vm6, %v568_v48, %v622_v31  ;;  %v8724_v32 = vsel %vm8698_vm7, %v611_v51, %v624_v26  ;;  %v8728_v0 = vsel %vm8694_vm6, %v568_v48, %v938_v40  ;;  %v8732_v53 = vsel %vm8698_vm7, %v611_v51, %v940_v25 }
 0x2ba   :  { %v8736_v24 = vsel %vm311_vm4, %v570_v28, %v1919_v36  ;;  %v8740_v31 = vsel %vm8690_vm5, %v613_v30, %v1921_v41  ;;  %v8744_v26 = vsel %vm8694_vm6, %v572_v42, %v1920_v45  ;;  %v8748_v27 = vsel %vm8698_vm7, %v615_v1, %v1922_v46 }
 0x2bb   :  { %v2242_v33 = vrot.slane %v566_v43, 2  ;;  %v2244_v39 = vrot.slane %v609_v44, 2  ;;  %v2243_v25 = vrot.slane %v568_v48, 2  ;;  %v2245_v40 = vrot.slane %v611_v51, 2 }
 0x2bd   :  { %v8752_v36 = vsel %vm311_vm4, %v570_v28, %v2242_v33  ;;  %v8756_v41 = vsel %vm8690_vm5, %v613_v30, %v2244_v39  ;;  %v8760_v45 = vsel %vm8694_vm6, %v572_v42, %v2243_v25  ;;  %v8764_v46 = vsel %vm8698_vm7, %v615_v1, %v2245_v40 }
 0x2be   :  { %9744 = vst [vmem:[#allocation30_spill] sm:$0xff] %v8756_v41  ;;  %9745 = vst [vmem:[#allocation31_spill] sm:$0xff] %v8764_v46 }
 0x2d1   :  { %v859_v43 = vpop.f32.mrb[4].mxu1  ;;  %v900_v44 = vpop.f32.mrb[8].mxu0 }
 0x2d2   :  { %v907_v48 = vadd.f32 %v859_v43, %v8704_v34  ;;  %v861_v51 = vpop.f32.mrb[5].mxu1  ;;  %v902_v29 = vpop.f32.mrb[9].mxu0  ;;  %v909_v25 = vadd.f32 %v900_v44, %v8708_v35 }
 0x2d3   :  { %v908_v28 = vadd.f32 %v861_v51, %v8720_v52  ;;  %v863_v33 = vpop.f32.mrb[6].mxu1  ;;  %v904_v47 = vpop.f32.mrb[10].mxu0  ;;  %v910_v42 = vadd.f32 %v902_v29, %v8724_v32 }
 0x2d4   :  { %v6799_v30 = vmul.f32 -1.442695, %v907_v48  ;;  %v864_v39 = vpop.f32.mrb[7].mxu1  ;;  %v905_v41 = vpop.f32.mrb[11].mxu0 }
 0x2d5   :  { %v6800_v56 = vmul.f32 -1.442695, %v908_v28  ;;  %v6801_v1 = vmul.f32 -1.442695, %v910_v42 }
 0x2d6   :  { %7861 = vpow2.f32 %v6799_v30 }
 0x2d7   :  { %7863 = vpow2.f32 %v6800_v56 }
 0x2d8   :  { %7865 = vpow2.f32 %v6801_v1 }
 0x2d9   :  { %7867 = vtanh.f32 %v909_v25 }
 0x2e0   :  { %v7862_v40 = vpop.eup %7861 }
 0x2e1   :  { %v7864_v57 = vpop.eup %7863  ;;  %v914_v43 = vadd.f32 1.0, %v7862_v40 }
 0x2e2   :  { %v920_v46 = vadd.f32 1.0, %v7864_v57  ;;  %v7866_v47 = vpop.eup %7865 }
 0x2e3   :  { %7869 = vrcp.f32 %v914_v43  ;;  %v7868_v48 = vpop.eup %7867  ;;  %v927_v33 = vadd.f32 1.0, %v7866_v47 }
 0x2e4   :  { %7871 = vrcp.f32 %v920_v46  ;;  %v9746_v46 = vmov 0  }
 0x2e5   :  { %7873 = vrcp.f32 %v927_v33 }
 0x2ed   :  { %v7870_v51 = vpop.eup %7869 }
 0x2ee   :  { %v7872_v41 = vpop.eup %7871  ;;  %v931_v28 = vmul.f32 %v7870_v51, %v7868_v48 }
 0x2ef   :  { %v930_v56 = vmul.f32 0.0, %v7872_v41  ;;  %v7874_v29 = vpop.eup %7873 }
 0x2f1   :  { %v8770_v30 = vadd.f32 %v931_v28, %v930_v56 }
 0x2f3   :  { %7875 = vtanh.f32 %v8770_v30 }
 0x2fd   :  { %v7876_v44 = vpop.eup %7875 }
 0x2fe   :  { %v934_v39 = vmul.f32 %v7876_v44, %v7874_v29 }
 0x300   :  { %935 = vst [vmem:[#allocation2] sm:$0x3] %v934_v39  ;;  %936 = vst [vmem:[#allocation3 + $0xe] sm:$0x3] %v934_v39  ;;  %v949_v57 = vpack.c.bf16 %v934_v39, %v934_v39 }
 0x302   :  { %1175 = vmatmul.mubr.bf16.vlgmr.msra.gmra.mrb[8].mxu1 %v949_v57  ;;  %1216 = vmatmul.mubr.bf16.vlgmr.msra.gmra.mrb[12].mxu0 %v949_v57 }
 0x303   :  { %1466 = vmatpush1.bf16.msra.mxu1 %v8535_v54  ;;  %1507 = vmatpush1.bf16.msra.mxu0 %v8537_v55 }
 0x304   :  { %1467 = vmatprep.subr.bf16.mxu1 %v8539_v58  ;;  %1508 = vmatprep.subr.bf16.mxu0 %v8541_v59 }
 0x305   :  { %1497 = vmatprep.mubr.bf16.mxu1 %v9746_v46  ;;  %1538 = vmatprep.mubr.bf16.mxu0 %v9746_v46 }
 0x307   :  { %1468 = vmatpush1.bf16.msra.mxu1 %v8545_v60  ;;  %1509 = vmatpush1.bf16.msra.mxu0 %v8547_v61 }
 0x308   :  { %1469 = vmatprep.subr.bf16.mxu1 %v8551_v62  ;;  %1510 = vmatprep.subr.bf16.mxu0 %v8553_v63 }
 0x30b   :  { %1470 = vmatpush1.bf16.msra.mxu1 %v8559_v2  ;;  %1511 = vmatpush1.bf16.msra.mxu0 %v8561_v3 }
 0x30c   :  { %1471 = vmatprep.subr.bf16.mxu1 %v8565_v4  ;;  %1512 = vmatprep.subr.bf16.mxu0 %v8567_v5 }
 0x30f   :  { %1472 = vmatpush1.bf16.msra.mxu1 %v8571_v6  ;;  %1513 = vmatpush1.bf16.msra.mxu0 %v8573_v7 }
 0x310   :  { %1473 = vmatprep.subr.bf16.mxu1 %v8577_v8  ;;  %1514 = vmatprep.subr.bf16.mxu0 %v8579_v9 }
 0x313   :  { %1474 = vmatpush1.bf16.msra.mxu1 %v8583_v10  ;;  %1515 = vmatpush1.bf16.msra.mxu0 %v8585_v11 }
 0x314   :  { %1475 = vmatprep.subr.bf16.mxu1 %v8589_v12  ;;  %1516 = vmatprep.subr.bf16.mxu0 %v8591_v13 }
 0x317   :  { %1476 = vmatpush1.bf16.msra.mxu1 %v8595_v14  ;;  %1517 = vmatpush1.bf16.msra.mxu0 %v8597_v15 }
 0x318   :  { %1477 = vmatprep.subr.bf16.mxu1 %v8601_v16  ;;  %1518 = vmatprep.subr.bf16.mxu0 %v8603_v17 }
 0x31b   :  { %1478 = vmatpush1.bf16.msra.mxu1 %v8607_v18  ;;  %1519 = vmatpush1.bf16.msra.mxu0 %v8609_v19 }
 0x31c   :  { %1479 = vmatprep.subr.bf16.mxu1 %v8613_v20  ;;  %1520 = vmatprep.subr.bf16.mxu0 %v8615_v21 }
 0x31f   :  { %1480 = vmatpush1.bf16.msra.mxu1 %v8619_v22  ;;  %1521 = vmatpush1.bf16.msra.mxu0 %v8621_v23 }
 0x320   :  { %1788 = vmatprep.subr.bf16.mxu1 %v8529_v49  ;;  %1829 = vmatprep.subr.bf16.mxu0 %v8531_v50 }
 0x3d5   :  { %v1176_v42 = vpop.f32.mrb[8].mxu1  ;;  %v1217_v1 = vpop.f32.mrb[12].mxu0 }
 0x3d6   :  { %v1228_v25 = vrot.slane %v1176_v42, 6  ;;  %v1178_v40 = vpop.f32.mrb[9].mxu1  ;;  %v1219_v43 = vpop.f32.mrb[13].mxu0  ;;  %v1230_v50 = vrot.slane %v1217_v1, 6 }
 0x3d7   :  { %v1229_v47 = vrot.slane %v1178_v40, 6  ;;  %v1180_v48 = vpop.f32.mrb[10].mxu1  ;;  %v1221_v51 = vpop.f32.mrb[14].mxu0  ;;  %v1231_v39 = vrot.slane %v1219_v43, 6  ;;  %v1260_v43 = vrot.slane %v8770_v30, 6 }
 0x3d8   :  { %v1236_v41 = vadd.f32 %v1228_v25, %v8712_v37  ;;  %v1181_v28 = vpop.f32.mrb[11].mxu1  ;;  %v1222_v33 = vpop.f32.mrb[15].mxu0  ;;  %v1238_v42 = vadd.f32 %v1230_v50, %v8716_v38 }
 0x3d9   :  { %v1237_v56 = vadd.f32 %v1229_v47, %v8728_v0  ;;  %v1239_v49 = vadd.f32 %v1231_v39, %v8732_v53 }
 0x3da   :  { %v6834_v29 = vmul.f32 -1.442695, %v1236_v41 }
 0x3db   :  { %v6835_v44 = vmul.f32 -1.442695, %v1237_v56  ;;  %v6836_v57 = vmul.f32 -1.442695, %v1239_v49 }
 0x3dc   :  { %7877 = vpow2.f32 %v6834_v29 }
 0x3dd   :  { %7879 = vpow2.f32 %v6835_v44 }
 0x3de   :  { %7881 = vpow2.f32 %v6836_v57 }
 0x3df   :  { %7883 = vtanh.f32 %v1238_v42 }
 0x3e6   :  { %v7878_v40 = vpop.eup %7877 }
 0x3e7   :  { %v7880_v48 = vpop.eup %7879  ;;  %v1243_v51 = vadd.f32 1.0, %v7878_v40 }
 0x3e8   :  { %v1249_v25 = vadd.f32 1.0, %v7880_v48  ;;  %v7882_v47 = vpop.eup %7881 }
 0x3e9   :  { %7885 = vrcp.f32 %v1243_v51  ;;  %v7884_v41 = vpop.eup %7883  ;;  %v1256_v29 = vadd.f32 1.0, %v7882_v47  ;;  %v8857_v51 = vld [vmem:[#allocation9 + $0x4] ss:$16 sps:$4 sm:$0xff]   ;;  %v8861_v47 = vld [vmem:[#allocation9] ss:$16 sps:$4 sm:$0xff]  }
 0x3ea   :  { %7887 = vrcp.f32 %v1249_v25  ;;  %v8859_v25 = vld [vmem:[#allocation9 + $0xc] ss:$16 sps:$4 sm:$0xff]  }
 0x3eb   :  { %7889 = vrcp.f32 %v1256_v29  ;;  %v8881_v29 = vld [vmem:[#allocation9 + $0x44] ss:$16 sps:$4 sm:$0xff]  }
 0x3f3   :  { %v7886_v28 = vpop.eup %7885 }
 0x3f4   :  { %v7888_v33 = vpop.eup %7887  ;;  %v1263_v56 = vmul.f32 %v7886_v28, %v7884_v41  ;;  %v8863_v41 = vld [vmem:[#allocation9 + $0x8] ss:$16 sps:$4 sm:$0xff]   ;;  %v8869_v28 = vld [vmem:[#allocation9 + $0x24] ss:$16 sps:$4 sm:$0xff]  }
 0x3f5   :  { %v1262_v1 = vmul.f32 %v7888_v33, %v1260_v43  ;;  %v7890_v39 = vpop.eup %7889  ;;  %v8871_v43 = vld [vmem:[#allocation9 + $0x2c] ss:$16 sps:$4 sm:$0xff]   ;;  %v8873_v33 = vld [vmem:[#allocation9 + $0x20] ss:$16 sps:$4 sm:$0xff]  }
 0x3f7   :  { %v8812_v44 = vadd.f32 %v1263_v56, %v1262_v1  ;;  %v8875_v56 = vld [vmem:[#allocation9 + $0x28] ss:$16 sps:$4 sm:$0xff]   ;;  %v8883_v1 = vld [vmem:[#allocation9 + $0x4c] ss:$16 sps:$4 sm:$0xff]  }
 0x3f9   :  { %7891 = vtanh.f32 %v8812_v44 }
 0x403   :  { %v7892_v49 = vpop.eup %7891 }
 0x404   :  { %v1266_v50 = vmul.f32 %v7892_v49, %v7890_v39  ;;  %v8887_v39 = vld [vmem:[#allocation9 + $0x48] ss:$16 sps:$4 sm:$0xff]   ;;  %v8893_v49 = vld [vmem:[#allocation9 + $0x64] ss:$16 sps:$4 sm:$0xff]  }
 0x406   :  { %1267 = vst [vmem:[#allocation2] sm:$0xc] %v1266_v50  ;;  %1268 = vst [vmem:[#allocation3 + $0xa] sm:$0xc] %v1266_v50  ;;  %v1269_v57 = vpack.c.bf16 %v1266_v50, %v1266_v50  ;;  %v8895_v50 = vld [vmem:[#allocation9 + $0x6c] ss:$16 sps:$4 sm:$0xff]  }
 0x408   :  { %v1303_v42 = vrot.slane %v1269_v57, 1  ;;  %v8897_v57 = vld [vmem:[#allocation9 + $0x60] ss:$16 sps:$4 sm:$0xff]  }
 0x40a   :  { %1498 = vmatmul.mubr.bf16.vlgmr.msra.gmra.mrb[12].mxu1 %v1303_v42  ;;  %1539 = vmatmul.mubr.bf16.vlgmr.msra.gmra.mrb[16].mxu0 %v1303_v42  ;;  %v8899_v42 = vld [vmem:[#allocation9 + $0x68] ss:$16 sps:$4 sm:$0xff]  }
 0x40b   :  { %1789 = vmatpush1.bf16.msra.mxu1 %v8535_v54  ;;  %1830 = vmatpush1.bf16.msra.mxu0 %v8537_v55 }
 0x40c   :  { %1790 = vmatprep.subr.bf16.mxu1 %v8539_v58  ;;  %1831 = vmatprep.subr.bf16.mxu0 %v8541_v59 }
 0x40d   :  { %1820 = vmatprep.mubr.bf16.mxu1 %v9746_v46  ;;  %1861 = vmatprep.mubr.bf16.mxu0 %v9746_v46 }
 0x40f   :  { %1791 = vmatpush1.bf16.msra.mxu1 %v8545_v60  ;;  %1832 = vmatpush1.bf16.msra.mxu0 %v8547_v61 }
 0x410   :  { %1792 = vmatprep.subr.bf16.mxu1 %v8551_v62  ;;  %1833 = vmatprep.subr.bf16.mxu0 %v8553_v63 }
 0x413   :  { %1793 = vmatpush1.bf16.msra.mxu1 %v8559_v2  ;;  %1834 = vmatpush1.bf16.msra.mxu0 %v8561_v3 }
 0x414   :  { %1794 = vmatprep.subr.bf16.mxu1 %v8565_v4  ;;  %1835 = vmatprep.subr.bf16.mxu0 %v8567_v5 }
 0x417   :  { %1795 = vmatpush1.bf16.msra.mxu1 %v8571_v6  ;;  %1836 = vmatpush1.bf16.msra.mxu0 %v8573_v7 }
 0x418   :  { %1796 = vmatprep.subr.bf16.mxu1 %v8577_v8  ;;  %1837 = vmatprep.subr.bf16.mxu0 %v8579_v9 }
 0x41b   :  { %1797 = vmatpush1.bf16.msra.mxu1 %v8583_v10  ;;  %1838 = vmatpush1.bf16.msra.mxu0 %v8585_v11 }
 0x41c   :  { %1798 = vmatprep.subr.bf16.mxu1 %v8589_v12  ;;  %1839 = vmatprep.subr.bf16.mxu0 %v8591_v13 }
 0x41f   :  { %1799 = vmatpush1.bf16.msra.mxu1 %v8595_v14  ;;  %1840 = vmatpush1.bf16.msra.mxu0 %v8597_v15 }
 0x420   :  { %1800 = vmatprep.subr.bf16.mxu1 %v8601_v16  ;;  %1841 = vmatprep.subr.bf16.mxu0 %v8603_v17 }
 0x423   :  { %1801 = vmatpush1.bf16.msra.mxu1 %v8607_v18  ;;  %1842 = vmatpush1.bf16.msra.mxu0 %v8609_v19 }
 0x424   :  { %1802 = vmatprep.subr.bf16.mxu1 %v8613_v20  ;;  %1843 = vmatprep.subr.bf16.mxu0 %v8615_v21  ;;  %v1583_v20 = vrot.slane %v8812_v44, 6  ;;  %v8885_v44 = vld [vmem:[#allocation9 + $0x40] ss:$16 sps:$4 sm:$0xff]  }
 0x427   :  { %1803 = vmatpush1.bf16.msra.mxu1 %v8619_v22  ;;  %1844 = vmatpush1.bf16.msra.mxu0 %v8621_v23 }
 0x428   :  { %2127 = vmatprep.subr.bf16.mxu1 %v8857_v51  ;;  %2168 = vmatprep.subr.bf16.mxu0 %v8859_v25 }
 0x4dd   :  { %v1499_v54 = vpop.f32.mrb[12].mxu1  ;;  %v1540_v55 = vpop.f32.mrb[16].mxu0 }
 0x4de   :  { %v1551_v58 = vrot.slane %v1499_v54, 4  ;;  %v1501_v59 = vpop.f32.mrb[13].mxu1  ;;  %v1542_v60 = vpop.f32.mrb[17].mxu0  ;;  %v1553_v10 = vrot.slane %v1540_v55, 4  ;;  %v8905_v54 = vld [vmem:[#allocation9 + $0x80] ss:$16 sps:$4 sm:$0xff]  }
 0x4df   :  { %v1552_v61 = vrot.slane %v1501_v59, 4  ;;  %v1503_v62 = vpop.f32.mrb[14].mxu1  ;;  %v1544_v63 = vpop.f32.mrb[18].mxu0  ;;  %v1554_v8 = vrot.slane %v1542_v60, 4  ;;  %v8907_v55 = vld [vmem:[#allocation9 + $0x84] ss:$16 sps:$4 sm:$0xff]  }
 0x4e0   :  { %v1559_v2 = vadd.f32 %v1551_v58, %v8704_v34  ;;  %v1504_v3 = vpop.f32.mrb[15].mxu1  ;;  %v1545_v4 = vpop.f32.mrb[19].mxu0  ;;  %v1561_v12 = vadd.f32 %v1553_v10, %v8708_v35  ;;  %v8909_v58 = vld [vmem:[#allocation9 + $0x88] ss:$16 sps:$4 sm:$0xff]   ;;  %v8911_v59 = vld [vmem:[#allocation9 + $0x8c] ss:$16 sps:$4 sm:$0xff]  }
 0x4e1   :  { %v1560_v5 = vadd.f32 %v1552_v61, %v8720_v52  ;;  %v1562_v9 = vadd.f32 %v1554_v8, %v8724_v32  ;;  %v8913_v60 = vld [vmem:[#allocation9 + $0xa4] ss:$16 sps:$4 sm:$0xff]   ;;  %v8916_v61 = vld [vmem:[#allocation9 + $0xac] ss:$16 sps:$4 sm:$0xff]   ;;  %v8920_v62 = vld [vmem:[#allocation9 + $0xa0] ss:$16 sps:$4 sm:$0xff]  }
 0x4e2   :  { %v6869_v6 = vmul.f32 -1.442695, %v1559_v2  ;;  %v8924_v63 = vld [vmem:[#allocation9 + $0xa8] ss:$16 sps:$4 sm:$0xff]   ;;  %v8926_v2 = vld [vmem:[#allocation9 + $0xc4] ss:$16 sps:$4 sm:$0xff]  }
 0x4e3   :  { %v6870_v7 = vmul.f32 -1.442695, %v1560_v5  ;;  %v6871_v11 = vmul.f32 -1.442695, %v1562_v9  ;;  %v8929_v3 = vld [vmem:[#allocation9 + $0xcc] ss:$16 sps:$4 sm:$0xff]  }
 0x4e4   :  { %7893 = vpow2.f32 %v6869_v6  ;;  %v8932_v4 = vld [vmem:[#allocation9 + $0xc0] ss:$16 sps:$4 sm:$0xff]   ;;  %v8936_v5 = vld [vmem:[#allocation9 + $0xc8] ss:$16 sps:$4 sm:$0xff]   ;;  %v8938_v6 = vld [vmem:[#allocation9 + $0xe4] ss:$16 sps:$4 sm:$0xff]  }
 0x4e5   :  { %7895 = vpow2.f32 %v6870_v7  ;;  %v8941_v7 = vld [vmem:[#allocation9 + $0xec] ss:$16 sps:$4 sm:$0xff]   ;;  %v8944_v8 = vld [vmem:[#allocation9 + $0xe0] ss:$16 sps:$4 sm:$0xff]   ;;  %v8948_v9 = vld [vmem:[#allocation9 + $0xe8] ss:$16 sps:$4 sm:$0xff]  }
 0x4e6   :  { %7897 = vpow2.f32 %v6871_v11 }
 0x4e7   :  { %7899 = vtanh.f32 %v1561_v12 }
 0x4ee   :  { %v7894_v13 = vpop.eup %7893 }
 0x4ef   :  { %v7896_v14 = vpop.eup %7895  ;;  %v1566_v15 = vadd.f32 1.0, %v7894_v13 }
 0x4f0   :  { %v1572_v16 = vadd.f32 1.0, %v7896_v14  ;;  %v7898_v17 = vpop.eup %7897 }
 0x4f1   :  { %7901 = vrcp.f32 %v1566_v15  ;;  %v7900_v18 = vpop.eup %7899  ;;  %v1579_v23 = vadd.f32 1.0, %v7898_v17 }
 0x4f2   :  { %7903 = vrcp.f32 %v1572_v16 }
 0x4f3   :  { %7905 = vrcp.f32 %v1579_v23 }
 0x4fb   :  { %v7902_v19 = vpop.eup %7901 }
 0x4fc   :  { %v7904_v21 = vpop.eup %7903  ;;  %v1586_v22 = vmul.f32 %v7902_v19, %v7900_v18 }
 0x4fd   :  { %v1585_v34 = vmul.f32 %v7904_v21, %v1583_v20  ;;  %v7906_v35 = vpop.eup %7905 }
 0x4ff   :  { %v8852_v52 = vadd.f32 %v1586_v22, %v1585_v34 }
 0x501   :  { %7907 = vtanh.f32 %v8852_v52 }
 0x50b   :  { %v7908_v32 = vpop.eup %7907 }
 0x50c   :  { %v1589_v30 = vmul.f32 %v7908_v32, %v7906_v35 }
 0x50e   :  { %1590 = vst [vmem:[#allocation2] sm:$0x30] %v1589_v30  ;;  %1591 = vst [vmem:[#allocation3 + $0x6] sm:$0x30] %v1589_v30  ;;  %v1592_v40 = vpack.c.bf16 %v1589_v30, %v1589_v30 }
 0x510   :  { %v1626_v48 = vrot.slane %v1592_v40, 2 }
 0x512   :  { %1821 = vmatmul.mubr.bf16.vlgmr.msra.gmra.mrb[16].mxu1 %v1626_v48  ;;  %1862 = vmatmul.mubr.bf16.vlgmr.msra.gmra.mrb[20].mxu0 %v1626_v48 }
 0x513   :  { %2159 = vmatprep.mubr.bf16.mxu1 %v9746_v46  ;;  %2200 = vmatprep.mubr.bf16.mxu0 %v9746_v46 }
 0x514   :  { %2128 = vmatpush1.bf16.msra.mxu1 %v8861_v47  ;;  %2169 = vmatpush1.bf16.msra.mxu0 %v8863_v41 }
 0x515   :  { %2129 = vmatprep.subr.bf16.mxu1 %v8869_v28  ;;  %2170 = vmatprep.subr.bf16.mxu0 %v8871_v43 }
 0x518   :  { %2130 = vmatpush1.bf16.msra.mxu1 %v8873_v33  ;;  %2171 = vmatpush1.bf16.msra.mxu0 %v8875_v56 }
 0x519   :  { %2131 = vmatprep.subr.bf16.mxu1 %v8881_v29  ;;  %2172 = vmatprep.subr.bf16.mxu0 %v8883_v1 }
 0x51c   :  { %2132 = vmatpush1.bf16.msra.mxu1 %v8885_v44  ;;  %2173 = vmatpush1.bf16.msra.mxu0 %v8887_v39 }
 0x51d   :  { %2133 = vmatprep.subr.bf16.mxu1 %v8893_v49  ;;  %2174 = vmatprep.subr.bf16.mxu0 %v8895_v50 }
 0x520   :  { %2134 = vmatpush1.bf16.msra.mxu1 %v8897_v57  ;;  %2175 = vmatpush1.bf16.msra.mxu0 %v8899_v42 }
 0x521   :  { %2135 = vmatprep.subr.bf16.mxu1 %v8907_v55  ;;  %2176 = vmatprep.subr.bf16.mxu0 %v8911_v59 }
 0x524   :  { %2136 = vmatpush1.bf16.msra.mxu1 %v8905_v54  ;;  %2177 = vmatpush1.bf16.msra.mxu0 %v8909_v58 }
 0x525   :  { %2137 = vmatprep.subr.bf16.mxu1 %v8913_v60  ;;  %2178 = vmatprep.subr.bf16.mxu0 %v8916_v61 }
 0x528   :  { %2138 = vmatpush1.bf16.msra.mxu1 %v8920_v62  ;;  %2179 = vmatpush1.bf16.msra.mxu0 %v8924_v63 }
 0x529   :  { %2139 = vmatprep.subr.bf16.mxu1 %v8926_v2  ;;  %2180 = vmatprep.subr.bf16.mxu0 %v8929_v3 }
 0x52c   :  { %2140 = vmatpush1.bf16.msra.mxu1 %v8932_v4  ;;  %2181 = vmatpush1.bf16.msra.mxu0 %v8936_v5 }
 0x52d   :  { %2141 = vmatprep.subr.bf16.mxu1 %v8938_v6  ;;  %2182 = vmatprep.subr.bf16.mxu0 %v8941_v7 }
 0x530   :  { %2142 = vmatpush1.bf16.msra.mxu1 %v8944_v8  ;;  %2183 = vmatpush1.bf16.msra.mxu0 %v8948_v9 }
 0x531   :  { %2447 = vmatprep.subr.bf16.mxu1 %v8857_v51  ;;  %2488 = vmatprep.subr.bf16.mxu0 %v8859_v25 }
 0x5e5   :  { %v1822_v10 = vpop.f32.mrb[16].mxu1  ;;  %v1863_v11 = vpop.f32.mrb[20].mxu0 }
 0x5e6   :  { %v1874_v12 = vrot.slane %v1822_v10, 2  ;;  %v1824_v13 = vpop.f32.mrb[17].mxu1  ;;  %v1865_v14 = vpop.f32.mrb[21].mxu0  ;;  %v1876_v32 = vrot.slane %v1863_v11, 2 }
 0x5e7   :  { %v1875_v15 = vrot.slane %v1824_v13, 2  ;;  %v1826_v16 = vpop.f32.mrb[18].mxu1  ;;  %v1867_v17 = vpop.f32.mrb[22].mxu0  ;;  %v1877_v34 = vrot.slane %v1865_v14, 2  ;;  %v1906_v14 = vrot.slane %v8852_v52, 6 }
 0x5e8   :  { %v1882_v18 = vadd.f32 %v1874_v12, %v8712_v37  ;;  %v1827_v19 = vpop.f32.mrb[19].mxu1  ;;  %v1868_v20 = vpop.f32.mrb[23].mxu0  ;;  %v1884_v40 = vadd.f32 %v1876_v32, %v8716_v38 }
 0x5e9   :  { %v1883_v21 = vadd.f32 %v1875_v15, %v8728_v0  ;;  %v1885_v35 = vadd.f32 %v1877_v34, %v8732_v53 }
 0x5ea   :  { %v6904_v22 = vmul.f32 -1.442695, %v1882_v18 }
 0x5eb   :  { %v6905_v23 = vmul.f32 -1.442695, %v1883_v21  ;;  %v6906_v30 = vmul.f32 -1.442695, %v1885_v35 }
 0x5ec   :  { %7909 = vpow2.f32 %v6904_v22 }
 0x5ed   :  { %7911 = vpow2.f32 %v6905_v23 }
 0x5ee   :  { %7913 = vpow2.f32 %v6906_v30 }
 0x5ef   :  { %7915 = vtanh.f32 %v1884_v40 }
 0x5f6   :  { %v7910_v48 = vpop.eup %7909 }
 0x5f7   :  { %v7912_v10 = vpop.eup %7911  ;;  %v1889_v13 = vadd.f32 1.0, %v7910_v48 }
 0x5f8   :  { %v1895_v37 = vadd.f32 1.0, %v7912_v10  ;;  %v7914_v0 = vpop.eup %7913 }
 0x5f9   :  { %7917 = vrcp.f32 %v1889_v13  ;;  %v7916_v12 = vpop.eup %7915  ;;  %v1902_v53 = vadd.f32 1.0, %v7914_v0 }
 0x5fa   :  { %7919 = vrcp.f32 %v1895_v37 }
 0x5fb   :  { %7921 = vrcp.f32 %v1902_v53 }
 0x603   :  { %v7918_v15 = vpop.eup %7917 }
 0x604   :  { %v7920_v16 = vpop.eup %7919  ;;  %v1909_v17 = vmul.f32 %v7918_v15, %v7916_v12 }
 0x605   :  { %v1908_v11 = vmul.f32 %v7920_v16, %v1906_v14  ;;  %v7922_v38 = vpop.eup %7921 }
 0x607   :  { %v8960_v18 = vadd.f32 %v1909_v17, %v1908_v11 }
 0x609   :  { %7923 = vtanh.f32 %v8960_v18 }
 0x613   :  { %v7924_v19 = vpop.eup %7923 }
 0x614   :  { %v1912_v20 = vmul.f32 %v7924_v19, %v7922_v38 }
 0x616   :  { %1913 = vst [vmem:[#allocation2] sm:$0xc0] %v1912_v20  ;;  %1914 = vst [vmem:[#allocation3 + $0x2] sm:$0xc0] %v1912_v20  ;;  %v1931_v21 = vpack.c.bf16 %v1912_v20, %v1912_v20 }
 0x618   :  { %v1965_v22 = vrot.slane %v1931_v21, 3  ;;  %v2233_v21 = vrot.slane %v8960_v18, 6 }
 0x61a   :  { %2160 = vmatmul.mubr.bf16.vlgmr.msra.gmra.mrb[20].mxu1 %v1965_v22  ;;  %2201 = vmatmul.mubr.bf16.vlgmr.msra.gmra.mrb[24].mxu0 %v1965_v22 }
 0x61b   :  { %2448 = vmatpush1.bf16.msra.mxu1 %v8861_v47  ;;  %2489 = vmatpush1.bf16.msra.mxu0 %v8863_v41 }
 0x61c   :  { %2449 = vmatprep.subr.bf16.mxu1 %v8869_v28  ;;  %2490 = vmatprep.subr.bf16.mxu0 %v8871_v43 }
 0x61d   :  { %2479 = vmatprep.mubr.bf16.mxu1 %v9746_v46  ;;  %2520 = vmatprep.mubr.bf16.mxu0 %v9746_v46 }
 0x61f   :  { %2450 = vmatpush1.bf16.msra.mxu1 %v8873_v33  ;;  %2491 = vmatpush1.bf16.msra.mxu0 %v8875_v56 }
 0x620   :  { %2451 = vmatprep.subr.bf16.mxu1 %v8881_v29  ;;  %2492 = vmatprep.subr.bf16.mxu0 %v8883_v1 }
 0x623   :  { %2452 = vmatpush1.bf16.msra.mxu1 %v8885_v44  ;;  %2493 = vmatpush1.bf16.msra.mxu0 %v8887_v39 }
 0x624   :  { %2453 = vmatprep.subr.bf16.mxu1 %v8893_v49  ;;  %2494 = vmatprep.subr.bf16.mxu0 %v8895_v50 }
 0x627   :  { %2454 = vmatpush1.bf16.msra.mxu1 %v8897_v57  ;;  %2495 = vmatpush1.bf16.msra.mxu0 %v8899_v42 }
 0x628   :  { %2455 = vmatprep.subr.bf16.mxu1 %v8907_v55  ;;  %2496 = vmatprep.subr.bf16.mxu0 %v8911_v59 }
 0x62b   :  { %2456 = vmatpush1.bf16.msra.mxu1 %v8905_v54  ;;  %2497 = vmatpush1.bf16.msra.mxu0 %v8909_v58 }
 0x62c   :  { %2457 = vmatprep.subr.bf16.mxu1 %v8913_v60  ;;  %2498 = vmatprep.subr.bf16.mxu0 %v8916_v61 }
 0x62f   :  { %2458 = vmatpush1.bf16.msra.mxu1 %v8920_v62  ;;  %2499 = vmatpush1.bf16.msra.mxu0 %v8924_v63 }
 0x630   :  { %2459 = vmatprep.subr.bf16.mxu1 %v8926_v2  ;;  %2500 = vmatprep.subr.bf16.mxu0 %v8929_v3 }
 0x633   :  { %2460 = vmatpush1.bf16.msra.mxu1 %v8932_v4  ;;  %2501 = vmatpush1.bf16.msra.mxu0 %v8936_v5 }
 0x634   :  { %2461 = vmatprep.subr.bf16.mxu1 %v8938_v6  ;;  %2502 = vmatprep.subr.bf16.mxu0 %v8941_v7 }
 0x637   :  { %2462 = vmatpush1.bf16.msra.mxu1 %v8944_v8  ;;  %2503 = vmatpush1.bf16.msra.mxu0 %v8948_v9 }
 0x638   :  { %2770 = vmatprep.subr.bf16.mxu1 %v8857_v51  ;;  %2811 = vmatprep.subr.bf16.mxu0 %v8859_v25 }
 0x6ed   :  { %v2161_v52 = vpop.f32.mrb[20].mxu1  ;;  %v2202_v23 = vpop.f32.mrb[24].mxu0 }
 0x6ee   :  { %v2209_v34 = vadd.f32 %v2161_v52, %v8736_v24  ;;  %v2163_v35 = vpop.f32.mrb[21].mxu1  ;;  %v2204_v32 = vpop.f32.mrb[25].mxu0  ;;  %v2211_v14 = vadd.f32 %v2202_v23, %v8740_v31 }
 0x6ef   :  { %v2210_v30 = vadd.f32 %v2163_v35, %v8744_v26  ;;  %v2165_v40 = vpop.f32.mrb[22].mxu1  ;;  %v2206_v48 = vpop.f32.mrb[26].mxu0  ;;  %v2212_v12 = vadd.f32 %v2204_v32, %v8748_v27 }
 0x6f0   :  { %v6939_v10 = vmul.f32 -1.442695, %v2209_v34  ;;  %v2166_v13 = vpop.f32.mrb[23].mxu1  ;;  %v2207_v37 = vpop.f32.mrb[27].mxu0 }
 0x6f1   :  { %v6940_v0 = vmul.f32 -1.442695, %v2210_v30  ;;  %v6941_v15 = vmul.f32 -1.442695, %v2212_v12 }
 0x6f2   :  { %7925 = vpow2.f32 %v6939_v10 }
 0x6f3   :  { %7927 = vpow2.f32 %v6940_v0 }
 0x6f4   :  { %7929 = vpow2.f32 %v6941_v15 }
 0x6f5   :  { %7931 = vtanh.f32 %v2211_v14 }
 0x6fc   :  { %v7926_v16 = vpop.eup %7925 }
 0x6fd   :  { %v7928_v17 = vpop.eup %7927  ;;  %v2216_v53 = vadd.f32 1.0, %v7926_v16 }
 0x6fe   :  { %v2222_v11 = vadd.f32 1.0, %v7928_v17  ;;  %v7930_v38 = vpop.eup %7929 }
 0x6ff   :  { %7933 = vrcp.f32 %v2216_v53  ;;  %v7932_v19 = vpop.eup %7931  ;;  %v2229_v34 = vadd.f32 1.0, %v7930_v38 }
 0x700   :  { %7935 = vrcp.f32 %v2222_v11 }
 0x701   :  { %7937 = vrcp.f32 %v2229_v34 }
 0x709   :  { %v7934_v20 = vpop.eup %7933 }
 0x70a   :  { %v7936_v22 = vpop.eup %7935  ;;  %v2236_v52 = vmul.f32 %v7934_v20, %v7932_v19 }
 0x70b   :  { %v2235_v35 = vmul.f32 %v7936_v22, %v2233_v21  ;;  %v7938_v23 = vpop.eup %7937 }
 0x70d   :  { %v9002_v32 = vadd.f32 %v2236_v52, %v2235_v35  ;;  %v9748_v52 = vld [vmem:[#allocation30_spill] sm:$0xff] }
 0x70f   :  { %7939 = vtanh.f32 %v9002_v32 }
 0x719   :  { %v7940_v30 = vpop.eup %7939 }
 0x71a   :  { %v2239_v40 = vmul.f32 %v7940_v30, %v7938_v23 }
 0x71c   :  { %2240 = vst [vmem:[#allocation2 + $0x8] sm:$0x3] %v2239_v40  ;;  %2241 = vst [vmem:[#allocation3 + $0x6] sm:$0x3] %v2239_v40  ;;  %v2254_v48 = vpack.c.bf16 %v2239_v40, %v2239_v40 }
 0x71e   :  { %2480 = vmatmul.mubr.bf16.vlgmr.msra.gmra.mrb[24].mxu1 %v2254_v48  ;;  %2521 = vmatmul.mubr.bf16.vlgmr.msra.gmra.mrb[28].mxu0 %v2254_v48 }
 0x71f   :  { %2771 = vmatpush1.bf16.msra.mxu1 %v8861_v47  ;;  %2812 = vmatpush1.bf16.msra.mxu0 %v8863_v41 }
 0x720   :  { %2772 = vmatprep.subr.bf16.mxu1 %v8869_v28  ;;  %2813 = vmatprep.subr.bf16.mxu0 %v8871_v43 }
 0x721   :  { %2802 = vmatprep.mubr.bf16.mxu1 %v9746_v46  ;;  %2843 = vmatprep.mubr.bf16.mxu0 %v9746_v46 }
 0x723   :  { %2773 = vmatpush1.bf16.msra.mxu1 %v8873_v33  ;;  %2814 = vmatpush1.bf16.msra.mxu0 %v8875_v56 }
 0x724   :  { %2774 = vmatprep.subr.bf16.mxu1 %v8881_v29  ;;  %2815 = vmatprep.subr.bf16.mxu0 %v8883_v1 }
 0x727   :  { %2775 = vmatpush1.bf16.msra.mxu1 %v8885_v44  ;;  %2816 = vmatpush1.bf16.msra.mxu0 %v8887_v39 }
 0x728   :  { %2776 = vmatprep.subr.bf16.mxu1 %v8893_v49  ;;  %2817 = vmatprep.subr.bf16.mxu0 %v8895_v50 }
 0x72b   :  { %2777 = vmatpush1.bf16.msra.mxu1 %v8897_v57  ;;  %2818 = vmatpush1.bf16.msra.mxu0 %v8899_v42 }
 0x72c   :  { %2778 = vmatprep.subr.bf16.mxu1 %v8907_v55  ;;  %2819 = vmatprep.subr.bf16.mxu0 %v8911_v59 }
 0x72f   :  { %2779 = vmatpush1.bf16.msra.mxu1 %v8905_v54  ;;  %2820 = vmatpush1.bf16.msra.mxu0 %v8909_v58 }
 0x730   :  { %2780 = vmatprep.subr.bf16.mxu1 %v8913_v60  ;;  %2821 = vmatprep.subr.bf16.mxu0 %v8916_v61 }
 0x733   :  { %2781 = vmatpush1.bf16.msra.mxu1 %v8920_v62  ;;  %2822 = vmatpush1.bf16.msra.mxu0 %v8924_v63 }
 0x734   :  { %2782 = vmatprep.subr.bf16.mxu1 %v8926_v2  ;;  %2823 = vmatprep.subr.bf16.mxu0 %v8929_v3 }
 0x737   :  { %2783 = vmatpush1.bf16.msra.mxu1 %v8932_v4  ;;  %2824 = vmatpush1.bf16.msra.mxu0 %v8936_v5 }
 0x738   :  { %2784 = vmatprep.subr.bf16.mxu1 %v8938_v6  ;;  %2825 = vmatprep.subr.bf16.mxu0 %v8941_v7 }
 0x73b   :  { %2785 = vmatpush1.bf16.msra.mxu1 %v8944_v8  ;;  %2826 = vmatpush1.bf16.msra.mxu0 %v8948_v9 }
 0x73c   :  { %3093 = vmatprep.subr.bf16.mxu1 %v8857_v51  ;;  %3134 = vmatprep.subr.bf16.mxu0 %v8859_v25  ;;  %v9747_v51 = vld [vmem:[#allocation31_spill] sm:$0xff] }
 0x7f1   :  { %v2481_v18 = vpop.f32.mrb[24].mxu1  ;;  %v2522_v10 = vpop.f32.mrb[28].mxu0 }
 0x7f2   :  { %v2533_v13 = vrot.slane %v2481_v18, 6  ;;  %v2483_v37 = vpop.f32.mrb[25].mxu1  ;;  %v2524_v0 = vpop.f32.mrb[29].mxu0  ;;  %v2535_v21 = vrot.slane %v2522_v10, 6 }
 0x7f3   :  { %v2534_v12 = vrot.slane %v2483_v37, 6  ;;  %v2485_v15 = vpop.f32.mrb[26].mxu1  ;;  %v2526_v14 = vpop.f32.mrb[30].mxu0  ;;  %v2536_v20 = vrot.slane %v2524_v0, 6  ;;  %v2565_v37 = vrot.slane %v9002_v32, 6 }
 0x7f4   :  { %v2541_v16 = vadd.f32 %v2533_v13, %v8752_v36  ;;  %v2486_v17 = vpop.f32.mrb[27].mxu1  ;;  %v2527_v53 = vpop.f32.mrb[31].mxu0  ;;  %v2543_v34 = vadd.f32 %v2535_v21, %v9748_v52  ;;  %v7682_v21 = vld [vmem:[#allocation10 + $0xc] ss:$16 sps:$4 sm:$0xff]  }
 0x7f5   :  { %v2542_v11 = vadd.f32 %v2534_v12, %v8760_v45  ;;  %v2544_v25 = vadd.f32 %v2536_v20, %v9747_v51 }
 0x7f6   :  { %v6974_v38 = vmul.f32 -1.442695, %v2541_v16 }
 0x7f7   :  { %v6975_v19 = vmul.f32 -1.442695, %v2542_v11  ;;  %v6976_v22 = vmul.f32 -1.442695, %v2544_v25  ;;  %v7679_v25 = vld [vmem:[#allocation10 + $0x4] ss:$16 sps:$4 sm:$0xff]  }
 0x7f8   :  { %7941 = vpow2.f32 %v6974_v38 }
 0x7f9   :  { %7943 = vpow2.f32 %v6975_v19 }
 0x7fa   :  { %7945 = vpow2.f32 %v6976_v22  ;;  %v7677_v22 = vld [vmem:[#allocation10] ss:$16 sps:$4 sm:$0xff]  }
 0x7fb   :  { %7947 = vtanh.f32 %v2543_v34  ;;  %v7680_v34 = vld [vmem:[#allocation10 + $0x8] ss:$16 sps:$4 sm:$0xff]  }
 0x802   :  { %v7942_v35 = vpop.eup %7941 }
 0x803   :  { %v7944_v23 = vpop.eup %7943  ;;  %v2548_v30 = vadd.f32 1.0, %v7942_v35  ;;  %v7685_v35 = vld [vmem:[#allocation10 + $0x24] ss:$16 sps:$4 sm:$0xff]  }
 0x804   :  { %v2554_v40 = vadd.f32 1.0, %v7944_v23  ;;  %v7946_v48 = vpop.eup %7945  ;;  %v7688_v23 = vld [vmem:[#allocation10 + $0x2c] ss:$16 sps:$4 sm:$0xff]  }
 0x805   :  { %7949 = vrcp.f32 %v2548_v30  ;;  %v7948_v18 = vpop.eup %7947  ;;  %v2561_v15 = vadd.f32 1.0, %v7946_v48  ;;  %v7683_v30 = vld [vmem:[#allocation10 + $0x20] ss:$16 sps:$4 sm:$0xff]   ;;  %v7691_v48 = vld [vmem:[#allocation10 + $0x44] ss:$16 sps:$4 sm:$0xff]  }
 0x806   :  { %7951 = vrcp.f32 %v2554_v40  ;;  %v7686_v40 = vld [vmem:[#allocation10 + $0x28] ss:$16 sps:$4 sm:$0xff]  }
 0x807   :  { %7953 = vrcp.f32 %v2561_v15  ;;  %v7695_v15 = vld [vmem:[#allocation10 + $0x60] ss:$16 sps:$4 sm:$0xff]  }
 0x80f   :  { %v7950_v13 = vpop.eup %7949 }
 0x810   :  { %v7952_v0 = vpop.eup %7951  ;;  %v2568_v12 = vmul.f32 %v7950_v13, %v7948_v18  ;;  %v7694_v18 = vld [vmem:[#allocation10 + $0x4c] ss:$16 sps:$4 sm:$0xff]   ;;  %v7689_v13 = vld [vmem:[#allocation10 + $0x40] ss:$16 sps:$4 sm:$0xff]  }
 0x811   :  { %v2567_v10 = vmul.f32 %v7952_v0, %v2565_v37  ;;  %v7954_v16 = vpop.eup %7953  ;;  %v7692_v37 = vld [vmem:[#allocation10 + $0x48] ss:$16 sps:$4 sm:$0xff]   ;;  %v7697_v0 = vld [vmem:[#allocation10 + $0x64] ss:$16 sps:$4 sm:$0xff]  }
 0x813   :  { %v9044_v14 = vadd.f32 %v2568_v12, %v2567_v10  ;;  %v7700_v12 = vld [vmem:[#allocation10 + $0x6c] ss:$16 sps:$4 sm:$0xff]   ;;  %v7698_v10 = vld [vmem:[#allocation10 + $0x68] ss:$16 sps:$4 sm:$0xff]  }
 0x815   :  { %7955 = vtanh.f32 %v9044_v14 }
 0x81f   :  { %v7956_v17 = vpop.eup %7955 }
 0x820   :  { %v2571_v53 = vmul.f32 %v7956_v17, %v7954_v16  ;;  %v7706_v16 = vld [vmem:[#allocation10 + $0x8c] ss:$16 sps:$4 sm:$0xff]   ;;  %v7701_v17 = vld [vmem:[#allocation10 + $0x80] ss:$16 sps:$4 sm:$0xff]  }
 0x822   :  { %2572 = vst [vmem:[#allocation2 + $0x8] sm:$0xc] %v2571_v53  ;;  %2573 = vst [vmem:[#allocation3 + $0x2] sm:$0xc] %v2571_v53  ;;  %v2574_v11 = vpack.c.bf16 %v2571_v53, %v2571_v53  ;;  %v7704_v53 = vld [vmem:[#allocation10 + $0x88] ss:$16 sps:$4 sm:$0xff]  }
 0x824   :  { %v2608_v38 = vrot.slane %v2574_v11, 1  ;;  %v7709_v11 = vld [vmem:[#allocation10 + $0xa4] ss:$16 sps:$4 sm:$0xff]  }
 0x826   :  { %2803 = vmatmul.mubr.bf16.vlgmr.msra.gmra.mrb[28].mxu1 %v2608_v38  ;;  %2844 = vmatmul.mubr.bf16.vlgmr.msra.gmra.mrb[32].mxu0 %v2608_v38  ;;  %v7707_v38 = vld [vmem:[#allocation10 + $0xa0] ss:$16 sps:$4 sm:$0xff]  }
 0x827   :  { %3094 = vmatpush1.bf16.msra.mxu1 %v8861_v47  ;;  %3135 = vmatpush1.bf16.msra.mxu0 %v8863_v41 }
 0x828   :  { %3095 = vmatprep.subr.bf16.mxu1 %v8869_v28  ;;  %3136 = vmatprep.subr.bf16.mxu0 %v8871_v43 }
 0x829   :  { %3125 = vmatprep.mubr.bf16.mxu1 %v9746_v46  ;;  %3166 = vmatprep.mubr.bf16.mxu0 %v9746_v46 }
 0x82b   :  { %3096 = vmatpush1.bf16.msra.mxu1 %v8873_v33  ;;  %3137 = vmatpush1.bf16.msra.mxu0 %v8875_v56 }
 0x82c   :  { %3097 = vmatprep.subr.bf16.mxu1 %v8881_v29  ;;  %3138 = vmatprep.subr.bf16.mxu0 %v8883_v1 }
 0x82f   :  { %3098 = vmatpush1.bf16.msra.mxu1 %v8885_v44  ;;  %3139 = vmatpush1.bf16.msra.mxu0 %v8887_v39 }
 0x830   :  { %3099 = vmatprep.subr.bf16.mxu1 %v8893_v49  ;;  %3140 = vmatprep.subr.bf16.mxu0 %v8895_v50 }
 0x833   :  { %3100 = vmatpush1.bf16.msra.mxu1 %v8897_v57  ;;  %3141 = vmatpush1.bf16.msra.mxu0 %v8899_v42 }
 0x834   :  { %3101 = vmatprep.subr.bf16.mxu1 %v8907_v55  ;;  %3142 = vmatprep.subr.bf16.mxu0 %v8911_v59 }
 0x837   :  { %3102 = vmatpush1.bf16.msra.mxu1 %v8905_v54  ;;  %3143 = vmatpush1.bf16.msra.mxu0 %v8909_v58 }
 0x838   :  { %3103 = vmatprep.subr.bf16.mxu1 %v8913_v60  ;;  %3144 = vmatprep.subr.bf16.mxu0 %v8916_v61 }
 0x83b   :  { %3104 = vmatpush1.bf16.msra.mxu1 %v8920_v62  ;;  %3145 = vmatpush1.bf16.msra.mxu0 %v8924_v63 }
 0x83c   :  { %3105 = vmatprep.subr.bf16.mxu1 %v8926_v2  ;;  %3146 = vmatprep.subr.bf16.mxu0 %v8929_v3 }
 0x83f   :  { %3106 = vmatpush1.bf16.msra.mxu1 %v8932_v4  ;;  %3147 = vmatpush1.bf16.msra.mxu0 %v8936_v5  ;;  %v2888_v4 = vrot.slane %v9044_v14, 6  ;;  %v7703_v14 = vld [vmem:[#allocation10 + $0x84] ss:$16 sps:$4 sm:$0xff]  }
 0x840   :  { %3107 = vmatprep.subr.bf16.mxu1 %v8938_v6  ;;  %3148 = vmatprep.subr.bf16.mxu0 %v8941_v7 }
 0x843   :  { %3108 = vmatpush1.bf16.msra.mxu1 %v8944_v8  ;;  %3149 = vmatpush1.bf16.msra.mxu0 %v8948_v9 }
 0x844   :  { %3441 = vmatprep.subr.bf16.mxu1 %v7679_v25  ;;  %3484 = vmatprep.subr.bf16.mxu0 %v7682_v21 }
 0x8f9   :  { %v2804_v47 = vpop.f32.mrb[28].mxu1  ;;  %v2845_v41 = vpop.f32.mrb[32].mxu0 }
 0x8fa   :  { %v2856_v28 = vrot.slane %v2804_v47, 4  ;;  %v2806_v43 = vpop.f32.mrb[29].mxu1  ;;  %v2847_v33 = vpop.f32.mrb[33].mxu0  ;;  %v2858_v58 = vrot.slane %v2845_v41, 4  ;;  %v7710_v47 = vld [vmem:[#allocation10 + $0xa8] ss:$16 sps:$4 sm:$0xff]  }
 0x8fb   :  { %v2857_v56 = vrot.slane %v2806_v43, 4  ;;  %v2808_v29 = vpop.f32.mrb[30].mxu1  ;;  %v2849_v1 = vpop.f32.mrb[34].mxu0  ;;  %v2859_v54 = vrot.slane %v2847_v33, 4  ;;  %v7712_v41 = vld [vmem:[#allocation10 + $0xac] ss:$16 sps:$4 sm:$0xff]  }
 0x8fc   :  { %v2864_v44 = vadd.f32 %v2856_v28, %v8736_v24  ;;  %v2809_v39 = vpop.f32.mrb[31].mxu1  ;;  %v2850_v49 = vpop.f32.mrb[35].mxu0  ;;  %v2866_v60 = vadd.f32 %v2858_v58, %v8740_v31  ;;  %v7715_v28 = vld [vmem:[#allocation10 + $0xc4] ss:$16 sps:$4 sm:$0xff]   ;;  %v7718_v43 = vld [vmem:[#allocation10 + $0xcc] ss:$16 sps:$4 sm:$0xff]  }
 0x8fd   :  { %v2865_v50 = vadd.f32 %v2857_v56, %v8744_v26  ;;  %v2867_v55 = vadd.f32 %v2859_v54, %v8748_v27  ;;  %v7713_v33 = vld [vmem:[#allocation10 + $0xc0] ss:$16 sps:$4 sm:$0xff]   ;;  %v7716_v56 = vld [vmem:[#allocation10 + $0xc8] ss:$16 sps:$4 sm:$0xff]   ;;  %v7721_v29 = vld [vmem:[#allocation10 + $0xe4] ss:$16 sps:$4 sm:$0xff]  }
 0x8fe   :  { %v7009_v57 = vmul.f32 -1.442695, %v2864_v44  ;;  %v7724_v1 = vld [vmem:[#allocation10 + $0xec] ss:$16 sps:$4 sm:$0xff]   ;;  %v7719_v44 = vld [vmem:[#allocation10 + $0xe0] ss:$16 sps:$4 sm:$0xff]  }
 0x8ff   :  { %v7010_v42 = vmul.f32 -1.442695, %v2865_v50  ;;  %v7011_v59 = vmul.f32 -1.442695, %v2867_v55  ;;  %v7722_v39 = vld [vmem:[#allocation10 + $0xe8] ss:$16 sps:$4 sm:$0xff]  }
 0x900   :  { %7957 = vpow2.f32 %v7009_v57  ;;  %v9089_v49 = vld [vmem:[#allocation12 + $0x4] ss:$16 sps:$4 sm:$0xff]   ;;  %v9091_v50 = vld [vmem:[#allocation12 + $0xc] ss:$16 sps:$4 sm:$0xff]  }
 0x901   :  { %7959 = vpow2.f32 %v7010_v42 }
 0x902   :  { %7961 = vpow2.f32 %v7011_v59 }
 0x903   :  { %7963 = vtanh.f32 %v2866_v60 }
 0x90a   :  { %v7958_v61 = vpop.eup %7957 }
 0x90b   :  { %v7960_v62 = vpop.eup %7959  ;;  %v2871_v63 = vadd.f32 1.0, %v7958_v61 }
 0x90c   :  { %v2877_v24 = vadd.f32 1.0, %v7960_v62  ;;  %v7962_v26 = vpop.eup %7961 }
 0x90d   :  { %7965 = vrcp.f32 %v2871_v63  ;;  %v7964_v2 = vpop.eup %7963  ;;  %v2884_v27 = vadd.f32 1.0, %v7962_v26 }
 0x90e   :  { %7967 = vrcp.f32 %v2877_v24 }
 0x90f   :  { %7969 = vrcp.f32 %v2884_v27 }
 0x917   :  { %v7966_v3 = vpop.eup %7965 }
 0x918   :  { %v7968_v5 = vpop.eup %7967  ;;  %v2891_v6 = vmul.f32 %v7966_v3, %v7964_v2 }
 0x919   :  { %v2890_v7 = vmul.f32 %v7968_v5, %v2888_v4  ;;  %v7970_v31 = vpop.eup %7969 }
 0x91b   :  { %v9084_v8 = vadd.f32 %v2891_v6, %v2890_v7 }
 0x91d   :  { %7971 = vtanh.f32 %v9084_v8  ;;  %v3211_v25 = vrot.slane %v9084_v8, 6 }
 0x927   :  { %v7972_v9 = vpop.eup %7971 }
 0x928   :  { %v2894_v32 = vmul.f32 %v7972_v9, %v7970_v31 }
 0x92a   :  { %2895 = vst [vmem:[#allocation2 + $0x8] sm:$0x30] %v2894_v32  ;;  %2896 = vst [vmem:[#allocation3 - $0x2] sm:$0x30] %v2894_v32  ;;  %v2897_v19 = vpack.c.bf16 %v2894_v32, %v2894_v32 }
 0x92c   :  { %v2931_v20 = vrot.slane %v2897_v19, 2 }
 0x92e   :  { %3126 = vmatmul.mubr.bf16.vlgmr.msra.gmra.mrb[32].mxu1 %v2931_v20  ;;  %3167 = vmatmul.mubr.bf16.vlgmr.msra.gmra.mrb[36].mxu0 %v2931_v20 }
 0x92f   :  { %3473 = vmatprep.mubr.bf16.mxu1 %v9746_v46  ;;  %3516 = vmatprep.mubr.bf16.mxu0 %v9746_v46 }
 0x930   :  { %3442 = vmatpush1.bf16.msra.mxu1 %v7677_v22  ;;  %3485 = vmatpush1.bf16.msra.mxu0 %v7680_v34 }
 0x931   :  { %3443 = vmatprep.subr.bf16.mxu1 %v7685_v35  ;;  %3486 = vmatprep.subr.bf16.mxu0 %v7688_v23 }
 0x934   :  { %3444 = vmatpush1.bf16.msra.mxu1 %v7683_v30  ;;  %3487 = vmatpush1.bf16.msra.mxu0 %v7686_v40  ;;  %v3220_v40 = vld [vmem:[#allocation2] sm:$0xff] }
 0x935   :  { %3445 = vmatprep.subr.bf16.mxu1 %v7691_v48  ;;  %3488 = vmatprep.subr.bf16.mxu0 %v7694_v18 }
 0x938   :  { %3446 = vmatpush1.bf16.msra.mxu1 %v7689_v13  ;;  %3489 = vmatpush1.bf16.msra.mxu0 %v7692_v37  ;;  %v3223_v13 = vld [vmem:[#allocation3 + $0x8] sm:$0xff]  ;;  %v9100_v37 = vld [vmem:[#allocation12] ss:$16 sps:$4 sm:$0xff]  }
 0x939   :  { %3447 = vmatprep.subr.bf16.mxu1 %v7697_v0  ;;  %3490 = vmatprep.subr.bf16.mxu0 %v7700_v12  ;;  %v9102_v0 = vld [vmem:[#allocation12 + $0x8] ss:$16 sps:$4 sm:$0xff]  }
 0x93c   :  { %3448 = vmatpush1.bf16.msra.mxu1 %v7695_v15  ;;  %3491 = vmatpush1.bf16.msra.mxu0 %v7698_v10 }
 0x93d   :  { %3449 = vmatprep.subr.bf16.mxu1 %v7703_v14  ;;  %3492 = vmatprep.subr.bf16.mxu0 %v7706_v16  ;;  %v9108_v14 = vld [vmem:[#allocation12 + $0x24] ss:$16 sps:$4 sm:$0xff]   ;;  %v9110_v16 = vld [vmem:[#allocation12 + $0x2c] ss:$16 sps:$4 sm:$0xff]  }
 0x940   :  { %3450 = vmatpush1.bf16.msra.mxu1 %v7701_v17  ;;  %3493 = vmatpush1.bf16.msra.mxu0 %v7704_v53  ;;  %v9114_v17 = vld [vmem:[#allocation12 + $0x20] ss:$16 sps:$4 sm:$0xff]   ;;  %v9116_v53 = vld [vmem:[#allocation12 + $0x28] ss:$16 sps:$4 sm:$0xff]  }
 0x941   :  { %3451 = vmatprep.subr.bf16.mxu1 %v7709_v11  ;;  %3494 = vmatprep.subr.bf16.mxu0 %v7712_v41  ;;  %v9120_v11 = vld [vmem:[#allocation12 + $0x44] ss:$16 sps:$4 sm:$0xff]   ;;  %v9130_v41 = vld [vmem:[#allocation12 + $0x48] ss:$16 sps:$4 sm:$0xff]  }
 0x944   :  { %3452 = vmatpush1.bf16.msra.mxu1 %v7707_v38  ;;  %3495 = vmatpush1.bf16.msra.mxu0 %v7710_v47  ;;  %v9122_v38 = vld [vmem:[#allocation12 + $0x4c] ss:$16 sps:$4 sm:$0xff]   ;;  %v9128_v47 = vld [vmem:[#allocation12 + $0x40] ss:$16 sps:$4 sm:$0xff]  }
 0x945   :  { %3453 = vmatprep.subr.bf16.mxu1 %v7715_v28  ;;  %3496 = vmatprep.subr.bf16.mxu0 %v7718_v43  ;;  %v9134_v28 = vld [vmem:[#allocation12 + $0x64] ss:$16 sps:$4 sm:$0xff]   ;;  %v9136_v43 = vld [vmem:[#allocation12 + $0x6c] ss:$16 sps:$4 sm:$0xff]  }
 0x948   :  { %3454 = vmatpush1.bf16.msra.mxu1 %v7713_v33  ;;  %3497 = vmatpush1.bf16.msra.mxu0 %v7716_v56  ;;  %v9140_v33 = vld [vmem:[#allocation12 + $0x60] ss:$16 sps:$4 sm:$0xff]   ;;  %v9142_v56 = vld [vmem:[#allocation12 + $0x68] ss:$16 sps:$4 sm:$0xff]  }
 0x949   :  { %3455 = vmatprep.subr.bf16.mxu1 %v7721_v29  ;;  %3498 = vmatprep.subr.bf16.mxu0 %v7724_v1  ;;  %v9146_v29 = vld [vmem:[#allocation12 + $0x84] ss:$16 sps:$4 sm:$0xff]   ;;  %v9148_v1 = vld [vmem:[#allocation12 + $0x8c] ss:$16 sps:$4 sm:$0xff]  }
 0x94c   :  { %3456 = vmatpush1.bf16.msra.mxu1 %v7719_v44  ;;  %3499 = vmatpush1.bf16.msra.mxu0 %v7722_v39  ;;  %v9152_v44 = vld [vmem:[#allocation12 + $0x80] ss:$16 sps:$4 sm:$0xff]   ;;  %v9154_v39 = vld [vmem:[#allocation12 + $0x88] ss:$16 sps:$4 sm:$0xff]  }
 0x94d   :  { %3735 = vmatprep.subr.bf16.mxu1 %v9089_v49  ;;  %3776 = vmatprep.subr.bf16.mxu0 %v9091_v50 }
 0xa01   :  { %v3127_v57 = vpop.f32.mrb[32].mxu1  ;;  %v3168_v42 = vpop.f32.mrb[36].mxu0 }
 0xa02   :  { %v3179_v54 = vrot.slane %v3127_v57, 2  ;;  %v3129_v55 = vpop.f32.mrb[33].mxu1  ;;  %v3170_v58 = vpop.f32.mrb[37].mxu0  ;;  %v3181_v6 = vrot.slane %v3168_v42, 2  ;;  %v9158_v57 = vld [vmem:[#allocation12 + $0xa4] ss:$16 sps:$4 sm:$0xff]  }
 0xa03   :  { %v3180_v59 = vrot.slane %v3129_v55, 2  ;;  %v3131_v60 = vpop.f32.mrb[34].mxu1  ;;  %v3172_v61 = vpop.f32.mrb[38].mxu0  ;;  %v3182_v4 = vrot.slane %v3170_v58, 2  ;;  %v9160_v42 = vld [vmem:[#allocation12 + $0xac] ss:$16 sps:$4 sm:$0xff]  }
 0xa04   :  { %v3187_v62 = vadd.f32 %v3179_v54, %v8752_v36  ;;  %v3132_v63 = vpop.f32.mrb[35].mxu1  ;;  %v3173_v24 = vpop.f32.mrb[39].mxu0  ;;  %v3189_v7 = vadd.f32 %v3181_v6, %v9748_v52  ;;  %v9164_v54 = vld [vmem:[#allocation12 + $0xa0] ss:$16 sps:$4 sm:$0xff]   ;;  %v9166_v55 = vld [vmem:[#allocation12 + $0xa8] ss:$16 sps:$4 sm:$0xff]  }
 0xa05   :  { %v3188_v26 = vadd.f32 %v3180_v59, %v8760_v45  ;;  %v3190_v5 = vadd.f32 %v3182_v4, %v9747_v51  ;;  %v9170_v58 = vld [vmem:[#allocation12 + $0xc4] ss:$16 sps:$4 sm:$0xff]   ;;  %v9172_v59 = vld [vmem:[#allocation12 + $0xcc] ss:$16 sps:$4 sm:$0xff]   ;;  %v9176_v60 = vld [vmem:[#allocation12 + $0xc0] ss:$16 sps:$4 sm:$0xff]  }
 0xa06   :  { %v7044_v2 = vmul.f32 -1.442695, %v3187_v62  ;;  %v9178_v61 = vld [vmem:[#allocation12 + $0xc8] ss:$16 sps:$4 sm:$0xff]   ;;  %v9182_v62 = vld [vmem:[#allocation12 + $0xe4] ss:$16 sps:$4 sm:$0xff]  }
 0xa07   :  { %v7045_v3 = vmul.f32 -1.442695, %v3188_v26  ;;  %v7046_v27 = vmul.f32 -1.442695, %v3190_v5  ;;  %v9184_v63 = vld [vmem:[#allocation12 + $0xec] ss:$16 sps:$4 sm:$0xff]  }
 0xa08   :  { %7973 = vpow2.f32 %v7044_v2  ;;  %v9188_v24 = vld [vmem:[#allocation12 + $0xe0] ss:$16 sps:$4 sm:$0xff]   ;;  %v9190_v26 = vld [vmem:[#allocation12 + $0xe8] ss:$16 sps:$4 sm:$0xff]  }
 0xa09   :  { %7975 = vpow2.f32 %v7045_v3  ;;  %v3259_v2 = vld [vmem:[%s9696_s6] sm:$0xf]  ;;  %v9750_v3 = vld [vmem:[#allocation24_spill] sm:$0xff]  ;;  %v9751_v5 = vld [vmem:[#allocation25_spill] sm:$0xff] }
 0xa0a   :  { %7977 = vpow2.f32 %v7046_v27  ;;  %v3264_v4 = vrot.slane %v3259_v2, %v9750_v3  ;;  %v3272_v6 = vrot.slane %v3259_v2, %v9751_v5  ;;  %v9752_v27 = vld [vmem:[#allocation26_spill] sm:$0xff] }
 0xa0b   :  { %7979 = vtanh.f32 %v3189_v7  ;;  %v3268_v7 = vrot.slane %v3259_v2, %v9752_v27 }
 0xa12   :  { %v7974_v31 = vpop.eup %7973 }
 0xa13   :  { %v7976_v9 = vpop.eup %7975  ;;  %v3194_v32 = vadd.f32 1.0, %v7974_v31  ;;  %v9753_v31 = vld [vmem:[#allocation23_spill] sm:$0xff] }
 0xa14   :  { %v3200_v36 = vadd.f32 1.0, %v7976_v9  ;;  %v7978_v45 = vpop.eup %7977  ;;  %v9754_v9 = vsub.s32 3, %v9753_v31 }
 0xa15   :  { %7981 = vrcp.f32 %v3194_v32  ;;  %v7980_v19 = vpop.eup %7979  ;;  %v3207_v51 = vadd.f32 1.0, %v7978_v45 }
 0xa16   :  { %7983 = vrcp.f32 %v3200_v36  ;;  %v3276_v32 = vrot.slane %v3259_v2, %v9754_v9 }
 0xa17   :  { %7985 = vrcp.f32 %v3207_v51 }
 0xa1f   :  { %v7982_v20 = vpop.eup %7981 }
 0xa20   :  { %v7984_v21 = vpop.eup %7983  ;;  %v3214_v22 = vmul.f32 %v7982_v20, %v7980_v19 }
 0xa21   :  { %v3213_v34 = vmul.f32 %v7984_v21, %v3211_v25  ;;  %v7986_v52 = vpop.eup %7985 }
 0xa23   :  { %v3215_v35 = vadd.f32 %v3214_v22, %v3213_v34 }
 0xa25   :  { %7987 = vtanh.f32 %v3215_v35 }
 0xa2f   :  { %v7988_v23 = vpop.eup %7987 }
 0xa30   :  { %v3217_v30 = vmul.f32 %v7988_v23, %v7986_v52 }
 0xa32   :  { %3218 = vst [vmem:[#allocation2 + $0x8] sm:$0xc0] %v3217_v30  ;;  %3219 = vst [vmem:[#allocation3 - $0x6] sm:$0xc0] %v3217_v30 }
 0xa39   :  { %v3221_v48 = vld [vmem:[#allocation2 + $0x8] sm:$0xff]  ;;  %v3222_v18 = vld [vmem:[#allocation3] sm:$0xff] }
 0xa3a   :  { %v3224_v12 = vsel %vm311_vm4, %v3220_v40, %v3222_v18  ;;  %v3225_v15 = vsel %vm311_vm4, %v3221_v48, %v3223_v13 }
 0xa3b   :  { %v3226_v10 = vpack.c.bf16 %v3225_v15, %v3224_v12 }
 0xa3d   :  { %3474 = vmatmul.mubr.bf16.vlgmr.msra.gmra.mrb[36].mxu1 %v3226_v10  ;;  %3517 = vmatmul.mubr.bf16.vlgmr.msra.gmra.mrb[40].mxu0 %v3226_v10 }
 0xa3e   :  { %3736 = vmatpush1.bf16.msra.mxu1 %v9100_v37  ;;  %3777 = vmatpush1.bf16.msra.mxu0 %v9102_v0 }
 0xa3f   :  { %3737 = vmatprep.subr.bf16.mxu1 %v9108_v14  ;;  %3778 = vmatprep.subr.bf16.mxu0 %v9110_v16 }
 0xa40   :  { %3767 = vmatprep.mubr.bf16.mxu1 %v9746_v46  ;;  %3808 = vmatprep.mubr.bf16.mxu0 %v9746_v46 }
 0xa42   :  { %3738 = vmatpush1.bf16.msra.mxu1 %v9114_v17  ;;  %3779 = vmatpush1.bf16.msra.mxu0 %v9116_v53 }
 0xa43   :  { %3739 = vmatprep.subr.bf16.mxu1 %v9120_v11  ;;  %3780 = vmatprep.subr.bf16.mxu0 %v9122_v38 }
 0xa46   :  { %3740 = vmatpush1.bf16.msra.mxu1 %v9128_v47  ;;  %3781 = vmatpush1.bf16.msra.mxu0 %v9130_v41 }
 0xa47   :  { %3741 = vmatprep.subr.bf16.mxu1 %v9134_v28  ;;  %3782 = vmatprep.subr.bf16.mxu0 %v9136_v43 }
 0xa4a   :  { %3742 = vmatpush1.bf16.msra.mxu1 %v9140_v33  ;;  %3783 = vmatpush1.bf16.msra.mxu0 %v9142_v56 }
 0xa4b   :  { %3743 = vmatprep.subr.bf16.mxu1 %v9146_v29  ;;  %3784 = vmatprep.subr.bf16.mxu0 %v9148_v1 }
 0xa4e   :  { %3744 = vmatpush1.bf16.msra.mxu1 %v9152_v44  ;;  %3785 = vmatpush1.bf16.msra.mxu0 %v9154_v39 }
 0xa4f   :  { %3745 = vmatprep.subr.bf16.mxu1 %v9158_v57  ;;  %3786 = vmatprep.subr.bf16.mxu0 %v9160_v42 }
 0xa52   :  { %3746 = vmatpush1.bf16.msra.mxu1 %v9164_v54  ;;  %3787 = vmatpush1.bf16.msra.mxu0 %v9166_v55 }
 0xa53   :  { %3747 = vmatprep.subr.bf16.mxu1 %v9170_v58  ;;  %3788 = vmatprep.subr.bf16.mxu0 %v9172_v59 }
 0xa56   :  { %3748 = vmatpush1.bf16.msra.mxu1 %v9176_v60  ;;  %3789 = vmatpush1.bf16.msra.mxu0 %v9178_v61 }
 0xa57   :  { %3749 = vmatprep.subr.bf16.mxu1 %v9182_v62  ;;  %3790 = vmatprep.subr.bf16.mxu0 %v9184_v63 }
 0xa5a   :  { %3750 = vmatpush1.bf16.msra.mxu1 %v9188_v24  ;;  %3791 = vmatpush1.bf16.msra.mxu0 %v9190_v26 }
 0xa5b   :  { %4052 = vmatprep.subr.bf16.mxu1 %v9089_v49  ;;  %4093 = vmatprep.subr.bf16.mxu0 %v9091_v50 }
 0xa5d   :  { %3768 = vmatmul.mubr.bf16.vlgmr.msra.gmra.mrb[40].mxu1 %v9746_v46  ;;  %3809 = vmatmul.mubr.bf16.vlgmr.msra.gmra.mrb[44].mxu0 %v9746_v46 }
 0xa5e   :  { %4053 = vmatpush1.bf16.msra.mxu1 %v9100_v37  ;;  %4094 = vmatpush1.bf16.msra.mxu0 %v9102_v0 }
 0xa5f   :  { %4054 = vmatprep.subr.bf16.mxu1 %v9108_v14  ;;  %4095 = vmatprep.subr.bf16.mxu0 %v9110_v16 }
 0xa60   :  { %4084 = vmatprep.mubr.bf16.mxu1 %v9746_v46  ;;  %4125 = vmatprep.mubr.bf16.mxu0 %v9746_v46 }
 0xa62   :  { %4055 = vmatpush1.bf16.msra.mxu1 %v9114_v17  ;;  %4096 = vmatpush1.bf16.msra.mxu0 %v9116_v53 }
 0xa63   :  { %4056 = vmatprep.subr.bf16.mxu1 %v9120_v11  ;;  %4097 = vmatprep.subr.bf16.mxu0 %v9122_v38 }
 0xa66   :  { %4057 = vmatpush1.bf16.msra.mxu1 %v9128_v47  ;;  %4098 = vmatpush1.bf16.msra.mxu0 %v9130_v41 }
 0xa67   :  { %4058 = vmatprep.subr.bf16.mxu1 %v9134_v28  ;;  %4099 = vmatprep.subr.bf16.mxu0 %v9136_v43 }
 0xa6a   :  { %4059 = vmatpush1.bf16.msra.mxu1 %v9140_v33  ;;  %4100 = vmatpush1.bf16.msra.mxu0 %v9142_v56 }
 0xa6b   :  { %4060 = vmatprep.subr.bf16.mxu1 %v9146_v29  ;;  %4101 = vmatprep.subr.bf16.mxu0 %v9148_v1 }
 0xa6e   :  { %4061 = vmatpush1.bf16.msra.mxu1 %v9152_v44  ;;  %4102 = vmatpush1.bf16.msra.mxu0 %v9154_v39 }
 0xa6f   :  { %4062 = vmatprep.subr.bf16.mxu1 %v9158_v57  ;;  %4103 = vmatprep.subr.bf16.mxu0 %v9160_v42 }
 0xa72   :  { %4063 = vmatpush1.bf16.msra.mxu1 %v9164_v54  ;;  %4104 = vmatpush1.bf16.msra.mxu0 %v9166_v55 }
 0xa73   :  { %4064 = vmatprep.subr.bf16.mxu1 %v9170_v58  ;;  %4105 = vmatprep.subr.bf16.mxu0 %v9172_v59 }
 0xa76   :  { %4065 = vmatpush1.bf16.msra.mxu1 %v9176_v60  ;;  %4106 = vmatpush1.bf16.msra.mxu0 %v9178_v61 }
 0xa77   :  { %4066 = vmatprep.subr.bf16.mxu1 %v9182_v62  ;;  %4107 = vmatprep.subr.bf16.mxu0 %v9184_v63 }
 0xa7a   :  { %4067 = vmatpush1.bf16.msra.mxu1 %v9188_v24  ;;  %4108 = vmatpush1.bf16.msra.mxu0 %v9190_v26 }
 0xa7b   :  { %4375 = vmatprep.subr.bf16.mxu1 %v9089_v49  ;;  %4416 = vmatprep.subr.bf16.mxu0 %v9091_v50 }
 0xb10   :  { %v3475_v36 = vpop.f32.mrb[36].mxu1  ;;  %v3518_v45 = vpop.f32.mrb[40].mxu0 }
 0xb11   :  { %v3476_v19 = vadd.f32 %v3475_v36, %v3264_v4  ;;  %v3519_v20 = vadd.f32 %v3518_v45, %v3272_v6  ;;  %v3477_v25 = vpop.f32.mrb[37].mxu1  ;;  %v3520_v21 = vpop.f32.mrb[41].mxu0 }
 0xb12   :  { %v3478_v22 = vadd.f32 %v3477_v25, %v3268_v7  ;;  %v3521_v51 = vadd.f32 %v3520_v21, %v3276_v32  ;;  %v3479_v34 = vpop.f32.mrb[38].mxu1  ;;  %v3522_v35 = vpop.f32.mrb[42].mxu0 }
 0xb13   :  { %v3480_v52 = vadd.f32 %v3479_v34, %v3264_v4  ;;  %v3523_v23 = vadd.f32 %v3522_v35, %v3272_v6  ;;  %v3481_v30 = vpop.f32.mrb[39].mxu1  ;;  %v3524_v40 = vpop.f32.mrb[43].mxu0  ;;  %v4829_v48 = vrot.slane %v3476_v19, 6  ;;  %v4831_v18 = vrot.slane %v3519_v20, 6 }
 0xb14   :  { %v3482_v13 = vadd.f32 %v3481_v30, %v3268_v7  ;;  %v3525_v12 = vadd.f32 %v3524_v40, %v3276_v32  ;;  %v4830_v15 = vrot.slane %v3478_v22, 6  ;;  %v4832_v10 = vrot.slane %v3521_v51, 6 }
 0xb15   :  { %v3531_v2 = vrot.slane %v3480_v52, 6  ;;  %v3533_v9 = vrot.slane %v3523_v23, 6  ;;  %v3847_v36 = vrot.slane %v3480_v52, 2  ;;  %v3849_v45 = vrot.slane %v3523_v23, 2 }
 0xb16   :  { %v3532_v31 = vrot.slane %v3482_v13, 6  ;;  %v3534_v27 = vrot.slane %v3525_v12, 6  ;;  %v3848_v25 = vrot.slane %v3482_v13, 2  ;;  %v3850_v21 = vrot.slane %v3525_v12, 2 }
 0xb17   :  { %v9244_v4 = vsel %vm311_vm4, %v3476_v19, %v3531_v2  ;;  %v9248_v34 = vsel %vm8690_vm5, %v3519_v20, %v3533_v9  ;;  %v9252_v7 = vsel %vm311_vm4, %v3476_v19, %v3847_v36  ;;  %v9256_v32 = vsel %vm8690_vm5, %v3519_v20, %v3849_v45 }
 0xb18   :  { %9756 = vst [vmem:[#allocation31_spill] sm:$0xff] %v9256_v32  ;;  %v9260_v30 = vsel %vm8694_vm6, %v3478_v22, %v3532_v31  ;;  %v9264_v2 = vsel %vm8698_vm7, %v3521_v51, %v3534_v27  ;;  %v9268_v9 = vsel %vm8694_vm6, %v3478_v22, %v3848_v25  ;;  %v9272_v36 = vsel %vm8698_vm7, %v3521_v51, %v3850_v21 }
 0xb19   :  { %v9276_v45 = vsel %vm311_vm4, %v3480_v52, %v4829_v48  ;;  %v9280_v31 = vsel %vm8690_vm5, %v3523_v23, %v4831_v18  ;;  %v9284_v27 = vsel %vm8694_vm6, %v3482_v13, %v4830_v15  ;;  %v9288_v25 = vsel %vm8698_vm7, %v3525_v12, %v4832_v10 }
 0xb1a   :  { %v5152_v5 = vrot.slane %v3476_v19, 2  ;;  %v5154_v3 = vrot.slane %v3519_v20, 2  ;;  %v5153_v21 = vrot.slane %v3478_v22, 2  ;;  %v5155_v32 = vrot.slane %v3521_v51, 2 }
 0xb1c   :  { %v9292_v48 = vsel %vm311_vm4, %v3480_v52, %v5152_v5  ;;  %v9296_v18 = vsel %vm8690_vm5, %v3523_v23, %v5154_v3  ;;  %v9300_v15 = vsel %vm8694_vm6, %v3482_v13, %v5153_v21  ;;  %v9304_v10 = vsel %vm8698_vm7, %v3525_v12, %v5155_v32 }
 0xb1d   :  { %9759 = vst [vmem:[#allocation30_spill] sm:$0xff] %v9296_v18  ;;  %9760 = vst [vmem:[#allocation27_spill] sm:$0xff] %v9304_v10 }
 0xb30   :  { %v3769_v19 = vpop.f32.mrb[40].mxu1  ;;  %v3810_v20 = vpop.f32.mrb[44].mxu0 }
 0xb31   :  { %v3817_v22 = vadd.f32 %v3769_v19, %v9244_v4  ;;  %v3771_v51 = vpop.f32.mrb[41].mxu1  ;;  %v3812_v8 = vpop.f32.mrb[45].mxu0  ;;  %v3819_v32 = vadd.f32 %v3810_v20, %v9248_v34 }
 0xb32   :  { %v3818_v5 = vadd.f32 %v3771_v51, %v9260_v30  ;;  %v3773_v52 = vpop.f32.mrb[42].mxu1  ;;  %v3814_v6 = vpop.f32.mrb[46].mxu0  ;;  %v3820_v13 = vadd.f32 %v3812_v8, %v9264_v2 }
 0xb33   :  { %v7111_v3 = vmul.f32 -1.442695, %v3817_v22  ;;  %v3774_v23 = vpop.f32.mrb[43].mxu1  ;;  %v3815_v18 = vpop.f32.mrb[47].mxu0 }
 0xb34   :  { %v7112_v35 = vmul.f32 -1.442695, %v3818_v5  ;;  %v7113_v12 = vmul.f32 -1.442695, %v3820_v13 }
 0xb35   :  { %7989 = vpow2.f32 %v7111_v3 }
 0xb36   :  { %7991 = vpow2.f32 %v7112_v35 }
 0xb37   :  { %7993 = vpow2.f32 %v7113_v12 }
 0xb38   :  { %7995 = vtanh.f32 %v3819_v32 }
 0xb3f   :  { %v7990_v40 = vpop.eup %7989 }
 0xb40   :  { %v7992_v21 = vpop.eup %7991  ;;  %v3824_v19 = vadd.f32 1.0, %v7990_v40 }
 0xb41   :  { %v3830_v10 = vadd.f32 1.0, %v7992_v21  ;;  %v7994_v51 = vpop.eup %7993 }
 0xb42   :  { %7997 = vrcp.f32 %v3824_v19  ;;  %v7996_v22 = vpop.eup %7995  ;;  %v3837_v6 = vadd.f32 1.0, %v7994_v51 }
 0xb43   :  { %7999 = vrcp.f32 %v3830_v10 }
 0xb44   :  { %8001 = vrcp.f32 %v3837_v6 }
 0xb4c   :  { %v7998_v52 = vpop.eup %7997 }
 0xb4d   :  { %v8000_v18 = vpop.eup %7999  ;;  %v3841_v5 = vmul.f32 %v7998_v52, %v7996_v22 }
 0xb4e   :  { %v3840_v3 = vmul.f32 0.0, %v8000_v18  ;;  %v8002_v8 = vpop.eup %8001 }
 0xb50   :  { %v9310_v23 = vadd.f32 %v3841_v5, %v3840_v3 }
 0xb52   :  { %8003 = vtanh.f32 %v9310_v23 }
 0xb5c   :  { %v8004_v20 = vpop.eup %8003 }
 0xb5d   :  { %v3844_v35 = vmul.f32 %v8004_v20, %v8002_v8 }
 0xb5f   :  { %3845 = vst [vmem:[#allocation2] sm:$0x3] %v3844_v35  ;;  %3846 = vst [vmem:[#allocation3 + $0xe] sm:$0x3] %v3844_v35  ;;  %v3859_v13 = vpack.c.bf16 %v3844_v35, %v3844_v35 }
 0xb61   :  { %4085 = vmatmul.mubr.bf16.vlgmr.msra.gmra.mrb[44].mxu1 %v3859_v13  ;;  %4126 = vmatmul.mubr.bf16.vlgmr.msra.gmra.mrb[48].mxu0 %v3859_v13  ;;  %v9761_v13 = vld [vmem:[#allocation31_spill] sm:$0xff] }
 0xb62   :  { %4376 = vmatpush1.bf16.msra.mxu1 %v9100_v37  ;;  %4417 = vmatpush1.bf16.msra.mxu0 %v9102_v0 }
 0xb63   :  { %4377 = vmatprep.subr.bf16.mxu1 %v9108_v14  ;;  %4418 = vmatprep.subr.bf16.mxu0 %v9110_v16 }
 0xb64   :  { %4407 = vmatprep.mubr.bf16.mxu1 %v9746_v46  ;;  %4448 = vmatprep.mubr.bf16.mxu0 %v9746_v46 }
 0xb66   :  { %4378 = vmatpush1.bf16.msra.mxu1 %v9114_v17  ;;  %4419 = vmatpush1.bf16.msra.mxu0 %v9116_v53 }
 0xb67   :  { %4379 = vmatprep.subr.bf16.mxu1 %v9120_v11  ;;  %4420 = vmatprep.subr.bf16.mxu0 %v9122_v38 }
 0xb6a   :  { %4380 = vmatpush1.bf16.msra.mxu1 %v9128_v47  ;;  %4421 = vmatpush1.bf16.msra.mxu0 %v9130_v41 }
 0xb6b   :  { %4381 = vmatprep.subr.bf16.mxu1 %v9134_v28  ;;  %4422 = vmatprep.subr.bf16.mxu0 %v9136_v43 }
 0xb6e   :  { %4382 = vmatpush1.bf16.msra.mxu1 %v9140_v33  ;;  %4423 = vmatpush1.bf16.msra.mxu0 %v9142_v56 }
 0xb6f   :  { %4383 = vmatprep.subr.bf16.mxu1 %v9146_v29  ;;  %4424 = vmatprep.subr.bf16.mxu0 %v9148_v1 }
 0xb72   :  { %4384 = vmatpush1.bf16.msra.mxu1 %v9152_v44  ;;  %4425 = vmatpush1.bf16.msra.mxu0 %v9154_v39 }
 0xb73   :  { %4385 = vmatprep.subr.bf16.mxu1 %v9158_v57  ;;  %4426 = vmatprep.subr.bf16.mxu0 %v9160_v42 }
 0xb76   :  { %4386 = vmatpush1.bf16.msra.mxu1 %v9164_v54  ;;  %4427 = vmatpush1.bf16.msra.mxu0 %v9166_v55 }
 0xb77   :  { %4387 = vmatprep.subr.bf16.mxu1 %v9170_v58  ;;  %4428 = vmatprep.subr.bf16.mxu0 %v9172_v59 }
 0xb7a   :  { %4388 = vmatpush1.bf16.msra.mxu1 %v9176_v60  ;;  %4429 = vmatpush1.bf16.msra.mxu0 %v9178_v61 }
 0xb7b   :  { %4389 = vmatprep.subr.bf16.mxu1 %v9182_v62  ;;  %4430 = vmatprep.subr.bf16.mxu0 %v9184_v63 }
 0xb7e   :  { %4390 = vmatpush1.bf16.msra.mxu1 %v9188_v24  ;;  %4431 = vmatpush1.bf16.msra.mxu0 %v9190_v26 }
 0xb7f   :  { %4698 = vmatprep.subr.bf16.mxu1 %v9089_v49  ;;  %4739 = vmatprep.subr.bf16.mxu0 %v9091_v50 }
 0xc34   :  { %v4086_v10 = vpop.f32.mrb[44].mxu1  ;;  %v4127_v12 = vpop.f32.mrb[48].mxu0 }
 0xc35   :  { %v4138_v32 = vrot.slane %v4086_v10, 6  ;;  %v4088_v40 = vpop.f32.mrb[45].mxu1  ;;  %v4129_v21 = vpop.f32.mrb[49].mxu0  ;;  %v4140_v50 = vrot.slane %v4127_v12, 6 }
 0xc36   :  { %v4139_v19 = vrot.slane %v4088_v40, 6  ;;  %v4090_v51 = vpop.f32.mrb[46].mxu1  ;;  %v4131_v22 = vpop.f32.mrb[50].mxu0  ;;  %v4141_v20 = vrot.slane %v4129_v21, 6  ;;  %v4170_v21 = vrot.slane %v9310_v23, 6 }
 0xc37   :  { %v4146_v52 = vadd.f32 %v4138_v32, %v9252_v7  ;;  %v4091_v18 = vpop.f32.mrb[47].mxu1  ;;  %v4132_v5 = vpop.f32.mrb[51].mxu0  ;;  %v4148_v10 = vadd.f32 %v4140_v50, %v9761_v13 }
 0xc38   :  { %v4147_v6 = vadd.f32 %v4139_v19, %v9268_v9  ;;  %v4149_v49 = vadd.f32 %v4141_v20, %v9272_v36 }
 0xc39   :  { %v7146_v3 = vmul.f32 -1.442695, %v4146_v52 }
 0xc3a   :  { %v7147_v8 = vmul.f32 -1.442695, %v4147_v6  ;;  %v7148_v35 = vmul.f32 -1.442695, %v4149_v49 }
 0xc3b   :  { %8005 = vpow2.f32 %v7146_v3 }
 0xc3c   :  { %8007 = vpow2.f32 %v7147_v8 }
 0xc3d   :  { %8009 = vpow2.f32 %v7148_v35 }
 0xc3e   :  { %8011 = vtanh.f32 %v4148_v10 }
 0xc45   :  { %v8006_v40 = vpop.eup %8005 }
 0xc46   :  { %v8008_v51 = vpop.eup %8007  ;;  %v4153_v22 = vadd.f32 1.0, %v8006_v40 }
 0xc47   :  { %v4159_v32 = vadd.f32 1.0, %v8008_v51  ;;  %v8010_v19 = vpop.eup %8009 }
 0xc48   :  { %8013 = vrcp.f32 %v4153_v22  ;;  %v8012_v52 = vpop.eup %8011  ;;  %v4166_v3 = vadd.f32 1.0, %v8010_v19  ;;  %v9397_v22 = vld [vmem:[#allocation12 + $0x4] ss:$16 sps:$4 sm:$0xff]   ;;  %v9401_v19 = vld [vmem:[#allocation12] ss:$16 sps:$4 sm:$0xff]  }
 0xc49   :  { %8015 = vrcp.f32 %v4159_v32  ;;  %v9399_v32 = vld [vmem:[#allocation12 + $0xc] ss:$16 sps:$4 sm:$0xff]  }
 0xc4a   :  { %8017 = vrcp.f32 %v4166_v3  ;;  %v9421_v3 = vld [vmem:[#allocation12 + $0x44] ss:$16 sps:$4 sm:$0xff]  }
 0xc52   :  { %v8014_v18 = vpop.eup %8013 }
 0xc53   :  { %v8016_v5 = vpop.eup %8015  ;;  %v4173_v6 = vmul.f32 %v8014_v18, %v8012_v52  ;;  %v9403_v52 = vld [vmem:[#allocation12 + $0x8] ss:$16 sps:$4 sm:$0xff]   ;;  %v9409_v18 = vld [vmem:[#allocation12 + $0x24] ss:$16 sps:$4 sm:$0xff]  }
 0xc54   :  { %v4172_v12 = vmul.f32 %v8016_v5, %v4170_v21  ;;  %v8018_v20 = vpop.eup %8017  ;;  %v9411_v21 = vld [vmem:[#allocation12 + $0x2c] ss:$16 sps:$4 sm:$0xff]   ;;  %v9413_v5 = vld [vmem:[#allocation12 + $0x20] ss:$16 sps:$4 sm:$0xff]  }
 0xc56   :  { %v9352_v8 = vadd.f32 %v4173_v6, %v4172_v12  ;;  %v9415_v6 = vld [vmem:[#allocation12 + $0x28] ss:$16 sps:$4 sm:$0xff]   ;;  %v9423_v12 = vld [vmem:[#allocation12 + $0x4c] ss:$16 sps:$4 sm:$0xff]  }
 0xc58   :  { %8019 = vtanh.f32 %v9352_v8 }
 0xc62   :  { %v8020_v49 = vpop.eup %8019 }
 0xc63   :  { %v4176_v50 = vmul.f32 %v8020_v49, %v8018_v20  ;;  %v9427_v20 = vld [vmem:[#allocation12 + $0x48] ss:$16 sps:$4 sm:$0xff]   ;;  %v9433_v49 = vld [vmem:[#allocation12 + $0x60] ss:$16 sps:$4 sm:$0xff]  }
 0xc65   :  { %4177 = vst [vmem:[#allocation2] sm:$0xc] %v4176_v50  ;;  %4178 = vst [vmem:[#allocation3 + $0xa] sm:$0xc] %v4176_v50  ;;  %v4179_v35 = vpack.c.bf16 %v4176_v50, %v4176_v50  ;;  %v9435_v50 = vld [vmem:[#allocation12 + $0x64] ss:$16 sps:$4 sm:$0xff]  }
 0xc67   :  { %v4213_v10 = vrot.slane %v4179_v35, 1  ;;  %v9437_v35 = vld [vmem:[#allocation12 + $0x68] ss:$16 sps:$4 sm:$0xff]  }
 0xc69   :  { %4408 = vmatmul.mubr.bf16.vlgmr.msra.gmra.mrb[48].mxu1 %v4213_v10  ;;  %4449 = vmatmul.mubr.bf16.vlgmr.msra.gmra.mrb[52].mxu0 %v4213_v10  ;;  %v9439_v10 = vld [vmem:[#allocation12 + $0x6c] ss:$16 sps:$4 sm:$0xff]  }
 0xc6a   :  { %4699 = vmatpush1.bf16.msra.mxu1 %v9100_v37  ;;  %4740 = vmatpush1.bf16.msra.mxu0 %v9102_v0 }
 0xc6b   :  { %4700 = vmatprep.subr.bf16.mxu1 %v9108_v14  ;;  %4741 = vmatprep.subr.bf16.mxu0 %v9110_v16 }
 0xc6c   :  { %4730 = vmatprep.mubr.bf16.mxu1 %v9746_v46  ;;  %4771 = vmatprep.mubr.bf16.mxu0 %v9746_v46 }
 0xc6e   :  { %4701 = vmatpush1.bf16.msra.mxu1 %v9114_v17  ;;  %4742 = vmatpush1.bf16.msra.mxu0 %v9116_v53 }
 0xc6f   :  { %4702 = vmatprep.subr.bf16.mxu1 %v9120_v11  ;;  %4743 = vmatprep.subr.bf16.mxu0 %v9122_v38 }
 0xc72   :  { %4703 = vmatpush1.bf16.msra.mxu1 %v9128_v47  ;;  %4744 = vmatpush1.bf16.msra.mxu0 %v9130_v41 }
 0xc73   :  { %4704 = vmatprep.subr.bf16.mxu1 %v9134_v28  ;;  %4745 = vmatprep.subr.bf16.mxu0 %v9136_v43 }
 0xc76   :  { %4705 = vmatpush1.bf16.msra.mxu1 %v9140_v33  ;;  %4746 = vmatpush1.bf16.msra.mxu0 %v9142_v56 }
 0xc77   :  { %4706 = vmatprep.subr.bf16.mxu1 %v9146_v29  ;;  %4747 = vmatprep.subr.bf16.mxu0 %v9148_v1 }
 0xc7a   :  { %4707 = vmatpush1.bf16.msra.mxu1 %v9152_v44  ;;  %4748 = vmatpush1.bf16.msra.mxu0 %v9154_v39 }
 0xc7b   :  { %4708 = vmatprep.subr.bf16.mxu1 %v9158_v57  ;;  %4749 = vmatprep.subr.bf16.mxu0 %v9160_v42 }
 0xc7e   :  { %4709 = vmatpush1.bf16.msra.mxu1 %v9164_v54  ;;  %4750 = vmatpush1.bf16.msra.mxu0 %v9166_v55 }
 0xc7f   :  { %4710 = vmatprep.subr.bf16.mxu1 %v9170_v58  ;;  %4751 = vmatprep.subr.bf16.mxu0 %v9172_v59 }
 0xc82   :  { %4711 = vmatpush1.bf16.msra.mxu1 %v9176_v60  ;;  %4752 = vmatpush1.bf16.msra.mxu0 %v9178_v61 }
 0xc83   :  { %4712 = vmatprep.subr.bf16.mxu1 %v9182_v62  ;;  %4753 = vmatprep.subr.bf16.mxu0 %v9184_v63  ;;  %v4493_v62 = vrot.slane %v9352_v8, 6  ;;  %v9425_v8 = vld [vmem:[#allocation12 + $0x40] ss:$16 sps:$4 sm:$0xff]  }
 0xc86   :  { %4713 = vmatpush1.bf16.msra.mxu1 %v9188_v24  ;;  %4754 = vmatpush1.bf16.msra.mxu0 %v9190_v26 }
 0xc87   :  { %5037 = vmatprep.subr.bf16.mxu1 %v9397_v22  ;;  %5078 = vmatprep.subr.bf16.mxu0 %v9399_v32 }
 0xd3c   :  { %v4409_v37 = vpop.f32.mrb[48].mxu1  ;;  %v4450_v0 = vpop.f32.mrb[52].mxu0 }
 0xd3d   :  { %v4461_v14 = vrot.slane %v4409_v37, 4  ;;  %v4411_v16 = vpop.f32.mrb[49].mxu1  ;;  %v4452_v17 = vpop.f32.mrb[53].mxu0  ;;  %v4463_v44 = vrot.slane %v4450_v0, 4  ;;  %v9441_v37 = vld [vmem:[#allocation12 + $0x84] ss:$16 sps:$4 sm:$0xff]  }
 0xd3e   :  { %v4462_v53 = vrot.slane %v4411_v16, 4  ;;  %v4413_v11 = vpop.f32.mrb[50].mxu1  ;;  %v4454_v38 = vpop.f32.mrb[54].mxu0  ;;  %v4464_v29 = vrot.slane %v4452_v17, 4  ;;  %v9444_v0 = vld [vmem:[#allocation12 + $0x8c] ss:$16 sps:$4 sm:$0xff]  }
 0xd3f   :  { %v4469_v47 = vadd.f32 %v4461_v14, %v9244_v4  ;;  %v4414_v41 = vpop.f32.mrb[51].mxu1  ;;  %v4455_v28 = vpop.f32.mrb[55].mxu0  ;;  %v4471_v57 = vadd.f32 %v4463_v44, %v9248_v34  ;;  %v9448_v14 = vld [vmem:[#allocation12 + $0x80] ss:$16 sps:$4 sm:$0xff]   ;;  %v9452_v16 = vld [vmem:[#allocation12 + $0x88] ss:$16 sps:$4 sm:$0xff]  }
 0xd40   :  { %v4470_v43 = vadd.f32 %v4462_v53, %v9260_v30  ;;  %v4472_v1 = vadd.f32 %v4464_v29, %v9264_v2  ;;  %v9454_v17 = vld [vmem:[#allocation12 + $0xa4] ss:$16 sps:$4 sm:$0xff]   ;;  %v9457_v53 = vld [vmem:[#allocation12 + $0xac] ss:$16 sps:$4 sm:$0xff]   ;;  %v9460_v11 = vld [vmem:[#allocation12 + $0xa0] ss:$16 sps:$4 sm:$0xff]  }
 0xd41   :  { %v7181_v33 = vmul.f32 -1.442695, %v4469_v47  ;;  %v9464_v38 = vld [vmem:[#allocation12 + $0xa8] ss:$16 sps:$4 sm:$0xff]   ;;  %v9466_v47 = vld [vmem:[#allocation12 + $0xc4] ss:$16 sps:$4 sm:$0xff]  }
 0xd42   :  { %v7182_v56 = vmul.f32 -1.442695, %v4470_v43  ;;  %v7183_v39 = vmul.f32 -1.442695, %v4472_v1  ;;  %v9469_v41 = vld [vmem:[#allocation12 + $0xcc] ss:$16 sps:$4 sm:$0xff]  }
 0xd43   :  { %8021 = vpow2.f32 %v7181_v33  ;;  %v9472_v28 = vld [vmem:[#allocation12 + $0xc0] ss:$16 sps:$4 sm:$0xff]   ;;  %v9476_v43 = vld [vmem:[#allocation12 + $0xc8] ss:$16 sps:$4 sm:$0xff]   ;;  %v9478_v33 = vld [vmem:[#allocation12 + $0xe4] ss:$16 sps:$4 sm:$0xff]  }
 0xd44   :  { %8023 = vpow2.f32 %v7182_v56  ;;  %v9481_v56 = vld [vmem:[#allocation12 + $0xec] ss:$16 sps:$4 sm:$0xff]   ;;  %v9484_v29 = vld [vmem:[#allocation12 + $0xe0] ss:$16 sps:$4 sm:$0xff]   ;;  %v9488_v1 = vld [vmem:[#allocation12 + $0xe8] ss:$16 sps:$4 sm:$0xff]  }
 0xd45   :  { %8025 = vpow2.f32 %v7183_v39 }
 0xd46   :  { %8027 = vtanh.f32 %v4471_v57 }
 0xd4d   :  { %v8022_v42 = vpop.eup %8021 }
 0xd4e   :  { %v8024_v54 = vpop.eup %8023  ;;  %v4476_v55 = vadd.f32 1.0, %v8022_v42 }
 0xd4f   :  { %v4482_v58 = vadd.f32 1.0, %v8024_v54  ;;  %v8026_v59 = vpop.eup %8025 }
 0xd50   :  { %8029 = vrcp.f32 %v4476_v55  ;;  %v8028_v60 = vpop.eup %8027  ;;  %v4489_v26 = vadd.f32 1.0, %v8026_v59 }
 0xd51   :  { %8031 = vrcp.f32 %v4482_v58 }
 0xd52   :  { %8033 = vrcp.f32 %v4489_v26 }
 0xd5a   :  { %v8030_v61 = vpop.eup %8029 }
 0xd5b   :  { %v8032_v63 = vpop.eup %8031  ;;  %v4496_v24 = vmul.f32 %v8030_v61, %v8028_v60 }
 0xd5c   :  { %v4495_v4 = vmul.f32 %v8032_v63, %v4493_v62  ;;  %v8034_v34 = vpop.eup %8033 }
 0xd5e   :  { %v9392_v30 = vadd.f32 %v4496_v24, %v4495_v4 }
 0xd60   :  { %8035 = vtanh.f32 %v9392_v30 }
 0xd6a   :  { %v8036_v2 = vpop.eup %8035 }
 0xd6b   :  { %v4499_v23 = vmul.f32 %v8036_v2, %v8034_v34 }
 0xd6d   :  { %4500 = vst [vmem:[#allocation2] sm:$0x30] %v4499_v23  ;;  %4501 = vst [vmem:[#allocation3 + $0x6] sm:$0x30] %v4499_v23  ;;  %v4502_v40 = vpack.c.bf16 %v4499_v23, %v4499_v23 }
 0xd6f   :  { %v4536_v51 = vrot.slane %v4502_v40, 2 }
 0xd71   :  { %4731 = vmatmul.mubr.bf16.vlgmr.msra.gmra.mrb[52].mxu1 %v4536_v51  ;;  %4772 = vmatmul.mubr.bf16.vlgmr.msra.gmra.mrb[56].mxu0 %v4536_v51 }
 0xd72   :  { %5069 = vmatprep.mubr.bf16.mxu1 %v9746_v46  ;;  %5110 = vmatprep.mubr.bf16.mxu0 %v9746_v46 }
 0xd73   :  { %5038 = vmatpush1.bf16.msra.mxu1 %v9401_v19  ;;  %5079 = vmatpush1.bf16.msra.mxu0 %v9403_v52 }
 0xd74   :  { %5039 = vmatprep.subr.bf16.mxu1 %v9409_v18  ;;  %5080 = vmatprep.subr.bf16.mxu0 %v9411_v21 }
 0xd77   :  { %5040 = vmatpush1.bf16.msra.mxu1 %v9413_v5  ;;  %5081 = vmatpush1.bf16.msra.mxu0 %v9415_v6 }
 0xd78   :  { %5041 = vmatprep.subr.bf16.mxu1 %v9421_v3  ;;  %5082 = vmatprep.subr.bf16.mxu0 %v9423_v12 }
 0xd7b   :  { %5042 = vmatpush1.bf16.msra.mxu1 %v9425_v8  ;;  %5083 = vmatpush1.bf16.msra.mxu0 %v9427_v20 }
 0xd7c   :  { %5043 = vmatprep.subr.bf16.mxu1 %v9435_v50  ;;  %5084 = vmatprep.subr.bf16.mxu0 %v9439_v10 }
 0xd7f   :  { %5044 = vmatpush1.bf16.msra.mxu1 %v9433_v49  ;;  %5085 = vmatpush1.bf16.msra.mxu0 %v9437_v35 }
 0xd80   :  { %5045 = vmatprep.subr.bf16.mxu1 %v9441_v37  ;;  %5086 = vmatprep.subr.bf16.mxu0 %v9444_v0 }
 0xd83   :  { %5046 = vmatpush1.bf16.msra.mxu1 %v9448_v14  ;;  %5087 = vmatpush1.bf16.msra.mxu0 %v9452_v16 }
 0xd84   :  { %5047 = vmatprep.subr.bf16.mxu1 %v9454_v17  ;;  %5088 = vmatprep.subr.bf16.mxu0 %v9457_v53 }
 0xd87   :  { %5048 = vmatpush1.bf16.msra.mxu1 %v9460_v11  ;;  %5089 = vmatpush1.bf16.msra.mxu0 %v9464_v38 }
 0xd88   :  { %5049 = vmatprep.subr.bf16.mxu1 %v9466_v47  ;;  %5090 = vmatprep.subr.bf16.mxu0 %v9469_v41 }
 0xd8b   :  { %5050 = vmatpush1.bf16.msra.mxu1 %v9472_v28  ;;  %5091 = vmatpush1.bf16.msra.mxu0 %v9476_v43 }
 0xd8c   :  { %5051 = vmatprep.subr.bf16.mxu1 %v9478_v33  ;;  %5092 = vmatprep.subr.bf16.mxu0 %v9481_v56 }
 0xd8f   :  { %5052 = vmatpush1.bf16.msra.mxu1 %v9484_v29  ;;  %5093 = vmatpush1.bf16.msra.mxu0 %v9488_v1 }
 0xd90   :  { %5357 = vmatprep.subr.bf16.mxu1 %v9397_v22  ;;  %5398 = vmatprep.subr.bf16.mxu0 %v9399_v32 }
 0xe44   :  { %v4732_v44 = vpop.f32.mrb[52].mxu1  ;;  %v4773_v39 = vpop.f32.mrb[56].mxu0 }
 0xe45   :  { %v4784_v57 = vrot.slane %v4732_v44, 2  ;;  %v4734_v42 = vpop.f32.mrb[53].mxu1  ;;  %v4775_v54 = vpop.f32.mrb[57].mxu0  ;;  %v4786_v2 = vrot.slane %v4773_v39, 2 }
 0xe46   :  { %v4785_v55 = vrot.slane %v4734_v42, 2  ;;  %v4736_v58 = vpop.f32.mrb[54].mxu1  ;;  %v4777_v59 = vpop.f32.mrb[58].mxu0  ;;  %v4787_v4 = vrot.slane %v4775_v54, 2  ;;  %v4816_v54 = vrot.slane %v9392_v30, 6 }
 0xe47   :  { %v4792_v60 = vadd.f32 %v4784_v57, %v9252_v7  ;;  %v4737_v61 = vpop.f32.mrb[55].mxu1  ;;  %v4778_v62 = vpop.f32.mrb[59].mxu0  ;;  %v4794_v40 = vadd.f32 %v4786_v2, %v9761_v13 }
 0xe48   :  { %v4793_v63 = vadd.f32 %v4785_v55, %v9268_v9  ;;  %v4795_v34 = vadd.f32 %v4787_v4, %v9272_v36 }
 0xe49   :  { %v7216_v24 = vmul.f32 -1.442695, %v4792_v60 }
 0xe4a   :  { %v7217_v26 = vmul.f32 -1.442695, %v4793_v63  ;;  %v7218_v23 = vmul.f32 -1.442695, %v4795_v34 }
 0xe4b   :  { %8037 = vpow2.f32 %v7216_v24 }
 0xe4c   :  { %8039 = vpow2.f32 %v7217_v26 }
 0xe4d   :  { %8041 = vpow2.f32 %v7218_v23 }
 0xe4e   :  { %8043 = vtanh.f32 %v4794_v40 }
 0xe55   :  { %v8038_v51 = vpop.eup %8037 }
 0xe56   :  { %v8040_v44 = vpop.eup %8039  ;;  %v4799_v42 = vadd.f32 1.0, %v8038_v51 }
 0xe57   :  { %v4805_v7 = vadd.f32 1.0, %v8040_v44  ;;  %v8042_v9 = vpop.eup %8041 }
 0xe58   :  { %8045 = vrcp.f32 %v4799_v42  ;;  %v8044_v57 = vpop.eup %8043  ;;  %v4812_v36 = vadd.f32 1.0, %v8042_v9 }
 0xe59   :  { %8047 = vrcp.f32 %v4805_v7 }
 0xe5a   :  { %8049 = vrcp.f32 %v4812_v36 }
 0xe62   :  { %v8046_v55 = vpop.eup %8045 }
 0xe63   :  { %v8048_v58 = vpop.eup %8047  ;;  %v4819_v59 = vmul.f32 %v8046_v55, %v8044_v57 }
 0xe64   :  { %v4818_v39 = vmul.f32 %v8048_v58, %v4816_v54  ;;  %v8050_v13 = vpop.eup %8049 }
 0xe66   :  { %v9500_v60 = vadd.f32 %v4819_v59, %v4818_v39 }
 0xe68   :  { %8051 = vtanh.f32 %v9500_v60 }
 0xe72   :  { %v8052_v61 = vpop.eup %8051 }
 0xe73   :  { %v4822_v62 = vmul.f32 %v8052_v61, %v8050_v13 }
 0xe75   :  { %4823 = vst [vmem:[#allocation2] sm:$0xc0] %v4822_v62  ;;  %4824 = vst [vmem:[#allocation3 + $0x2] sm:$0xc0] %v4822_v62  ;;  %v4841_v63 = vpack.c.bf16 %v4822_v62, %v4822_v62 }
 0xe77   :  { %v4875_v24 = vrot.slane %v4841_v63, 3  ;;  %v5143_v63 = vrot.slane %v9500_v60, 6 }
 0xe79   :  { %5070 = vmatmul.mubr.bf16.vlgmr.msra.gmra.mrb[56].mxu1 %v4875_v24  ;;  %5111 = vmatmul.mubr.bf16.vlgmr.msra.gmra.mrb[60].mxu0 %v4875_v24 }
 0xe7a   :  { %5358 = vmatpush1.bf16.msra.mxu1 %v9401_v19  ;;  %5399 = vmatpush1.bf16.msra.mxu0 %v9403_v52 }
 0xe7b   :  { %5359 = vmatprep.subr.bf16.mxu1 %v9409_v18  ;;  %5400 = vmatprep.subr.bf16.mxu0 %v9411_v21 }
 0xe7c   :  { %5389 = vmatprep.mubr.bf16.mxu1 %v9746_v46  ;;  %5430 = vmatprep.mubr.bf16.mxu0 %v9746_v46 }
 0xe7e   :  { %5360 = vmatpush1.bf16.msra.mxu1 %v9413_v5  ;;  %5401 = vmatpush1.bf16.msra.mxu0 %v9415_v6 }
 0xe7f   :  { %5361 = vmatprep.subr.bf16.mxu1 %v9421_v3  ;;  %5402 = vmatprep.subr.bf16.mxu0 %v9423_v12 }
 0xe82   :  { %5362 = vmatpush1.bf16.msra.mxu1 %v9425_v8  ;;  %5403 = vmatpush1.bf16.msra.mxu0 %v9427_v20 }
 0xe83   :  { %5363 = vmatprep.subr.bf16.mxu1 %v9435_v50  ;;  %5404 = vmatprep.subr.bf16.mxu0 %v9439_v10 }
 0xe86   :  { %5364 = vmatpush1.bf16.msra.mxu1 %v9433_v49  ;;  %5405 = vmatpush1.bf16.msra.mxu0 %v9437_v35 }
 0xe87   :  { %5365 = vmatprep.subr.bf16.mxu1 %v9441_v37  ;;  %5406 = vmatprep.subr.bf16.mxu0 %v9444_v0 }
 0xe8a   :  { %5366 = vmatpush1.bf16.msra.mxu1 %v9448_v14  ;;  %5407 = vmatpush1.bf16.msra.mxu0 %v9452_v16 }
 0xe8b   :  { %5367 = vmatprep.subr.bf16.mxu1 %v9454_v17  ;;  %5408 = vmatprep.subr.bf16.mxu0 %v9457_v53 }
 0xe8e   :  { %5368 = vmatpush1.bf16.msra.mxu1 %v9460_v11  ;;  %5409 = vmatpush1.bf16.msra.mxu0 %v9464_v38 }
 0xe8f   :  { %5369 = vmatprep.subr.bf16.mxu1 %v9466_v47  ;;  %5410 = vmatprep.subr.bf16.mxu0 %v9469_v41 }
 0xe92   :  { %5370 = vmatpush1.bf16.msra.mxu1 %v9472_v28  ;;  %5411 = vmatpush1.bf16.msra.mxu0 %v9476_v43 }
 0xe93   :  { %5371 = vmatprep.subr.bf16.mxu1 %v9478_v33  ;;  %5412 = vmatprep.subr.bf16.mxu0 %v9481_v56 }
 0xe96   :  { %5372 = vmatpush1.bf16.msra.mxu1 %v9484_v29  ;;  %5413 = vmatpush1.bf16.msra.mxu0 %v9488_v1 }
 0xe97   :  { %5680 = vmatprep.subr.bf16.mxu1 %v9397_v22  ;;  %5721 = vmatprep.subr.bf16.mxu0 %v9399_v32 }
 0xf4c   :  { %v5071_v30 = vpop.f32.mrb[56].mxu1  ;;  %v5112_v26 = vpop.f32.mrb[60].mxu0 }
 0xf4d   :  { %v5119_v4 = vadd.f32 %v5071_v30, %v9276_v45  ;;  %v5073_v34 = vpop.f32.mrb[57].mxu1  ;;  %v5114_v2 = vpop.f32.mrb[61].mxu0  ;;  %v5121_v54 = vadd.f32 %v5112_v26, %v9280_v31 }
 0xf4e   :  { %v5120_v23 = vadd.f32 %v5073_v34, %v9284_v27  ;;  %v5075_v40 = vpop.f32.mrb[58].mxu1  ;;  %v5116_v51 = vpop.f32.mrb[62].mxu0  ;;  %v5122_v57 = vadd.f32 %v5114_v2, %v9288_v25 }
 0xf4f   :  { %v7251_v44 = vmul.f32 -1.442695, %v5119_v4  ;;  %v5076_v42 = vpop.f32.mrb[59].mxu1  ;;  %v5117_v7 = vpop.f32.mrb[63].mxu0 }
 0xf50   :  { %v7252_v9 = vmul.f32 -1.442695, %v5120_v23  ;;  %v7253_v55 = vmul.f32 -1.442695, %v5122_v57 }
 0xf51   :  { %8053 = vpow2.f32 %v7251_v44 }
 0xf52   :  { %8055 = vpow2.f32 %v7252_v9 }
 0xf53   :  { %8057 = vpow2.f32 %v7253_v55 }
 0xf54   :  { %8059 = vtanh.f32 %v5121_v54 }
 0xf5b   :  { %v8054_v58 = vpop.eup %8053 }
 0xf5c   :  { %v8056_v59 = vpop.eup %8055  ;;  %v5126_v36 = vadd.f32 1.0, %v8054_v58 }
 0xf5d   :  { %v5132_v39 = vadd.f32 1.0, %v8056_v59  ;;  %v8058_v13 = vpop.eup %8057 }
 0xf5e   :  { %8061 = vrcp.f32 %v5126_v36  ;;  %v8060_v61 = vpop.eup %8059  ;;  %v5139_v4 = vadd.f32 1.0, %v8058_v13 }
 0xf5f   :  { %8063 = vrcp.f32 %v5132_v39 }
 0xf60   :  { %8065 = vrcp.f32 %v5139_v4 }
 0xf68   :  { %v8062_v62 = vpop.eup %8061 }
 0xf69   :  { %v8064_v24 = vpop.eup %8063  ;;  %v5146_v30 = vmul.f32 %v8062_v62, %v8060_v61 }
 0xf6a   :  { %v5145_v34 = vmul.f32 %v8064_v24, %v5143_v63  ;;  %v8066_v26 = vpop.eup %8065 }
 0xf6c   :  { %v9542_v2 = vadd.f32 %v5146_v30, %v5145_v34  ;;  %v9763_v30 = vld [vmem:[#allocation30_spill] sm:$0xff] }
 0xf6e   :  { %8067 = vtanh.f32 %v9542_v2 }
 0xf78   :  { %v8068_v23 = vpop.eup %8067 }
 0xf79   :  { %v5149_v40 = vmul.f32 %v8068_v23, %v8066_v26 }
 0xf7b   :  { %5150 = vst [vmem:[#allocation2 + $0x8] sm:$0x3] %v5149_v40  ;;  %5151 = vst [vmem:[#allocation3 + $0x6] sm:$0x3] %v5149_v40  ;;  %v5164_v51 = vpack.c.bf16 %v5149_v40, %v5149_v40 }
 0xf7d   :  { %5390 = vmatmul.mubr.bf16.vlgmr.msra.gmra.mrb[60].mxu1 %v5164_v51  ;;  %5431 = vmatmul.mubr.bf16.vlgmr.msra.gmra.mrb[64].mxu0 %v5164_v51 }
 0xf7e   :  { %5681 = vmatpush1.bf16.msra.mxu1 %v9401_v19  ;;  %5722 = vmatpush1.bf16.msra.mxu0 %v9403_v52 }
 0xf7f   :  { %5682 = vmatprep.subr.bf16.mxu1 %v9409_v18  ;;  %5723 = vmatprep.subr.bf16.mxu0 %v9411_v21 }
 0xf80   :  { %5712 = vmatprep.mubr.bf16.mxu1 %v9746_v46  ;;  %5753 = vmatprep.mubr.bf16.mxu0 %v9746_v46 }
 0xf82   :  { %5683 = vmatpush1.bf16.msra.mxu1 %v9413_v5  ;;  %5724 = vmatpush1.bf16.msra.mxu0 %v9415_v6 }
 0xf83   :  { %5684 = vmatprep.subr.bf16.mxu1 %v9421_v3  ;;  %5725 = vmatprep.subr.bf16.mxu0 %v9423_v12 }
 0xf86   :  { %5685 = vmatpush1.bf16.msra.mxu1 %v9425_v8  ;;  %5726 = vmatpush1.bf16.msra.mxu0 %v9427_v20 }
 0xf87   :  { %5686 = vmatprep.subr.bf16.mxu1 %v9435_v50  ;;  %5727 = vmatprep.subr.bf16.mxu0 %v9439_v10 }
 0xf8a   :  { %5687 = vmatpush1.bf16.msra.mxu1 %v9433_v49  ;;  %5728 = vmatpush1.bf16.msra.mxu0 %v9437_v35 }
 0xf8b   :  { %5688 = vmatprep.subr.bf16.mxu1 %v9441_v37  ;;  %5729 = vmatprep.subr.bf16.mxu0 %v9444_v0 }
 0xf8e   :  { %5689 = vmatpush1.bf16.msra.mxu1 %v9448_v14  ;;  %5730 = vmatpush1.bf16.msra.mxu0 %v9452_v16 }
 0xf8f   :  { %5690 = vmatprep.subr.bf16.mxu1 %v9454_v17  ;;  %5731 = vmatprep.subr.bf16.mxu0 %v9457_v53 }
 0xf92   :  { %5691 = vmatpush1.bf16.msra.mxu1 %v9460_v11  ;;  %5732 = vmatpush1.bf16.msra.mxu0 %v9464_v38 }
 0xf93   :  { %5692 = vmatprep.subr.bf16.mxu1 %v9466_v47  ;;  %5733 = vmatprep.subr.bf16.mxu0 %v9469_v41 }
 0xf96   :  { %5693 = vmatpush1.bf16.msra.mxu1 %v9472_v28  ;;  %5734 = vmatpush1.bf16.msra.mxu0 %v9476_v43 }
 0xf97   :  { %5694 = vmatprep.subr.bf16.mxu1 %v9478_v33  ;;  %5735 = vmatprep.subr.bf16.mxu0 %v9481_v56 }
 0xf9a   :  { %5695 = vmatpush1.bf16.msra.mxu1 %v9484_v29  ;;  %5736 = vmatpush1.bf16.msra.mxu0 %v9488_v1 }
 0xf9b   :  { %6003 = vmatprep.subr.bf16.mxu1 %v9397_v22  ;;  %6044 = vmatprep.subr.bf16.mxu0 %v9399_v32  ;;  %v9762_v22 = vld [vmem:[#allocation27_spill] sm:$0xff] }
0x1050   :  { %v5391_v60 = vpop.f32.mrb[60].mxu1  ;;  %v5432_v44 = vpop.f32.mrb[64].mxu0 }
0x1051   :  { %v5443_v42 = vrot.slane %v5391_v60, 6  ;;  %v5393_v7 = vpop.f32.mrb[61].mxu1  ;;  %v5434_v9 = vpop.f32.mrb[65].mxu0  ;;  %v5445_v63 = vrot.slane %v5432_v44, 6 }
0x1052   :  { %v5444_v57 = vrot.slane %v5393_v7, 6  ;;  %v5395_v55 = vpop.f32.mrb[62].mxu1  ;;  %v5436_v54 = vpop.f32.mrb[66].mxu0  ;;  %v5446_v62 = vrot.slane %v5434_v9, 6  ;;  %v5475_v7 = vrot.slane %v9542_v2, 6 }
0x1053   :  { %v5451_v58 = vadd.f32 %v5443_v42, %v9292_v48  ;;  %v5396_v59 = vpop.f32.mrb[63].mxu1  ;;  %v5437_v36 = vpop.f32.mrb[67].mxu0  ;;  %v5453_v4 = vadd.f32 %v5445_v63, %v9763_v30  ;;  %v7823_v63 = vld [vmem:[#allocation13 + $0x4] ss:$12 sps:$4 sm:$0xff]  }
0x1054   :  { %v5452_v39 = vadd.f32 %v5444_v57, %v9300_v15  ;;  %v5454_v32 = vadd.f32 %v5446_v62, %v9762_v22 }
0x1055   :  { %v7286_v13 = vmul.f32 -1.442695, %v5451_v58 }
0x1056   :  { %v7287_v61 = vmul.f32 -1.442695, %v5452_v39  ;;  %v7288_v24 = vmul.f32 -1.442695, %v5454_v32 }
0x1057   :  { %8069 = vpow2.f32 %v7286_v13 }
0x1058   :  { %8071 = vpow2.f32 %v7287_v61 }
0x1059   :  { %8073 = vpow2.f32 %v7288_v24  ;;  %v7821_v24 = vld [vmem:[#allocation13] ss:$12 sps:$4 sm:$0xff]  }
0x105a   :  { %8075 = vtanh.f32 %v5453_v4  ;;  %v7824_v4 = vld [vmem:[#allocation13 + $0x8] ss:$12 sps:$4 sm:$0xff]  }
0x1061   :  { %v8070_v34 = vpop.eup %8069 }
0x1062   :  { %v8072_v26 = vpop.eup %8071  ;;  %v5458_v23 = vadd.f32 1.0, %v8070_v34  ;;  %v7827_v34 = vld [vmem:[#allocation13 + $0x1c] ss:$12 sps:$4 sm:$0xff]  }
0x1063   :  { %v5464_v40 = vadd.f32 1.0, %v8072_v26  ;;  %v8074_v51 = vpop.eup %8073  ;;  %v7825_v26 = vld [vmem:[#allocation13 + $0x18] ss:$12 sps:$4 sm:$0xff]  }
0x1064   :  { %8077 = vrcp.f32 %v5458_v23  ;;  %v8076_v60 = vpop.eup %8075  ;;  %v5471_v55 = vadd.f32 1.0, %v8074_v51  ;;  %v7828_v23 = vld [vmem:[#allocation13 + $0x20] ss:$12 sps:$4 sm:$0xff]   ;;  %v7832_v51 = vld [vmem:[#allocation13 + $0x38] ss:$12 sps:$4 sm:$0xff]  }
0x1065   :  { %8079 = vrcp.f32 %v5464_v40  ;;  %v7831_v40 = vld [vmem:[#allocation13 + $0x34] ss:$12 sps:$4 sm:$0xff]  }
0x1066   :  { %8081 = vrcp.f32 %v5471_v55  ;;  %v7840_v55 = vld [vmem:[#allocation13 + $0x68] ss:$12 sps:$4 sm:$0xff]  }
0x106e   :  { %v8078_v42 = vpop.eup %8077 }
0x106f   :  { %v8080_v9 = vpop.eup %8079  ;;  %v5478_v57 = vmul.f32 %v8078_v42, %v8076_v60  ;;  %v7835_v60 = vld [vmem:[#allocation13 + $0x4c] ss:$12 sps:$4 sm:$0xff]   ;;  %v7833_v42 = vld [vmem:[#allocation13 + $0x48] ss:$12 sps:$4 sm:$0xff]  }
0x1070   :  { %v5477_v44 = vmul.f32 %v8080_v9, %v5475_v7  ;;  %v8082_v58 = vpop.eup %8081  ;;  %v7836_v7 = vld [vmem:[#allocation13 + $0x50] ss:$12 sps:$4 sm:$0xff]  }
0x1071   :  { %v7839_v9 = vld [vmem:[#allocation13 + $0x64] ss:$12 sps:$4 sm:$0xff]  }
0x1072   :  { %v9584_v54 = vadd.f32 %v5478_v57, %v5477_v44  ;;  %v7837_v57 = vld [vmem:[#allocation13 + $0x60] ss:$12 sps:$4 sm:$0xff]   ;;  %v7843_v44 = vld [vmem:[#allocation13 + $0x7c] ss:$12 sps:$4 sm:$0xff]  }
0x1074   :  { %8083 = vtanh.f32 %v9584_v54 }
0x107e   :  { %v8084_v59 = vpop.eup %8083 }
0x107f   :  { %v5481_v36 = vmul.f32 %v8084_v59, %v8082_v58  ;;  %v7844_v58 = vld [vmem:[#allocation13 + $0x80] ss:$12 sps:$4 sm:$0xff]  }
0x1080   :  { %v7847_v59 = vld [vmem:[#allocation13 + $0x94] ss:$12 sps:$4 sm:$0xff]  }
0x1081   :  { %5482 = vst [vmem:[#allocation2 + $0x8] sm:$0xc] %v5481_v36  ;;  %5483 = vst [vmem:[#allocation3 + $0x2] sm:$0xc] %v5481_v36  ;;  %v5484_v39 = vpack.c.bf16 %v5481_v36, %v5481_v36  ;;  %v7845_v36 = vld [vmem:[#allocation13 + $0x90] ss:$12 sps:$4 sm:$0xff]  }
0x1083   :  { %v5518_v13 = vrot.slane %v5484_v39, 1  ;;  %v7848_v39 = vld [vmem:[#allocation13 + $0x98] ss:$12 sps:$4 sm:$0xff]  }
0x1085   :  { %5713 = vmatmul.mubr.bf16.vlgmr.msra.gmra.mrb[64].mxu1 %v5518_v13  ;;  %5754 = vmatmul.mubr.bf16.vlgmr.msra.gmra.mrb[68].mxu0 %v5518_v13  ;;  %v7851_v13 = vld [vmem:[#allocation13 + $0xac] ss:$12 sps:$4 sm:$0xff]  }
0x1086   :  { %6004 = vmatpush1.bf16.msra.mxu1 %v9401_v19  ;;  %6045 = vmatpush1.bf16.msra.mxu0 %v9403_v52  ;;  %v9764_v19 = vmov 0.0  }
0x1087   :  { %6005 = vmatprep.subr.bf16.mxu1 %v9409_v18  ;;  %6046 = vmatprep.subr.bf16.mxu0 %v9411_v21 }
0x1088   :  { %6035 = vmatprep.mubr.bf16.mxu1 %v9746_v46  ;;  %6076 = vmatprep.mubr.bf16.mxu0 %v9746_v46 }
0x108a   :  { %6006 = vmatpush1.bf16.msra.mxu1 %v9413_v5  ;;  %6047 = vmatpush1.bf16.msra.mxu0 %v9415_v6 }
0x108b   :  { %6007 = vmatprep.subr.bf16.mxu1 %v9421_v3  ;;  %6048 = vmatprep.subr.bf16.mxu0 %v9423_v12 }
0x108e   :  { %6008 = vmatpush1.bf16.msra.mxu1 %v9425_v8  ;;  %6049 = vmatpush1.bf16.msra.mxu0 %v9427_v20 }
0x108f   :  { %6009 = vmatprep.subr.bf16.mxu1 %v9435_v50  ;;  %6050 = vmatprep.subr.bf16.mxu0 %v9439_v10 }
0x1092   :  { %6010 = vmatpush1.bf16.msra.mxu1 %v9433_v49  ;;  %6051 = vmatpush1.bf16.msra.mxu0 %v9437_v35 }
0x1093   :  { %6011 = vmatprep.subr.bf16.mxu1 %v9441_v37  ;;  %6052 = vmatprep.subr.bf16.mxu0 %v9444_v0 }
0x1096   :  { %6012 = vmatpush1.bf16.msra.mxu1 %v9448_v14  ;;  %6053 = vmatpush1.bf16.msra.mxu0 %v9452_v16 }
0x1097   :  { %6013 = vmatprep.subr.bf16.mxu1 %v9454_v17  ;;  %6054 = vmatprep.subr.bf16.mxu0 %v9457_v53 }
0x109a   :  { %6014 = vmatpush1.bf16.msra.mxu1 %v9460_v11  ;;  %6055 = vmatpush1.bf16.msra.mxu0 %v9464_v38 }
0x109b   :  { %6015 = vmatprep.subr.bf16.mxu1 %v9466_v47  ;;  %6056 = vmatprep.subr.bf16.mxu0 %v9469_v41 }
0x109e   :  { %6016 = vmatpush1.bf16.msra.mxu1 %v9472_v28  ;;  %6057 = vmatpush1.bf16.msra.mxu0 %v9476_v43  ;;  %v5798_v43 = vrot.slane %v9584_v54, 6  ;;  %v7841_v54 = vld [vmem:[#allocation13 + $0x78] ss:$12 sps:$4 sm:$0xff]  }
0x109f   :  { %6017 = vmatprep.subr.bf16.mxu1 %v9478_v33  ;;  %6058 = vmatprep.subr.bf16.mxu0 %v9481_v56 }
0x10a2   :  { %6018 = vmatpush1.bf16.msra.mxu1 %v9484_v29  ;;  %6059 = vmatpush1.bf16.msra.mxu0 %v9488_v1 }
0x10a3   :  { %7447 = vmatprep.subr.bf16.mxu0 %v9764_v19  ;;  %6314 = vmatprep.subr.bf16.mxu1 %v7823_v63  ;;  %v6133_v63 = vld [vmem:[#allocation3 + $0x8] sm:$0xff] }
0x1158   :  { %v5714_v52 = vpop.f32.mrb[64].mxu1  ;;  %v5755_v18 = vpop.f32.mrb[68].mxu0 }
0x1159   :  { %v5766_v21 = vrot.slane %v5714_v52, 4  ;;  %v5716_v5 = vpop.f32.mrb[65].mxu1  ;;  %v5757_v6 = vpop.f32.mrb[69].mxu0  ;;  %v5768_v16 = vrot.slane %v5755_v18, 4  ;;  %v7849_v52 = vld [vmem:[#allocation13 + $0xa8] ss:$12 sps:$4 sm:$0xff]  }
0x115a   :  { %v5767_v3 = vrot.slane %v5716_v5, 4  ;;  %v5718_v12 = vpop.f32.mrb[66].mxu1  ;;  %v5759_v8 = vpop.f32.mrb[70].mxu0  ;;  %v5769_v0 = vrot.slane %v5757_v6, 4  ;;  %v7852_v18 = vld [vmem:[#allocation13 + $0xb0] ss:$12 sps:$4 sm:$0xff]  }
0x115b   :  { %v5774_v20 = vadd.f32 %v5766_v21, %v9276_v45  ;;  %v5719_v49 = vpop.f32.mrb[67].mxu1  ;;  %v5760_v50 = vpop.f32.mrb[71].mxu0  ;;  %v5776_v53 = vadd.f32 %v5768_v16, %v9280_v31 }
0x115c   :  { %v5775_v35 = vadd.f32 %v5767_v3, %v9284_v27  ;;  %v5777_v14 = vadd.f32 %v5769_v0, %v9288_v25 }
0x115d   :  { %v7321_v10 = vmul.f32 -1.442695, %v5774_v20 }
0x115e   :  { %v7322_v37 = vmul.f32 -1.442695, %v5775_v35  ;;  %v7323_v17 = vmul.f32 -1.442695, %v5777_v14 }
0x115f   :  { %8085 = vpow2.f32 %v7321_v10 }
0x1160   :  { %8087 = vpow2.f32 %v7322_v37 }
0x1161   :  { %8089 = vpow2.f32 %v7323_v17 }
0x1162   :  { %8091 = vtanh.f32 %v5776_v53 }
0x1169   :  { %v8086_v11 = vpop.eup %8085 }
0x116a   :  { %v8088_v38 = vpop.eup %8087  ;;  %v5781_v47 = vadd.f32 1.0, %v8086_v11 }
0x116b   :  { %v5787_v45 = vadd.f32 1.0, %v8088_v38  ;;  %v8090_v27 = vpop.eup %8089 }
0x116c   :  { %8093 = vrcp.f32 %v5781_v47  ;;  %v8092_v41 = vpop.eup %8091  ;;  %v5794_v25 = vadd.f32 1.0, %v8090_v27 }
0x116d   :  { %8095 = vrcp.f32 %v5787_v45 }
0x116e   :  { %8097 = vrcp.f32 %v5794_v25 }
0x1176   :  { %v8094_v28 = vpop.eup %8093 }
0x1177   :  { %v8096_v33 = vpop.eup %8095  ;;  %v5801_v56 = vmul.f32 %v8094_v28, %v8092_v41 }
0x1178   :  { %v5800_v29 = vmul.f32 %v8096_v33, %v5798_v43  ;;  %v8098_v31 = vpop.eup %8097 }
0x117a   :  { %v9625_v1 = vadd.f32 %v5801_v56, %v5800_v29 }
0x117c   :  { %8099 = vtanh.f32 %v9625_v1  ;;  %v6121_v43 = vrot.slane %v9625_v1, 6 }
0x1186   :  { %v8100_v2 = vpop.eup %8099 }
0x1187   :  { %v5804_v61 = vmul.f32 %v8100_v2, %v8098_v31 }
0x1189   :  { %5805 = vst [vmem:[#allocation2 + $0x8] sm:$0x30] %v5804_v61  ;;  %5806 = vst [vmem:[#allocation3 - $0x2] sm:$0x30] %v5804_v61  ;;  %v5807_v62 = vpack.c.bf16 %v5804_v61, %v5804_v61  ;;  %v6130_v61 = vld [vmem:[#allocation2] sm:$0xff] }
0x118b   :  { %v5841_v32 = vrot.slane %v5807_v62, 2 }
0x118d   :  { %6036 = vmatmul.mubr.bf16.vlgmr.msra.gmra.mrb[68].mxu1 %v5841_v32  ;;  %6077 = vmatmul.mubr.bf16.vlgmr.msra.gmra.mrb[72].mxu0 %v5841_v32 }
0x118e   :  { %6346 = vmatprep.mubr.bf16.mxu1 %v9746_v46  ;;  %7463 = vmatprep.mubr.msk.bf16.mxu0 %vm8326_vm0, %v9764_v19  ;;  %v7829_v46 = vld [vmem:[#allocation13 + $0x30] ss:$12 sps:$4 sm:$0xff]  }
0x118f   :  { %6315 = vmatpush1.bf16.msra.mxu1 %v7821_v24  ;;  %7448 = vmatpush3.bf16.msra.mxu0 %v7824_v4  ;;  %v9765_v24 = vld [vmem:[#allocation22_spill] sm:$0xff] }
0x1190   :  { %7449 = vmatprep.subr.bf16.mxu0 %v9764_v19  ;;  %6316 = vmatprep.subr.bf16.mxu1 %v7827_v34 }
0x1193   :  { %6317 = vmatpush1.bf16.msra.mxu1 %v7825_v26  ;;  %7450 = vmatpush3.bf16.msra.mxu0 %v7828_v23  ;;  %v6169_v26 = vld [vmem:[%s9699_s9] sm:$0x7]  ;;  %v9766_v23 = vld [vmem:[#allocation24_spill] sm:$0xff] }
0x1194   :  { %7451 = vmatprep.subr.bf16.mxu0 %v9764_v19  ;;  %6318 = vmatprep.subr.bf16.mxu1 %v7831_v40  ;;  %v6174_v40 = vrot.slane %v6169_v26, %v9766_v23  ;;  %v7385_v23 = vld [vmem:[%s9701_s11] ss:$0 sm:$0xff] }
0x1197   :  { %6319 = vmatpush1.bf16.msra.mxu1 %v7829_v46  ;;  %7452 = vmatpush3.bf16.msra.mxu0 %v7832_v51  ;;  %v9767_v46 = vld [vmem:[#allocation25_spill] sm:$0xff] }
0x1198   :  { %7453 = vmatprep.subr.bf16.mxu0 %v9764_v19  ;;  %6320 = vmatprep.subr.bf16.mxu1 %v7835_v60  ;;  %v6182_v51 = vrot.slane %v6169_v26, %v9767_v46 }
0x119b   :  { %6321 = vmatpush1.bf16.msra.mxu1 %v7833_v42  ;;  %7454 = vmatpush3.bf16.msra.mxu0 %v7836_v7  ;;  %v9768_v7 = vld [vmem:[#allocation26_spill] sm:$0xff] }
0x119c   :  { %7455 = vmatprep.subr.bf16.mxu0 %v9764_v19  ;;  %6322 = vmatprep.subr.bf16.mxu1 %v7839_v9  ;;  %v6178_v9 = vrot.slane %v6169_v26, %v9768_v7 }
0x119f   :  { %6323 = vmatpush1.bf16.msra.mxu1 %v7837_v57  ;;  %7456 = vmatpush3.bf16.msra.mxu0 %v7840_v55 }
0x11a0   :  { %6324 = vmatprep.subr.bf16.mxu1 %v7843_v44  ;;  %7457 = vmatprep.subr.bf16.mxu0 %v9764_v19 }
0x11a3   :  { %6325 = vmatpush1.bf16.msra.mxu1 %v7841_v54  ;;  %7458 = vmatpush3.bf16.msra.mxu0 %v7844_v58 }
0x11a4   :  { %6326 = vmatprep.subr.bf16.mxu1 %v7847_v59  ;;  %7459 = vmatprep.subr.bf16.mxu0 %v9764_v19 }
0x11a7   :  { %6327 = vmatpush1.bf16.msra.mxu1 %v7845_v36  ;;  %7460 = vmatpush3.bf16.msra.mxu0 %v7848_v39 }
0x11a8   :  { %6328 = vmatprep.subr.bf16.mxu1 %v7851_v13  ;;  %7461 = vmatprep.subr.bf16.mxu0 %v9764_v19 }
0x11ab   :  { %6329 = vmatpush1.bf16.msra.mxu1 %v7849_v52  ;;  %7462 = vmatpush3.bf16.msra.mxu0 %v7852_v18 }
0x11ac   :  { %7467 = vmatprep.subr.bf16.mxu0 %v9764_v19 }
0x1260   :  { %v6037_v21 = vpop.f32.mrb[68].mxu1  ;;  %v6078_v5 = vpop.f32.mrb[72].mxu0 }
0x1261   :  { %v6089_v6 = vrot.slane %v6037_v21, 2  ;;  %v6039_v3 = vpop.f32.mrb[69].mxu1  ;;  %v6080_v12 = vpop.f32.mrb[73].mxu0  ;;  %v6091_v53 = vrot.slane %v6078_v5, 2 }
0x1262   :  { %v6090_v8 = vrot.slane %v6039_v3, 2  ;;  %v6041_v20 = vpop.f32.mrb[70].mxu1  ;;  %v6082_v49 = vpop.f32.mrb[74].mxu0  ;;  %v6092_v16 = vrot.slane %v6080_v12, 2  ;;  %v9769_v12 = vld [vmem:[#allocation23_spill] sm:$0xff] }
0x1263   :  { %v6097_v50 = vadd.f32 %v6089_v6, %v9292_v48  ;;  %v6042_v35 = vpop.f32.mrb[71].mxu1  ;;  %v6083_v10 = vpop.f32.mrb[75].mxu0  ;;  %v6099_v38 = vadd.f32 %v6091_v53, %v9763_v30  ;;  %v6448_v20 = vand.u32 1, %v9769_v12  ;;  %v6472_v49 = vand.u32 1, %v9765_v24  ;;  %v7859_v24 = vld [vmem:[#allocation15 + $0x30] sm:$0xff]  }
0x1264   :  { %v6098_v37 = vadd.f32 %v6090_v8, %v9300_v15  ;;  %v6100_v17 = vadd.f32 %v6092_v16, %v9762_v22  ;;  %v6443_v8 = vadd.s32 8, %v9769_v12 }
0x1265   :  { %v7356_v0 = vmul.f32 -1.442695, %v6097_v50  ;;  %vm6480_vm8 = vcmp.eq.s32.totalorder %v6448_v20, %v6472_v49 }
0x1266   :  { %v7357_v14 = vmul.f32 -1.442695, %v6098_v37  ;;  %v7358_v11 = vmul.f32 -1.442695, %v6100_v17  ;;  %v6455_v50 = vand.u32 1, %v6443_v8 }
0x1267   :  { %8101 = vpow2.f32 %v7356_v0 }
0x1268   :  { %8103 = vpow2.f32 %v7357_v14  ;;  %vm6481_vm10 = vcmp.eq.s32.totalorder %v6455_v50, %v6472_v49 }
0x1269   :  { %8105 = vpow2.f32 %v7358_v11 }
0x126a   :  { %8107 = vtanh.f32 %v6099_v38 }
0x1271   :  { %v8102_v47 = vpop.eup %8101 }
0x1272   :  { %v8104_v45 = vpop.eup %8103  ;;  %v6104_v27 = vadd.f32 1.0, %v8102_v47 }
0x1273   :  { %v6110_v48 = vadd.f32 1.0, %v8104_v45  ;;  %v8106_v15 = vpop.eup %8105 }
0x1274   :  { %8109 = vrcp.f32 %v6104_v27  ;;  %v8108_v41 = vpop.eup %8107  ;;  %v6117_v22 = vadd.f32 1.0, %v8106_v15 }
0x1275   :  { %8111 = vrcp.f32 %v6110_v48 }
0x1276   :  { %8113 = vrcp.f32 %v6117_v22 }
0x127e   :  { %v8110_v28 = vpop.eup %8109 }
0x127f   :  { %v8112_v33 = vpop.eup %8111  ;;  %v6124_v56 = vmul.f32 %v8110_v28, %v8108_v41 }
0x1280   :  { %v6123_v25 = vmul.f32 %v8112_v33, %v6121_v43  ;;  %v8114_v30 = vpop.eup %8113 }
0x1282   :  { %v6125_v29 = vadd.f32 %v6124_v56, %v6123_v25 }
0x1284   :  { %8115 = vtanh.f32 %v6125_v29 }
0x128e   :  { %v8116_v31 = vpop.eup %8115 }
0x128f   :  { %v6127_v2 = vmul.f32 %v8116_v31, %v8114_v30  ;;  %v7853_v30 = vld [vmem:[#allocation15] sm:$0xff]  }
0x1291   :  { %6128 = vst [vmem:[#allocation2 + $0x8] sm:$0xc0] %v6127_v2  ;;  %6129 = vst [vmem:[#allocation3 - $0x6] sm:$0xc0] %v6127_v2  ;;  %v7854_v2 = vld [vmem:[#allocation15 + $0x8] sm:$0xff]  }
0x1298   :  { %v6131_v62 = vld [vmem:[#allocation2 + $0x8] sm:$0xff]  ;;  %v6132_v32 = vld [vmem:[#allocation3] sm:$0xff] }
0x1299   :  { %v6134_v4 = vsel %vm311_vm4, %v6130_v61, %v6132_v32  ;;  %v6135_v1 = vsel %vm311_vm4, %v6131_v62, %v6133_v63  ;;  %v7855_v61 = vld [vmem:[#allocation15 + $0x10] sm:$0xff]   ;;  %v7856_v62 = vld [vmem:[#allocation15 + $0x18] sm:$0xff]   ;;  %v7857_v32 = vld [vmem:[#allocation15 + $0x20] sm:$0xff]  }
0x129a   :  { %v6136_v34 = vpack.c.bf16 %v6135_v1, %v6134_v4  ;;  %v7858_v63 = vld [vmem:[#allocation15 + $0x28] sm:$0xff]   ;;  %v7860_v4 = vld [vmem:[#allocation15 + $0x38] sm:$0xff]  }
0x129c   :  { %6347 = vmatmul.mubr.bf16.vlgmr.msra.gmra.mrb[72].mxu1 %v6136_v34  ;;  %7464 = vmatmul.mubr.bf16.vlgmr.msra.gmra.mrb[76].mxu0 %v6136_v34 }
0x129d   :  { %7469 = vmatprep.mubr.msk.bf16.mxu0 %vm8326_vm0, %v9764_v19 }
0x136f   :  { %v6348_v60 = vpop.f32.mrb[72].mxu1  ;;  %v6391_v42 = vpop.f32.mrb[76].mxu0 }
0x1370   :  { %v6350_v57 = vpop.f32.mrb[73].mxu1  ;;  %v7465_v55 = vpop.f32.mrb[77].mxu0  ;;  %v6349_v58 = vadd.f32 %v6348_v60, %v6174_v40  ;;  %v6392_v59 = vadd.f32 %v6391_v42, %v6182_v51 }
0x1371   :  { %v6352_v44 = vpop.f32.mrb[74].mxu1  ;;  %v6394_v54 = vpop.f32.mrb[78].mxu0  ;;  %v6351_v18 = vadd.f32 %v6350_v57, %v6178_v9 }
0x1372   :  { %v6353_v36 = vadd.f32 %v6352_v44, %v6174_v40  ;;  %v6395_v39 = vadd.f32 %v6394_v54, %v6182_v51  ;;  %v6354_v13 = vpop.f32.mrb[75].mxu1  ;;  %v7466_v52 = vpop.f32.mrb[79].mxu0 }
0x1373   :  { %v6355_v21 = vadd.f32 %v6354_v13, %v6178_v9 }
0x1374   :  { %v6398_v5 = vpack.c.bf16 %v6353_v36, %v6349_v58  ;;  %v7500_v6 = vpack.c.bf16 %v6395_v39, %v6392_v59 }
0x1375   :  { %v6399_v3 = vpack.c.bf16 %v6355_v21, %v6351_v18 }
0x1376   :  { %7501 = vmatprep.subr.bf16.mxu1 %v7500_v6 }
0x1377   :  { %7468 = vmatpush3.bf16.xpose.msra.mxu0 %v6399_v3  ;;  %7503 = vmatpush3.bf16.msra.mxu1 %v7500_v6 }
0x1378   :  { %7480 = vmatprep.subr.bf16.mxu1 %v9764_v19 }
0x137e   :  { %7470 = vmatmul.mubr.bf16.vlgmr.msra.gmra.mrb[80].mxu0 %v6398_v5 }
0x1451   :  { %v6434_v35 = vpop.f32.mrb[80].mxu0 }
0x1452   :  { %v6482_v10 = vsel %vm6480_vm8, %v6434_v35, -1e+09  ;;  %v7471_v37 = vpop.f32.mrb[81].mxu0 }
0x1453   :  { %v6437_v0 = vpop.f32.mrb[82].mxu0  ;;  %v6485_v14 = vsel %vm6484_vm9, %v6482_v10, -inf }
0x1454   :  { %v6483_v16 = vsel %vm6481_vm10, %v6437_v0, -1e+09  ;;  %6486 = vmax.xlane.f32.xlu1 %v6485_v14  ;;  %v7472_v17 = vpop.f32.mrb[83].mxu0 }
0x1455   :  { %v6488_v53 = vsel %vm6484_vm9, %v6483_v16, -inf }
0x1458   :  { %6489 = vmax.xlane.f32.xlu1 %v6488_v53 }
0x14e1   :  { %v6487_v11 = vpop.xlane.xlu1 %6486 }
0x14e2   :  { %v6491_v38 = vsub.f32 %v6482_v10, %v6487_v11 }
0x14e4   :  { %v6493_v47 = vmul.f32 1.442695, %v6491_v38 }
0x14e5   :  { %v6490_v45 = vpop.xlane.xlu1 %6489 }
0x14e6   :  { %8117 = vpow2.f32 %v6493_v47  ;;  %v6492_v27 = vsub.f32 %v6483_v16, %v6490_v45 }
0x14e8   :  { %v6495_v48 = vmul.f32 1.442695, %v6492_v27 }
0x14ea   :  { %8119 = vpow2.f32 %v6495_v48 }
0x14f0   :  { %v8118_v15 = vpop.eup %8117 }
0x14f1   :  { %v6497_v41 = vsel %vm6484_vm9, %v8118_v15, 0.0 }
0x14f2   :  { %6498 = vadd.xlane.f32.xlu0 %v6497_v41 }
0x14f4   :  { %v8120_v28 = vpop.eup %8119 }
0x14f5   :  { %v6500_v43 = vsel %vm6484_vm9, %v8120_v28, 0.0 }
0x14f6   :  { %6501 = vadd.xlane.f32.xlu1 %v6500_v43 }
0x157f   :  { %v6499_v33 = vpop.xlane.xlu0 %6498 }
0x1580   :  { %8121 = vrcp.f32 %v6499_v33 }
0x1583   :  { %v6502_v56 = vpop.xlane.xlu1 %6501 }
0x1584   :  { %8123 = vrcp.f32 %v6502_v56 }
0x158a   :  { %v8122_v22 = vpop.eup %8121 }
0x158b   :  { %v6504_v25 = vmul.f32 %v8122_v22, %v8118_v15 }
0x158d   :  { %7477 = vmatprep.mubr.msk.f32.mxu1 %vm6484_vm9, %v6504_v25 }
0x158e   :  { %v8124_v29 = vpop.eup %8123 }
0x158f   :  { %v6506_v31 = vmul.f32 %v8124_v29, %v8120_v28 }
0x1591   :  { %7478 = vmatmul.mubr.msk.f32.vlgmr.msra.gmra.mrb[76].mxu1 %vm6484_vm9, %v6506_v31 }
0x1592   :  { %7481 = vmatpush3.bf16.msra.mxu1 %v7853_v30  ;;  %7496 = vmatprep.mubr.msk.bf16.mxu1 %vm8326_vm0, %v9764_v19 }
0x1593   :  { %7482 = vmatprep.subr.bf16.mxu1 %v9764_v19 }
0x1596   :  { %7483 = vmatpush3.bf16.msra.mxu1 %v7854_v2 }
0x1597   :  { %7484 = vmatprep.subr.bf16.mxu1 %v9764_v19 }
0x159a   :  { %7485 = vmatpush3.bf16.msra.mxu1 %v7855_v61 }
0x159b   :  { %7486 = vmatprep.subr.bf16.mxu1 %v9764_v19 }
0x159e   :  { %7487 = vmatpush3.bf16.msra.mxu1 %v7856_v62 }
0x159f   :  { %7488 = vmatprep.subr.bf16.mxu1 %v9764_v19 }
0x15a2   :  { %7489 = vmatpush3.bf16.msra.mxu1 %v7857_v32 }
0x15a3   :  { %7490 = vmatprep.subr.bf16.mxu1 %v9764_v19 }
0x15a6   :  { %7491 = vmatpush3.bf16.msra.mxu1 %v7858_v63 }
0x15a7   :  { %7492 = vmatprep.subr.bf16.mxu1 %v9764_v19 }
0x15aa   :  { %7493 = vmatpush3.bf16.msra.mxu1 %v7859_v24 }
0x15ab   :  { %7494 = vmatprep.subr.bf16.mxu1 %v9764_v19 }
0x15ae   :  { %7495 = vmatpush3.bf16.msra.mxu1 %v7860_v4 }
0x1664   :  { %v7479_v1 = vpop.f32.mrb[76].mxu1 }
0x1665   :  { %v6579_v34 = vpop.f32.mrb[77].mxu1 }
0x1666   :  { %v6588_v26 = vpack.c.bf16 %v7479_v1, %v6579_v34 }
0x1668   :  { %7497 = vmatmul.mubr.bf16.vlgmr.msra.gmra.mrb[80].mxu1 %v6588_v26 }
0x173b   :  { %v6694_v40 = vpop.f32.mrb[80].mxu1 }
0x173c   :  { %v6695_v46 = vadd.f32 %v7385_v23, %v6694_v40  ;;  %v7498_v51 = vpop.f32.mrb[81].mxu1 }
0x173d   :  { %v6697_v60 = vpop.f32.mrb[82].mxu1 }
0x173e   :  { %6701 = vst [vmem:[#allocation16] sm:$0xff] %v6695_v46  ;;  %v6698_v42 = vadd.f32 %v7385_v23, %v6697_v60  ;;  %v7499_v7 = vpop.f32.mrb[83].mxu1 }
0x1740   :  { %6702 = vst [vmem:[#allocation16 + $0x8] sm:$0xff] %v6698_v42 }
0x1741   :  { %8290 = shalt.err (!%p8287_p4)
}
0x1742   :  { %s8291_s5 = scalar_lea.hbm %s9702_s12, 256 }
0x1743   :  { %p8292_p5 = scmp.ne.s32.totalorder %s9702_s12, %s8291_s5  ;;  %p8295_p6 = scmp.lt.u32.totalorder %s8291_s5, %s9702_s12 }
0x1745   :  { %p8297_p7 = pnand %p8295_p6, %p8292_p5 }
0x1747   :  { %8300 = shalt.err (!%p8297_p7)
}
0x1748   :  { %s8329_s15 = smov 128   ;;  %s8330_s1 = smov 8  }
0x1749   :  { %6714 = dma.vmem_to_hbm [thread:$0]  %s6709_s26, 256, %s9702_s12, [#allocation6], %s8329_s15, %s8329_s15, %s8330_s1  }
0x174a   :  { %8309 = dma.done.wait [#allocation6], 256  }
0x174b   :  { %8310 = vsyncadd [#allocation6], 4294967040 }
0x174c   :  { %6718 = vsyncpa [#allocation5], 1 }
0x174d   :  { %6719 = vsyncpa [#allocation8], 1 }
0x174e   :  { %6720 = vsyncpa [#allocation11], 1 }
0x174f   :  { %6721 = vsyncpa [#allocation14], 1 }
0x1750   :  { %6722 = vsyncpa [#allocation6], 1 }

</bundles_post_ra>
